<compile_context>
chip_gen: v7x
topology: tpu7x:2x2x1
jax: 0.10.0
libtpu: 0.0.40
codegen_flags: <defaults>
</compile_context>

<pallas_src>
import math

import jax
import jax.numpy as jnp
from jax import lax
from jax.experimental import pallas as pl
from jax.experimental.pallas import tpu as pltpu


# ---------------------------------------------------------------------------
# Kernel
# ---------------------------------------------------------------------------
def _rel_pos_mha_kernel(x_ref, wq_ref, wkv_ref, pk_ref, bu_ref, bv_ref,
                        wo_ref, bo_ref, out_ref, attn_ref=None):
    """One (batch, head-block) grid step of the RelPosMHAXL forward."""
    L = x_ref.shape[1]
    hb = bu_ref.shape[1]           # heads in this block
    hd = bu_ref.shape[-1]          # head dim
    j = pl.program_id(1)           # head-block index (innermost grid axis)
    cdt = x_ref.dtype              # MXU operand dtype (bf16 by default)

    x = x_ref[0]                                                     # (L, E)

    # Block-wide projections: full-lane MXU matmuls over all hb heads at once.
    # w_q is pre-scaled by 1/sqrt(E); q kept f32 for the bias adds, k|v are
    # produced directly in the MXU operand dtype.
    q = jnp.dot(x, wq_ref[0], preferred_element_type=jnp.float32)    # (L, hb*hd)
    kv = jnp.dot(x, wkv_ref[0], preferred_element_type=cdt)          # (L, 2*hb*hd)

    # Per-row relative shift amount: bd_s[i, :] = bd[i, (L-1-i):(2L-1-i)]
    row_shift = (L - 1) - lax.broadcasted_iota(jnp.int32, (L, 1), 0)  # (L, 1)

    ctx_parts = []
    for h in range(hb):            # static unroll over heads in the block
        q_h = q[:, h * hd:(h + 1) * hd]                               # (L, hd) f32
        k_h = kv[:, h * hd:(h + 1) * hd]                              # (L, hd) cdt
        v_h = kv[:, (hb + h) * hd:(hb + h + 1) * hd]                  # (L, hd) cdt
        pk_h = pk_ref[0, h]                                           # (2L, hd) cdt

        # biases pre-scaled by 1/sqrt(E)
        q_u = (q_h + bu_ref[0, h]).astype(cdt)
        q_v = (q_h + bv_ref[0, h]).astype(cdt)

        # matrix_ac[i, j] = (q+u)[i] . k[j]
        ac = lax.dot_general(q_u, k_h, (((1,), (1,)), ((), ())),
                             preferred_element_type=jnp.float32)      # (L, L)
        # matrix_bd[i, p] = (q+v)[i] . p_k[p]
        bd = lax.dot_general(q_v, pk_h, (((1,), (1,)), ((), ())),
                             preferred_element_type=jnp.float32)      # (L, 2L)

        # Relative shift: bd_s[i, j] = bd[i, j + (L-1-i)].
        # log2(L) barrel-shift steps: XLU rotate (pltpu.roll) + per-row select.
        # roll by (2L - step) == roll by -step == left-rotate by `step`.
        # The zero-padded column 2L-1 is never selected (max src idx = 2L-2).
        cur = bd
        step = 1
        while step < L:                                  # static python loop
            rolled = pltpu.roll(cur, shift=2 * L - step, axis=1)
            cur = jnp.where((row_shift & step) != 0, rolled, cur)
            step *= 2

        # Softmax (1/sqrt(E) already folded into w_q / biases); f32 math.
        score = ac + cur[:, :L]
        score = score - jnp.max(score, axis=-1, keepdims=True)
        e = jnp.exp(score)
        s = jnp.sum(e, axis=-1, keepdims=True)
        r = pl.reciprocal(s, approx=True)                # EUP
        r = r * (2.0 - s * r)                            # one Newton step
        attn = e * r

        attn_c = attn.astype(cdt)
        if attn_ref is not None:                         # static python branch
            attn_ref[0, h] = (attn_c if attn_ref.dtype == cdt
                              else attn.astype(attn_ref.dtype))

        # Context for this head, directly in the MXU operand dtype.
        ctx_parts.append(jnp.dot(attn_c, v_h, preferred_element_type=cdt))

    ctx = ctx_parts[0] if hb == 1 else jnp.concatenate(ctx_parts, axis=1)
    # Out-projection partial for this head block, full-lane matmul.
    partial = jnp.dot(ctx, wo_ref[0], preferred_element_type=jnp.float32)  # (L, E)

    @pl.when(j == 0)
    def _():
        out_ref[0] = jnp.broadcast_to(
            bo_ref[...], out_ref.shape[1:]).astype(out_ref.dtype)

    out_ref[0] += partial.astype(out_ref.dtype)


# ---------------------------------------------------------------------------
# Wrapper
# ---------------------------------------------------------------------------
def _vmem_estimate(L, E, hd, hb, cbytes, abytes, ret_attn):
    """Rough per-grid-step VMEM footprint (double-buffered blocks + temps)."""
    blk = (L * E * cbytes                       # x
           + 3 * E * hb * hd * cbytes           # w_q + w_kv
           + hb * 2 * L * hd * cbytes           # p_k
           + 2 * hb * hd * 4 + E * 4            # biases
           + hb * hd * E * cbytes               # w_o
           + L * E * 4)                         # out block
    if ret_attn:
        blk += hb * L * L * abytes
    temps = 3 * L * 2 * L * 4 + 3 * L * L * 4 + L * 3 * hb * hd * (4 + cbytes)
    return 2 * blk + temps


def _choose_heads_per_block(H, hd, L, E, cbytes, abytes, ret_attn,
                            budget=40 << 20):
    """Largest divisor of H whose per-step footprint fits the VMEM budget."""
    for hb in sorted((d for d in range(1, H + 1) if H % d == 0), reverse=True):
        if _vmem_estimate(L, E, hd, hb, cbytes, abytes, ret_attn) <= budget:
            return hb
    return 1


def rel_pos_mha_xl(x, pos_embs_2d, params, num_heads,
                   compute_dtype=jnp.bfloat16,
                   attn_dtype=jnp.float32,
                   return_attn=True,
                   heads_per_block=None):
    """x: (B, L, E); pos_embs_2d: (2L-1, E).

    Returns (out (B,L,E) f32, attn (B,H,L,L)) when return_attn, else out only.
    """
    B, L, E = x.shape
    H = num_heads
    hd = E // H
    scale = 1.0 / math.sqrt(E)
    cdt = jnp.dtype(compute_dtype)
    adt = jnp.dtype(attn_dtype)

    w_in = params["in_proj_weight"].astype(jnp.float32)    # (3E, E), head-interleaved rows
    w_pos = params["linear_pos_weight"].astype(jnp.float32)
    w_out = params["out_proj_weight"].astype(jnp.float32)
    b_out = params["out_proj_bias"].astype(jnp.float32)

    if heads_per_block is None:
        hb = _choose_heads_per_block(H, hd, L, E, cdt.itemsize, adt.itemsize,
                                     return_attn)
    else:
        hb = heads_per_block
    assert H % hb == 0, "heads_per_block must divide num_heads"
    HB = H // hb

    # --- per-head weight splits (head-major), grouped into head blocks ------
    w3 = w_in.reshape(H, 3, hd, E)                    # rows: (head, {q,k,v}, dim)

    def _block_cols(w):                               # (H, E, hd) -> (HB, E, hb*hd)
        return w.reshape(HB, hb, E, hd).transpose(0, 2, 1, 3).reshape(HB, E, hb * hd)

    w_q = _block_cols(jnp.transpose(w3[:, 0], (0, 2, 1)) * scale)  # scale folded
    w_k = _block_cols(jnp.transpose(w3[:, 1], (0, 2, 1)))
    w_v = _block_cols(jnp.transpose(w3[:, 2], (0, 2, 1)))
    w_kv = jnp.concatenate([w_k, w_v], axis=2)                     # (HB, E, 2*hb*hd)

    # Batch-invariant positional projection, hoisted out of the kernel and
    # padded with one zero row to 2L rows (layout-aligned relative shift).
    p_k = pos_embs_2d.astype(jnp.float32) @ w_pos.T                # (2L-1, E)
    p_k = jnp.concatenate([p_k, jnp.zeros((1, E), p_k.dtype)], axis=0)
    p_k = jnp.transpose(p_k.reshape(2 * L, H, hd), (1, 0, 2))      # (H, 2L, hd)
    p_k = p_k.reshape(HB, hb, 2 * L, hd)

    # pos_bias_u/v stored as (hd, H), raw-reinterpreted row-major to (H, hd)
    # exactly as the module's .view(); pre-scaled by 1/sqrt(E).
    bias_u = (params["pos_bias_u"].astype(jnp.float32).reshape(H, hd) * scale
              ).reshape(HB, hb, 1, hd)
    bias_v = (params["pos_bias_v"].astype(jnp.float32).reshape(H, hd) * scale
              ).reshape(HB, hb, 1, hd)

    # out_proj split per head block: out = sum_j ctx_j @ w_o[j] + b_out
    w_o = jnp.transpose(w_out.reshape(E, H, hd), (1, 2, 0)).reshape(HB, hb * hd, E)
    b_o = b_out.reshape(1, E)

    # bf16 MXU operands by default; accumulation / softmax / out stay f32.
    cast = lambda a: a.astype(cdt)
    x_c, w_q, w_kv, p_k, w_o = map(cast, (x, w_q, w_kv, p_k, w_o))

    out_shapes = [jax.ShapeDtypeStruct((B, L, E), jnp.float32)]
    out_specs = [pl.BlockSpec((1, L, E), lambda b, j: (b, 0, 0))]   # head accumulator
    if return_attn:
        out_shapes.append(jax.ShapeDtypeStruct((B, H, L, L), adt))
        out_specs.append(pl.BlockSpec((1, hb, L, L), lambda b, j: (b, j, 0, 0)))

    vmem_est = _vmem_estimate(L, E, hd, hb, cdt.itemsize, adt.itemsize, return_attn)
    vmem_limit = int(min(max(32 << 20, int(vmem_est * 1.5)), 100 << 20))

    outs = pl.pallas_call(
        _rel_pos_mha_kernel,
        out_shape=tuple(out_shapes),
        grid_spec=pltpu.PrefetchScalarGridSpec(
            num_scalar_prefetch=0,
            # head-block axis innermost: the (1, L, E) out block stays resident
            # and accumulates per-head-block out-projection partials.
            grid=(B, HB),
            in_specs=[
                pl.BlockSpec((1, L, E), lambda b, j: (b, 0, 0)),              # x
                pl.BlockSpec((1, E, hb * hd), lambda b, j: (j, 0, 0)),        # w_q*scale
                pl.BlockSpec((1, E, 2 * hb * hd), lambda b, j: (j, 0, 0)),    # [w_k|w_v]
                pl.BlockSpec((1, hb, 2 * L, hd), lambda b, j: (j, 0, 0, 0)),  # p_k
                pl.BlockSpec((1, hb, 1, hd), lambda b, j: (j, 0, 0, 0)),      # bias_u*scale
                pl.BlockSpec((1, hb, 1, hd), lambda b, j: (j, 0, 0, 0)),      # bias_v*scale
                pl.BlockSpec((1, hb * hd, E), lambda b, j: (j, 0, 0)),        # w_o block
                pl.BlockSpec((1, E), lambda b, j: (0, 0)),                    # out bias
            ],
            out_specs=tuple(out_specs),
        ),
        compiler_params=pltpu.CompilerParams(
            dimension_semantics=("parallel", "arbitrary"),
            vmem_limit_bytes=vmem_limit),
    )(x_c, w_q, w_kv, p_k, bias_u, bias_v, w_o, b_o)

    if return_attn:
        out, attn = outs
        return out, attn
    (out,) = outs
    return out


# ---------------------------------------------------------------------------
# Pure-JAX reference (mirrors the PyTorch forward, self-attention path)
# ---------------------------------------------------------------------------
def ref_forward(x, pos_embs, params, num_heads):
    B, L, E = x.shape
    hd = E // num_heads
    scale = 1.0 / math.sqrt(E)

    qkv = x @ params["in_proj_weight"].T                       # (B, L, 3E)
    qkv = qkv.reshape(B, L, num_heads, 3 * hd)
    q, k, v = qkv[..., :hd], qkv[..., hd:2 * hd], qkv[..., 2 * hd:]

    p_k = (pos_embs @ params["linear_pos_weight"].T).reshape(1, -1, num_heads, hd)
    bu = params["pos_bias_u"].reshape(1, 1, num_heads, hd)
    bv = params["pos_bias_v"].reshape(1, 1, num_heads, hd)

    q_u = jnp.transpose(q + bu, (0, 2, 1, 3))                  # (B,H,L,hd)
    q_v = jnp.transpose(q + bv, (0, 2, 1, 3))
    ac = q_u @ jnp.transpose(k, (0, 2, 3, 1))                  # (B,H,L,L)
    bd = q_v @ jnp.transpose(p_k, (0, 2, 3, 1))                # (B,H,L,P)

    P = bd.shape[-1]
    y = jnp.pad(bd, ((0, 0), (0, 0), (0, 0), (1, 0)))
    y = y.reshape(B, num_heads, P + 1, L)[:, :, 1:, :].reshape(B, num_heads, L, P)
    bd_s = y[..., :P // 2 + 1]

    attn = jax.nn.softmax((ac + bd_s) * scale, axis=-1)
    ctx = attn @ jnp.transpose(v, (0, 2, 1, 3))                # (B,H,L,hd)
    ctx = jnp.transpose(ctx, (0, 2, 1, 3)).reshape(B, L, E)
    out = ctx @ params["out_proj_weight"].T + params["out_proj_bias"]
    return out, attn


# ---------------------------------------------------------------------------
if __name__ == "__main__":
    # Small but lane-friendly shapes: 2L = 128 lanes for the XLU rotates.
    B, L, E, H = 2, 64, 64, 4
    hd = E // H

    key = jax.random.PRNGKey(0)
    keys = jax.random.split(key, 8)

    x = jax.random.normal(keys[0], (B, L, E), jnp.float32)           # q = k = v
    pos_embs = jax.random.normal(keys[1], (1, 2 * L - 1, E), jnp.float32)

    def xavier(k, shape):
        limit = math.sqrt(6.0 / (shape[0] + shape[1]))
        return jax.random.uniform(k, shape, jnp.float32, -limit, limit)

    params = {
        "in_proj_weight": xavier(keys[2], (3 * E, E)),
        "linear_pos_weight": xavier(keys[3], (E, E)),
        "out_proj_weight": xavier(keys[4], (E, E)),
        "out_proj_bias": 0.02 * jax.random.normal(keys[5], (E,), jnp.float32),
        "pos_bias_u": xavier(keys[6], (hd, H)),
        "pos_bias_v": xavier(keys[7], (hd, H)),
    }

    ref_out, ref_attn = ref_forward(x, pos_embs, params, H)

    # 1) f32 compute path: structural check (shift / head layout / projections).
    out32, attn32 = rel_pos_mha_xl(x, pos_embs[0], params, H,
                                   compute_dtype=jnp.float32)
    jax.block_until_ready((out32, attn32))
    assert out32.shape == (B, L, E) and attn32.shape == (B, H, L, L)
    assert jnp.max(jnp.abs(out32 - ref_out)) < 5e-3
    assert jnp.max(jnp.abs(attn32 - ref_attn)) < 5e-3

    # 2) default path: bf16 MXU operands, f32 accumulation / softmax / outputs.
    out, attn = rel_pos_mha_xl(x, pos_embs[0], params, H)
    jax.block_until_ready((out, attn))
    assert jnp.max(jnp.abs(out - ref_out)) < 2e-2
    assert jnp.max(jnp.abs(attn - ref_attn)) < 2e-2

    # 3) output-only path: skips the (B,H,L,L) attention-weights HBM write.
    out_only = rel_pos_mha_xl(x, pos_embs[0], params, H, return_attn=False)
    jax.block_until_ready(out_only)
    assert jnp.max(jnp.abs(out_only - ref_out)) < 2e-2

    print("KERNEL_OK")
</pallas_src>

<mosaic_0001>
module attributes {stable_mosaic.version = 11 : i64} {
  func.func @_rel_pos_mha_kernel(%arg0: i32, %arg1: i32, %arg2: memref<1x64x64xf32, #tpu.memory_space<vmem>>, %arg3: memref<1x64x64xf32, #tpu.memory_space<vmem>>, %arg4: memref<1x64x128xf32, #tpu.memory_space<vmem>>, %arg5: memref<1x4x128x16xf32, #tpu.memory_space<vmem>>, %arg6: memref<1x4x1x16xf32, #tpu.memory_space<vmem>>, %arg7: memref<1x4x1x16xf32, #tpu.memory_space<vmem>>, %arg8: memref<1x64x64xf32, #tpu.memory_space<vmem>>, %arg9: memref<1x64xf32, #tpu.memory_space<vmem>>, %arg10: memref<1x64x64xf32, #tpu.memory_space<vmem>>, %arg11: memref<1x4x64x64xf32, #tpu.memory_space<vmem>>) attributes {dimension_semantics = [#tpu.dimension_semantics<parallel>, #tpu.dimension_semantics<arbitrary>], iteration_bounds = array<i64: 2, 1>, scalar_prefetch = 0 : i64, scratch_operands = 0 : i64, tpu.core_type = #tpu.core_type<tc>, window_params = [{transform_indices = @transform_0, window_bounds = array<i64: 1, 64, 64>}, {transform_indices = @transform_1, window_bounds = array<i64: 1, 64, 64>}, {transform_indices = @transform_2, window_bounds = array<i64: 1, 64, 128>}, {transform_indices = @transform_3, window_bounds = array<i64: 1, 4, 128, 16>}, {transform_indices = @transform_4, window_bounds = array<i64: 1, 4, 1, 16>}, {transform_indices = @transform_5, window_bounds = array<i64: 1, 4, 1, 16>}, {transform_indices = @transform_6, window_bounds = array<i64: 1, 64, 64>}, {pipeline_mode = #tpu.pipeline_mode<synchronous>, transform_indices = @transform_7, window_bounds = array<i64: 1, 64>}, {transform_indices = @transform_8, window_bounds = array<i64: 1, 64, 64>}, {transform_indices = @transform_9, window_bounds = array<i64: 1, 4, 64, 64>}]} {
    %c0 = arith.constant 0 : index
    %c0_0 = arith.constant 0 : index
    %c0_1 = arith.constant 0 : index
    %0 = vector.load %arg2[%c0, %c0_0, %c0_1] : memref<1x64x64xf32, #tpu.memory_space<vmem>>, vector<1x64x64xf32>
    %1 = vector.shape_cast %0 : vector<1x64x64xf32> to vector<64x64xf32>
    %c0_2 = arith.constant 0 : index
    %c0_3 = arith.constant 0 : index
    %c0_4 = arith.constant 0 : index
    %2 = vector.load %arg3[%c0_2, %c0_3, %c0_4] : memref<1x64x64xf32, #tpu.memory_space<vmem>>, vector<1x64x64xf32>
    %3 = vector.shape_cast %2 : vector<1x64x64xf32> to vector<64x64xf32>
    %cst = arith.constant dense<0.000000e+00> : vector<64x64xf32>
    %4 = tpu.matmul %1, %3, %cst {dimension_numbers = #tpu.dot_dimension_numbers<[1], [0], [0], [1], [0, 0, 1, 1], [], []>} : vector<64x64xf32>, vector<64x64xf32>, vector<64x64xf32> -> vector<64x64xf32>
    %c0_5 = arith.constant 0 : index
    %c0_6 = arith.constant 0 : index
    %c0_7 = arith.constant 0 : index
    %5 = vector.load %arg4[%c0_5, %c0_6, %c0_7] : memref<1x64x128xf32, #tpu.memory_space<vmem>>, vector<1x64x128xf32>
    %6 = vector.shape_cast %5 : vector<1x64x128xf32> to vector<64x128xf32>
    %cst_8 = arith.constant dense<0.000000e+00> : vector<64x128xf32>
    %7 = tpu.matmul %1, %6, %cst_8 {dimension_numbers = #tpu.dot_dimension_numbers<[1], [0], [0], [1], [0, 0, 1, 1], [], []>} : vector<64x64xf32>, vector<64x128xf32>, vector<64x128xf32> -> vector<64x128xf32>
    %8 = tpu.iota {dimensions = array<i32: 0>} : vector<64x1xi32>
    %c63_i32 = arith.constant 63 : i32
    %9 = vector.broadcast %c63_i32 : i32 to vector<64x1xi32>
    %10 = arith.subi %9, %8 : vector<64x1xi32>
    %11 = vector.extract_strided_slice %4 {offsets = [0, 0], sizes = [64, 16], strides = [1, 1]} : vector<64x64xf32> to vector<64x16xf32>
    %12 = vector.extract_strided_slice %7 {offsets = [0, 0], sizes = [64, 16], strides = [1, 1]} : vector<64x128xf32> to vector<64x16xf32>
    %13 = vector.extract_strided_slice %7 {offsets = [0, 64], sizes = [64, 16], strides = [1, 1]} : vector<64x128xf32> to vector<64x16xf32>
    %c0_9 = arith.constant 0 : index
    %c0_10 = arith.constant 0 : index
    %c0_11 = arith.constant 0 : index
    %c0_12 = arith.constant 0 : index
    %14 = vector.load %arg5[%c0_9, %c0_10, %c0_11, %c0_12] : memref<1x4x128x16xf32, #tpu.memory_space<vmem>>, vector<1x1x128x16xf32>
    %15 = vector.shape_cast %14 : vector<1x1x128x16xf32> to vector<128x16xf32>
    %c0_13 = arith.constant 0 : index
    %c0_14 = arith.constant 0 : index
    %c0_15 = arith.constant 0 : index
    %c0_16 = arith.constant 0 : index
    %16 = vector.load %arg6[%c0_13, %c0_14, %c0_15, %c0_16] : memref<1x4x1x16xf32, #tpu.memory_space<vmem>>, vector<1x1x1x16xf32>
    %17 = vector.shape_cast %16 : vector<1x1x1x16xf32> to vector<1x16xf32>
    %18 = vector.broadcast %17 : vector<1x16xf32> to vector<64x16xf32>
    %19 = arith.addf %11, %18 : vector<64x16xf32>
    %c0_17 = arith.constant 0 : index
    %c0_18 = arith.constant 0 : index
    %c0_19 = arith.constant 0 : index
    %c0_20 = arith.constant 0 : index
    %20 = vector.load %arg7[%c0_17, %c0_18, %c0_19, %c0_20] : memref<1x4x1x16xf32, #tpu.memory_space<vmem>>, vector<1x1x1x16xf32>
    %21 = vector.shape_cast %20 : vector<1x1x1x16xf32> to vector<1x16xf32>
    %22 = vector.broadcast %21 : vector<1x16xf32> to vector<64x16xf32>
    %23 = arith.addf %11, %22 : vector<64x16xf32>
    %cst_21 = arith.constant dense<0.000000e+00> : vector<64x64xf32>
    %24 = tpu.matmul %19, %12, %cst_21 {dimension_numbers = #tpu.dot_dimension_numbers<[1], [1], [0], [0], [0, 0, 1, 0], [], []>} : vector<64x16xf32>, vector<64x16xf32>, vector<64x64xf32> -> vector<64x64xf32>
    %cst_22 = arith.constant dense<0.000000e+00> : vector<64x128xf32>
    %25 = tpu.matmul %23, %15, %cst_22 {dimension_numbers = #tpu.dot_dimension_numbers<[1], [1], [0], [0], [0, 0, 1, 0], [], []>} : vector<64x16xf32>, vector<128x16xf32>, vector<64x128xf32> -> vector<64x128xf32>
    %c127_i32 = arith.constant 127 : i32
    %26 = tpu.dynamic_rotate %25 by %c127_i32 dim 1 : vector<64x128xf32>, i32 -> vector<64x128xf32>
    %c1_i32 = arith.constant 1 : i32
    %27 = vector.broadcast %c1_i32 : i32 to vector<64x1xi32>
    %28 = arith.andi %10, %27 : vector<64x1xi32>
    %c0_i32 = arith.constant 0 : i32
    %29 = vector.broadcast %c0_i32 : i32 to vector<64x1xi32>
    %30 = arith.cmpi ne, %28, %29 : vector<64x1xi32>
    %31 = vector.shape_cast %30 : vector<64x1xi1> to vector<64x1xi1>
    %32 = vector.broadcast %31 : vector<64x1xi1> to vector<64x128xi1>
    %33 = arith.select %32, %26, %25 : vector<64x128xi1>, vector<64x128xf32>
    %c126_i32 = arith.constant 126 : i32
    %34 = tpu.dynamic_rotate %33 by %c126_i32 dim 1 : vector<64x128xf32>, i32 -> vector<64x128xf32>
    %c2_i32 = arith.constant 2 : i32
    %35 = vector.broadcast %c2_i32 : i32 to vector<64x1xi32>
    %36 = arith.andi %10, %35 : vector<64x1xi32>
    %c0_i32_23 = arith.constant 0 : i32
    %37 = vector.broadcast %c0_i32_23 : i32 to vector<64x1xi32>
    %38 = arith.cmpi ne, %36, %37 : vector<64x1xi32>
    %39 = vector.shape_cast %38 : vector<64x1xi1> to vector<64x1xi1>
    %40 = vector.broadcast %39 : vector<64x1xi1> to vector<64x128xi1>
    %41 = arith.select %40, %34, %33 : vector<64x128xi1>, vector<64x128xf32>
    %c124_i32 = arith.constant 124 : i32
    %42 = tpu.dynamic_rotate %41 by %c124_i32 dim 1 : vector<64x128xf32>, i32 -> vector<64x128xf32>
    %c4_i32 = arith.constant 4 : i32
    %43 = vector.broadcast %c4_i32 : i32 to vector<64x1xi32>
    %44 = arith.andi %10, %43 : vector<64x1xi32>
    %c0_i32_24 = arith.constant 0 : i32
    %45 = vector.broadcast %c0_i32_24 : i32 to vector<64x1xi32>
    %46 = arith.cmpi ne, %44, %45 : vector<64x1xi32>
    %47 = vector.shape_cast %46 : vector<64x1xi1> to vector<64x1xi1>
    %48 = vector.broadcast %47 : vector<64x1xi1> to vector<64x128xi1>
    %49 = arith.select %48, %42, %41 : vector<64x128xi1>, vector<64x128xf32>
    %c120_i32 = arith.constant 120 : i32
    %50 = tpu.dynamic_rotate %49 by %c120_i32 dim 1 : vector<64x128xf32>, i32 -> vector<64x128xf32>
    %c8_i32 = arith.constant 8 : i32
    %51 = vector.broadcast %c8_i32 : i32 to vector<64x1xi32>
    %52 = arith.andi %10, %51 : vector<64x1xi32>
    %c0_i32_25 = arith.constant 0 : i32
    %53 = vector.broadcast %c0_i32_25 : i32 to vector<64x1xi32>
    %54 = arith.cmpi ne, %52, %53 : vector<64x1xi32>
    %55 = vector.shape_cast %54 : vector<64x1xi1> to vector<64x1xi1>
    %56 = vector.broadcast %55 : vector<64x1xi1> to vector<64x128xi1>
    %57 = arith.select %56, %50, %49 : vector<64x128xi1>, vector<64x128xf32>
    %c112_i32 = arith.constant 112 : i32
    %58 = tpu.dynamic_rotate %57 by %c112_i32 dim 1 : vector<64x128xf32>, i32 -> vector<64x128xf32>
    %c16_i32 = arith.constant 16 : i32
    %59 = vector.broadcast %c16_i32 : i32 to vector<64x1xi32>
    %60 = arith.andi %10, %59 : vector<64x1xi32>
    %c0_i32_26 = arith.constant 0 : i32
    %61 = vector.broadcast %c0_i32_26 : i32 to vector<64x1xi32>
    %62 = arith.cmpi ne, %60, %61 : vector<64x1xi32>
    %63 = vector.shape_cast %62 : vector<64x1xi1> to vector<64x1xi1>
    %64 = vector.broadcast %63 : vector<64x1xi1> to vector<64x128xi1>
    %65 = arith.select %64, %58, %57 : vector<64x128xi1>, vector<64x128xf32>
    %c96_i32 = arith.constant 96 : i32
    %66 = tpu.dynamic_rotate %65 by %c96_i32 dim 1 : vector<64x128xf32>, i32 -> vector<64x128xf32>
    %c32_i32 = arith.constant 32 : i32
    %67 = vector.broadcast %c32_i32 : i32 to vector<64x1xi32>
    %68 = arith.andi %10, %67 : vector<64x1xi32>
    %c0_i32_27 = arith.constant 0 : i32
    %69 = vector.broadcast %c0_i32_27 : i32 to vector<64x1xi32>
    %70 = arith.cmpi ne, %68, %69 : vector<64x1xi32>
    %71 = vector.shape_cast %70 : vector<64x1xi1> to vector<64x1xi1>
    %72 = vector.broadcast %71 : vector<64x1xi1> to vector<64x128xi1>
    %73 = arith.select %72, %66, %65 : vector<64x128xi1>, vector<64x128xf32>
    %74 = vector.extract_strided_slice %73 {offsets = [0, 0], sizes = [64, 64], strides = [1, 1]} : vector<64x128xf32> to vector<64x64xf32>
    %75 = arith.addf %24, %74 : vector<64x64xf32>
    %cst_28 = arith.constant dense<0xFF800000> : vector<64xf32>
    %76 = vector.multi_reduction <maximumf>, %75, %cst_28 [1] : vector<64x64xf32> to vector<64xf32>
    %77 = vector.shape_cast %76 : vector<64xf32> to vector<64x1xf32>
    %78 = vector.broadcast %77 : vector<64x1xf32> to vector<64x64xf32>
    %79 = arith.subf %75, %78 : vector<64x64xf32>
    %80 = math.exp %79 : vector<64x64xf32>
    %cst_29 = arith.constant dense<0.000000e+00> : vector<64xf32>
    %81 = vector.multi_reduction <add>, %80, %cst_29 [1] : vector<64x64xf32> to vector<64xf32>
    %82 = vector.shape_cast %81 : vector<64xf32> to vector<64x1xf32>
    %83 = tpu.reciprocal %82 {approx = true} : vector<64x1xf32> -> vector<64x1xf32>
    %84 = arith.mulf %82, %83 : vector<64x1xf32>
    %cst_30 = arith.constant 2.000000e+00 : f32
    %85 = vector.broadcast %cst_30 : f32 to vector<64x1xf32>
    %86 = arith.subf %85, %84 : vector<64x1xf32>
    %87 = arith.mulf %83, %86 : vector<64x1xf32>
    %88 = vector.broadcast %87 : vector<64x1xf32> to vector<64x64xf32>
    %89 = arith.mulf %80, %88 : vector<64x64xf32>
    %c0_31 = arith.constant 0 : index
    %c0_32 = arith.constant 0 : index
    %c0_33 = arith.constant 0 : index
    %c0_34 = arith.constant 0 : index
    %90 = vector.load %arg11[%c0_31, %c0_32, %c0_33, %c0_34] : memref<1x4x64x64xf32, #tpu.memory_space<vmem>>, vector<1x1x64x64xf32>
    %91 = vector.shape_cast %90 : vector<1x1x64x64xf32> to vector<64x64xf32>
    %92 = vector.shape_cast %89 : vector<64x64xf32> to vector<1x1x64x64xf32>
    tpu.vector_store %arg11[%c0_31, %c0_32, %c0_33, %c0_34], %92 {strides = array<i32>} : memref<1x4x64x64xf32, #tpu.memory_space<vmem>>, vector<1x1x64x64xf32>,
    %cst_35 = arith.constant dense<0.000000e+00> : vector<64x16xf32>
    %93 = tpu.matmul %89, %13, %cst_35 {dimension_numbers = #tpu.dot_dimension_numbers<[1], [0], [0], [1], [0, 0, 1, 1], [], []>} : vector<64x64xf32>, vector<64x16xf32>, vector<64x16xf32> -> vector<64x16xf32>
    %94 = vector.extract_strided_slice %4 {offsets = [0, 16], sizes = [64, 16], strides = [1, 1]} : vector<64x64xf32> to vector<64x16xf32>
    %95 = vector.extract_strided_slice %7 {offsets = [0, 16], sizes = [64, 16], strides = [1, 1]} : vector<64x128xf32> to vector<64x16xf32>
    %96 = vector.extract_strided_slice %7 {offsets = [0, 80], sizes = [64, 16], strides = [1, 1]} : vector<64x128xf32> to vector<64x16xf32>
    %c0_36 = arith.constant 0 : index
    %c1 = arith.constant 1 : index
    %c0_37 = arith.constant 0 : index
    %c0_38 = arith.constant 0 : index
    %97 = vector.load %arg5[%c0_36, %c1, %c0_37, %c0_38] : memref<1x4x128x16xf32, #tpu.memory_space<vmem>>, vector<1x1x128x16xf32>
    %98 = vector.shape_cast %97 : vector<1x1x128x16xf32> to vector<128x16xf32>
    %c0_39 = arith.constant 0 : index
    %c1_40 = arith.constant 1 : index
    %c0_41 = arith.constant 0 : index
    %c0_42 = arith.constant 0 : index
    %99 = vector.load %arg6[%c0_39, %c1_40, %c0_41, %c0_42] : memref<1x4x1x16xf32, #tpu.memory_space<vmem>>, vector<1x1x1x16xf32>
    %100 = vector.shape_cast %99 : vector<1x1x1x16xf32> to vector<1x16xf32>
    %101 = vector.broadcast %100 : vector<1x16xf32> to vector<64x16xf32>
    %102 = arith.addf %94, %101 : vector<64x16xf32>
    %c0_43 = arith.constant 0 : index
    %c1_44 = arith.constant 1 : index
    %c0_45 = arith.constant 0 : index
    %c0_46 = arith.constant 0 : index
    %103 = vector.load %arg7[%c0_43, %c1_44, %c0_45, %c0_46] : memref<1x4x1x16xf32, #tpu.memory_space<vmem>>, vector<1x1x1x16xf32>
    %104 = vector.shape_cast %103 : vector<1x1x1x16xf32> to vector<1x16xf32>
    %105 = vector.broadcast %104 : vector<1x16xf32> to vector<64x16xf32>
    %106 = arith.addf %94, %105 : vector<64x16xf32>
    %cst_47 = arith.constant dense<0.000000e+00> : vector<64x64xf32>
    %107 = tpu.matmul %102, %95, %cst_47 {dimension_numbers = #tpu.dot_dimension_numbers<[1], [1], [0], [0], [0, 0, 1, 0], [], []>} : vector<64x16xf32>, vector<64x16xf32>, vector<64x64xf32> -> vector<64x64xf32>
    %cst_48 = arith.constant dense<0.000000e+00> : vector<64x128xf32>
    %108 = tpu.matmul %106, %98, %cst_48 {dimension_numbers = #tpu.dot_dimension_numbers<[1], [1], [0], [0], [0, 0, 1, 0], [], []>} : vector<64x16xf32>, vector<128x16xf32>, vector<64x128xf32> -> vector<64x128xf32>
    %c127_i32_49 = arith.constant 127 : i32
    %109 = tpu.dynamic_rotate %108 by %c127_i32_49 dim 1 : vector<64x128xf32>, i32 -> vector<64x128xf32>
    %c1_i32_50 = arith.constant 1 : i32
    %110 = vector.broadcast %c1_i32_50 : i32 to vector<64x1xi32>
    %111 = arith.andi %10, %110 : vector<64x1xi32>
    %c0_i32_51 = arith.constant 0 : i32
    %112 = vector.broadcast %c0_i32_51 : i32 to vector<64x1xi32>
    %113 = arith.cmpi ne, %111, %112 : vector<64x1xi32>
    %114 = vector.shape_cast %113 : vector<64x1xi1> to vector<64x1xi1>
    %115 = vector.broadcast %114 : vector<64x1xi1> to vector<64x128xi1>
    %116 = arith.select %115, %109, %108 : vector<64x128xi1>, vector<64x128xf32>
    %c126_i32_52 = arith.constant 126 : i32
    %117 = tpu.dynamic_rotate %116 by %c126_i32_52 dim 1 : vector<64x128xf32>, i32 -> vector<64x128xf32>
    %c2_i32_53 = arith.constant 2 : i32
    %118 = vector.broadcast %c2_i32_53 : i32 to vector<64x1xi32>
    %119 = arith.andi %10, %118 : vector<64x1xi32>
    %c0_i32_54 = arith.constant 0 : i32
    %120 = vector.broadcast %c0_i32_54 : i32 to vector<64x1xi32>
    %121 = arith.cmpi ne, %119, %120 : vector<64x1xi32>
    %122 = vector.shape_cast %121 : vector<64x1xi1> to vector<64x1xi1>
    %123 = vector.broadcast %122 : vector<64x1xi1> to vector<64x128xi1>
    %124 = arith.select %123, %117, %116 : vector<64x128xi1>, vector<64x128xf32>
    %c124_i32_55 = arith.constant 124 : i32
    %125 = tpu.dynamic_rotate %124 by %c124_i32_55 dim 1 : vector<64x128xf32>, i32 -> vector<64x128xf32>
    %c4_i32_56 = arith.constant 4 : i32
    %126 = vector.broadcast %c4_i32_56 : i32 to vector<64x1xi32>
    %127 = arith.andi %10, %126 : vector<64x1xi32>
    %c0_i32_57 = arith.constant 0 : i32
    %128 = vector.broadcast %c0_i32_57 : i32 to vector<64x1xi32>
    %129 = arith.cmpi ne, %127, %128 : vector<64x1xi32>
    %130 = vector.shape_cast %129 : vector<64x1xi1> to vector<64x1xi1>
    %131 = vector.broadcast %130 : vector<64x1xi1> to vector<64x128xi1>
    %132 = arith.select %131, %125, %124 : vector<64x128xi1>, vector<64x128xf32>
    %c120_i32_58 = arith.constant 120 : i32
    %133 = tpu.dynamic_rotate %132 by %c120_i32_58 dim 1 : vector<64x128xf32>, i32 -> vector<64x128xf32>
    %c8_i32_59 = arith.constant 8 : i32
    %134 = vector.broadcast %c8_i32_59 : i32 to vector<64x1xi32>
    %135 = arith.andi %10, %134 : vector<64x1xi32>
    %c0_i32_60 = arith.constant 0 : i32
    %136 = vector.broadcast %c0_i32_60 : i32 to vector<64x1xi32>
    %137 = arith.cmpi ne, %135, %136 : vector<64x1xi32>
    %138 = vector.shape_cast %137 : vector<64x1xi1> to vector<64x1xi1>
    %139 = vector.broadcast %138 : vector<64x1xi1> to vector<64x128xi1>
    %140 = arith.select %139, %133, %132 : vector<64x128xi1>, vector<64x128xf32>
    %c112_i32_61 = arith.constant 112 : i32
    %141 = tpu.dynamic_rotate %140 by %c112_i32_61 dim 1 : vector<64x128xf32>, i32 -> vector<64x128xf32>
    %c16_i32_62 = arith.constant 16 : i32
    %142 = vector.broadcast %c16_i32_62 : i32 to vector<64x1xi32>
    %143 = arith.andi %10, %142 : vector<64x1xi32>
    %c0_i32_63 = arith.constant 0 : i32
    %144 = vector.broadcast %c0_i32_63 : i32 to vector<64x1xi32>
    %145 = arith.cmpi ne, %143, %144 : vector<64x1xi32>
    %146 = vector.shape_cast %145 : vector<64x1xi1> to vector<64x1xi1>
    %147 = vector.broadcast %146 : vector<64x1xi1> to vector<64x128xi1>
    %148 = arith.select %147, %141, %140 : vector<64x128xi1>, vector<64x128xf32>
    %c96_i32_64 = arith.constant 96 : i32
    %149 = tpu.dynamic_rotate %148 by %c96_i32_64 dim 1 : vector<64x128xf32>, i32 -> vector<64x128xf32>
    %c32_i32_65 = arith.constant 32 : i32
    %150 = vector.broadcast %c32_i32_65 : i32 to vector<64x1xi32>
    %151 = arith.andi %10, %150 : vector<64x1xi32>
    %c0_i32_66 = arith.constant 0 : i32
    %152 = vector.broadcast %c0_i32_66 : i32 to vector<64x1xi32>
    %153 = arith.cmpi ne, %151, %152 : vector<64x1xi32>
    %154 = vector.shape_cast %153 : vector<64x1xi1> to vector<64x1xi1>
    %155 = vector.broadcast %154 : vector<64x1xi1> to vector<64x128xi1>
    %156 = arith.select %155, %149, %148 : vector<64x128xi1>, vector<64x128xf32>
    %157 = vector.extract_strided_slice %156 {offsets = [0, 0], sizes = [64, 64], strides = [1, 1]} : vector<64x128xf32> to vector<64x64xf32>
    %158 = arith.addf %107, %157 : vector<64x64xf32>
    %cst_67 = arith.constant dense<0xFF800000> : vector<64xf32>
    %159 = vector.multi_reduction <maximumf>, %158, %cst_67 [1] : vector<64x64xf32> to vector<64xf32>
    %160 = vector.shape_cast %159 : vector<64xf32> to vector<64x1xf32>
    %161 = vector.broadcast %160 : vector<64x1xf32> to vector<64x64xf32>
    %162 = arith.subf %158, %161 : vector<64x64xf32>
    %163 = math.exp %162 : vector<64x64xf32>
    %cst_68 = arith.constant dense<0.000000e+00> : vector<64xf32>
    %164 = vector.multi_reduction <add>, %163, %cst_68 [1] : vector<64x64xf32> to vector<64xf32>
    %165 = vector.shape_cast %164 : vector<64xf32> to vector<64x1xf32>
    %166 = tpu.reciprocal %165 {approx = true} : vector<64x1xf32> -> vector<64x1xf32>
    %167 = arith.mulf %165, %166 : vector<64x1xf32>
    %cst_69 = arith.constant 2.000000e+00 : f32
    %168 = vector.broadcast %cst_69 : f32 to vector<64x1xf32>
    %169 = arith.subf %168, %167 : vector<64x1xf32>
    %170 = arith.mulf %166, %169 : vector<64x1xf32>
    %171 = vector.broadcast %170 : vector<64x1xf32> to vector<64x64xf32>
    %172 = arith.mulf %163, %171 : vector<64x64xf32>
    %c0_70 = arith.constant 0 : index
    %c1_71 = arith.constant 1 : index
    %c0_72 = arith.constant 0 : index
    %c0_73 = arith.constant 0 : index
    %173 = vector.load %arg11[%c0_70, %c1_71, %c0_72, %c0_73] : memref<1x4x64x64xf32, #tpu.memory_space<vmem>>, vector<1x1x64x64xf32>
    %174 = vector.shape_cast %173 : vector<1x1x64x64xf32> to vector<64x64xf32>
    %175 = vector.shape_cast %172 : vector<64x64xf32> to vector<1x1x64x64xf32>
    tpu.vector_store %arg11[%c0_70, %c1_71, %c0_72, %c0_73], %175 {strides = array<i32>} : memref<1x4x64x64xf32, #tpu.memory_space<vmem>>, vector<1x1x64x64xf32>,
    %cst_74 = arith.constant dense<0.000000e+00> : vector<64x16xf32>
    %176 = tpu.matmul %172, %96, %cst_74 {dimension_numbers = #tpu.dot_dimension_numbers<[1], [0], [0], [1], [0, 0, 1, 1], [], []>} : vector<64x64xf32>, vector<64x16xf32>, vector<64x16xf32> -> vector<64x16xf32>
    %177 = vector.extract_strided_slice %4 {offsets = [0, 32], sizes = [64, 16], strides = [1, 1]} : vector<64x64xf32> to vector<64x16xf32>
    %178 = vector.extract_strided_slice %7 {offsets = [0, 32], sizes = [64, 16], strides = [1, 1]} : vector<64x128xf32> to vector<64x16xf32>
    %179 = vector.extract_strided_slice %7 {offsets = [0, 96], sizes = [64, 16], strides = [1, 1]} : vector<64x128xf32> to vector<64x16xf32>
    %c0_75 = arith.constant 0 : index
    %c2 = arith.constant 2 : index
    %c0_76 = arith.constant 0 : index
    %c0_77 = arith.constant 0 : index
    %180 = vector.load %arg5[%c0_75, %c2, %c0_76, %c0_77] : memref<1x4x128x16xf32, #tpu.memory_space<vmem>>, vector<1x1x128x16xf32>
    %181 = vector.shape_cast %180 : vector<1x1x128x16xf32> to vector<128x16xf32>
    %c0_78 = arith.constant 0 : index
    %c2_79 = arith.constant 2 : index
    %c0_80 = arith.constant 0 : index
    %c0_81 = arith.constant 0 : index
    %182 = vector.load %arg6[%c0_78, %c2_79, %c0_80, %c0_81] : memref<1x4x1x16xf32, #tpu.memory_space<vmem>>, vector<1x1x1x16xf32>
    %183 = vector.shape_cast %182 : vector<1x1x1x16xf32> to vector<1x16xf32>
    %184 = vector.broadcast %183 : vector<1x16xf32> to vector<64x16xf32>
    %185 = arith.addf %177, %184 : vector<64x16xf32>
    %c0_82 = arith.constant 0 : index
    %c2_83 = arith.constant 2 : index
    %c0_84 = arith.constant 0 : index
    %c0_85 = arith.constant 0 : index
    %186 = vector.load %arg7[%c0_82, %c2_83, %c0_84, %c0_85] : memref<1x4x1x16xf32, #tpu.memory_space<vmem>>, vector<1x1x1x16xf32>
    %187 = vector.shape_cast %186 : vector<1x1x1x16xf32> to vector<1x16xf32>
    %188 = vector.broadcast %187 : vector<1x16xf32> to vector<64x16xf32>
    %189 = arith.addf %177, %188 : vector<64x16xf32>
    %cst_86 = arith.constant dense<0.000000e+00> : vector<64x64xf32>
    %190 = tpu.matmul %185, %178, %cst_86 {dimension_numbers = #tpu.dot_dimension_numbers<[1], [1], [0], [0], [0, 0, 1, 0], [], []>} : vector<64x16xf32>, vector<64x16xf32>, vector<64x64xf32> -> vector<64x64xf32>
    %cst_87 = arith.constant dense<0.000000e+00> : vector<64x128xf32>
    %191 = tpu.matmul %189, %181, %cst_87 {dimension_numbers = #tpu.dot_dimension_numbers<[1], [1], [0], [0], [0, 0, 1, 0], [], []>} : vector<64x16xf32>, vector<128x16xf32>, vector<64x128xf32> -> vector<64x128xf32>
    %c127_i32_88 = arith.constant 127 : i32
    %192 = tpu.dynamic_rotate %191 by %c127_i32_88 dim 1 : vector<64x128xf32>, i32 -> vector<64x128xf32>
    %c1_i32_89 = arith.constant 1 : i32
    %193 = vector.broadcast %c1_i32_89 : i32 to vector<64x1xi32>
    %194 = arith.andi %10, %193 : vector<64x1xi32>
    %c0_i32_90 = arith.constant 0 : i32
    %195 = vector.broadcast %c0_i32_90 : i32 to vector<64x1xi32>
    %196 = arith.cmpi ne, %194, %195 : vector<64x1xi32>
    %197 = vector.shape_cast %196 : vector<64x1xi1> to vector<64x1xi1>
    %198 = vector.broadcast %197 : vector<64x1xi1> to vector<64x128xi1>
    %199 = arith.select %198, %192, %191 : vector<64x128xi1>, vector<64x128xf32>
    %c126_i32_91 = arith.constant 126 : i32
    %200 = tpu.dynamic_rotate %199 by %c126_i32_91 dim 1 : vector<64x128xf32>, i32 -> vector<64x128xf32>
    %c2_i32_92 = arith.constant 2 : i32
    %201 = vector.broadcast %c2_i32_92 : i32 to vector<64x1xi32>
    %202 = arith.andi %10, %201 : vector<64x1xi32>
    %c0_i32_93 = arith.constant 0 : i32
    %203 = vector.broadcast %c0_i32_93 : i32 to vector<64x1xi32>
    %204 = arith.cmpi ne, %202, %203 : vector<64x1xi32>
    %205 = vector.shape_cast %204 : vector<64x1xi1> to vector<64x1xi1>
    %206 = vector.broadcast %205 : vector<64x1xi1> to vector<64x128xi1>
    %207 = arith.select %206, %200, %199 : vector<64x128xi1>, vector<64x128xf32>
    %c124_i32_94 = arith.constant 124 : i32
    %208 = tpu.dynamic_rotate %207 by %c124_i32_94 dim 1 : vector<64x128xf32>, i32 -> vector<64x128xf32>
    %c4_i32_95 = arith.constant 4 : i32
    %209 = vector.broadcast %c4_i32_95 : i32 to vector<64x1xi32>
    %210 = arith.andi %10, %209 : vector<64x1xi32>
    %c0_i32_96 = arith.constant 0 : i32
    %211 = vector.broadcast %c0_i32_96 : i32 to vector<64x1xi32>
    %212 = arith.cmpi ne, %210, %211 : vector<64x1xi32>
    %213 = vector.shape_cast %212 : vector<64x1xi1> to vector<64x1xi1>
    %214 = vector.broadcast %213 : vector<64x1xi1> to vector<64x128xi1>
    %215 = arith.select %214, %208, %207 : vector<64x128xi1>, vector<64x128xf32>
    %c120_i32_97 = arith.constant 120 : i32
    %216 = tpu.dynamic_rotate %215 by %c120_i32_97 dim 1 : vector<64x128xf32>, i32 -> vector<64x128xf32>
    %c8_i32_98 = arith.constant 8 : i32
    %217 = vector.broadcast %c8_i32_98 : i32 to vector<64x1xi32>
    %218 = arith.andi %10, %217 : vector<64x1xi32>
    %c0_i32_99 = arith.constant 0 : i32
    %219 = vector.broadcast %c0_i32_99 : i32 to vector<64x1xi32>
    %220 = arith.cmpi ne, %218, %219 : vector<64x1xi32>
    %221 = vector.shape_cast %220 : vector<64x1xi1> to vector<64x1xi1>
    %222 = vector.broadcast %221 : vector<64x1xi1> to vector<64x128xi1>
    %223 = arith.select %222, %216, %215 : vector<64x128xi1>, vector<64x128xf32>
    %c112_i32_100 = arith.constant 112 : i32
    %224 = tpu.dynamic_rotate %223 by %c112_i32_100 dim 1 : vector<64x128xf32>, i32 -> vector<64x128xf32>
    %c16_i32_101 = arith.constant 16 : i32
    %225 = vector.broadcast %c16_i32_101 : i32 to vector<64x1xi32>
    %226 = arith.andi %10, %225 : vector<64x1xi32>
    %c0_i32_102 = arith.constant 0 : i32
    %227 = vector.broadcast %c0_i32_102 : i32 to vector<64x1xi32>
    %228 = arith.cmpi ne, %226, %227 : vector<64x1xi32>
    %229 = vector.shape_cast %228 : vector<64x1xi1> to vector<64x1xi1>
    %230 = vector.broadcast %229 : vector<64x1xi1> to vector<64x128xi1>
    %231 = arith.select %230, %224, %223 : vector<64x128xi1>, vector<64x128xf32>
    %c96_i32_103 = arith.constant 96 : i32
    %232 = tpu.dynamic_rotate %231 by %c96_i32_103 dim 1 : vector<64x128xf32>, i32 -> vector<64x128xf32>
    %c32_i32_104 = arith.constant 32 : i32
    %233 = vector.broadcast %c32_i32_104 : i32 to vector<64x1xi32>
    %234 = arith.andi %10, %233 : vector<64x1xi32>
    %c0_i32_105 = arith.constant 0 : i32
    %235 = vector.broadcast %c0_i32_105 : i32 to vector<64x1xi32>
    %236 = arith.cmpi ne, %234, %235 : vector<64x1xi32>
    %237 = vector.shape_cast %236 : vector<64x1xi1> to vector<64x1xi1>
    %238 = vector.broadcast %237 : vector<64x1xi1> to vector<64x128xi1>
    %239 = arith.select %238, %232, %231 : vector<64x128xi1>, vector<64x128xf32>
    %240 = vector.extract_strided_slice %239 {offsets = [0, 0], sizes = [64, 64], strides = [1, 1]} : vector<64x128xf32> to vector<64x64xf32>
    %241 = arith.addf %190, %240 : vector<64x64xf32>
    %cst_106 = arith.constant dense<0xFF800000> : vector<64xf32>
    %242 = vector.multi_reduction <maximumf>, %241, %cst_106 [1] : vector<64x64xf32> to vector<64xf32>
    %243 = vector.shape_cast %242 : vector<64xf32> to vector<64x1xf32>
    %244 = vector.broadcast %243 : vector<64x1xf32> to vector<64x64xf32>
    %245 = arith.subf %241, %244 : vector<64x64xf32>
    %246 = math.exp %245 : vector<64x64xf32>
    %cst_107 = arith.constant dense<0.000000e+00> : vector<64xf32>
    %247 = vector.multi_reduction <add>, %246, %cst_107 [1] : vector<64x64xf32> to vector<64xf32>
    %248 = vector.shape_cast %247 : vector<64xf32> to vector<64x1xf32>
    %249 = tpu.reciprocal %248 {approx = true} : vector<64x1xf32> -> vector<64x1xf32>
    %250 = arith.mulf %248, %249 : vector<64x1xf32>
    %cst_108 = arith.constant 2.000000e+00 : f32
    %251 = vector.broadcast %cst_108 : f32 to vector<64x1xf32>
    %252 = arith.subf %251, %250 : vector<64x1xf32>
    %253 = arith.mulf %249, %252 : vector<64x1xf32>
    %254 = vector.broadcast %253 : vector<64x1xf32> to vector<64x64xf32>
    %255 = arith.mulf %246, %254 : vector<64x64xf32>
    %c0_109 = arith.constant 0 : index
    %c2_110 = arith.constant 2 : index
    %c0_111 = arith.constant 0 : index
    %c0_112 = arith.constant 0 : index
    %256 = vector.load %arg11[%c0_109, %c2_110, %c0_111, %c0_112] : memref<1x4x64x64xf32, #tpu.memory_space<vmem>>, vector<1x1x64x64xf32>
    %257 = vector.shape_cast %256 : vector<1x1x64x64xf32> to vector<64x64xf32>
    %258 = vector.shape_cast %255 : vector<64x64xf32> to vector<1x1x64x64xf32>
    tpu.vector_store %arg11[%c0_109, %c2_110, %c0_111, %c0_112], %258 {strides = array<i32>} : memref<1x4x64x64xf32, #tpu.memory_space<vmem>>, vector<1x1x64x64xf32>,
    %cst_113 = arith.constant dense<0.000000e+00> : vector<64x16xf32>
    %259 = tpu.matmul %255, %179, %cst_113 {dimension_numbers = #tpu.dot_dimension_numbers<[1], [0], [0], [1], [0, 0, 1, 1], [], []>} : vector<64x64xf32>, vector<64x16xf32>, vector<64x16xf32> -> vector<64x16xf32>
    %260 = vector.extract_strided_slice %4 {offsets = [0, 48], sizes = [64, 16], strides = [1, 1]} : vector<64x64xf32> to vector<64x16xf32>
    %261 = vector.extract_strided_slice %7 {offsets = [0, 48], sizes = [64, 16], strides = [1, 1]} : vector<64x128xf32> to vector<64x16xf32>
    %262 = vector.extract_strided_slice %7 {offsets = [0, 112], sizes = [64, 16], strides = [1, 1]} : vector<64x128xf32> to vector<64x16xf32>
    %c0_114 = arith.constant 0 : index
    %c3 = arith.constant 3 : index
    %c0_115 = arith.constant 0 : index
    %c0_116 = arith.constant 0 : index
    %263 = vector.load %arg5[%c0_114, %c3, %c0_115, %c0_116] : memref<1x4x128x16xf32, #tpu.memory_space<vmem>>, vector<1x1x128x16xf32>
    %264 = vector.shape_cast %263 : vector<1x1x128x16xf32> to vector<128x16xf32>
    %c0_117 = arith.constant 0 : index
    %c3_118 = arith.constant 3 : index
    %c0_119 = arith.constant 0 : index
    %c0_120 = arith.constant 0 : index
    %265 = vector.load %arg6[%c0_117, %c3_118, %c0_119, %c0_120] : memref<1x4x1x16xf32, #tpu.memory_space<vmem>>, vector<1x1x1x16xf32>
    %266 = vector.shape_cast %265 : vector<1x1x1x16xf32> to vector<1x16xf32>
    %267 = vector.broadcast %266 : vector<1x16xf32> to vector<64x16xf32>
    %268 = arith.addf %260, %267 : vector<64x16xf32>
    %c0_121 = arith.constant 0 : index
    %c3_122 = arith.constant 3 : index
    %c0_123 = arith.constant 0 : index
    %c0_124 = arith.constant 0 : index
    %269 = vector.load %arg7[%c0_121, %c3_122, %c0_123, %c0_124] : memref<1x4x1x16xf32, #tpu.memory_space<vmem>>, vector<1x1x1x16xf32>
    %270 = vector.shape_cast %269 : vector<1x1x1x16xf32> to vector<1x16xf32>
    %271 = vector.broadcast %270 : vector<1x16xf32> to vector<64x16xf32>
    %272 = arith.addf %260, %271 : vector<64x16xf32>
    %cst_125 = arith.constant dense<0.000000e+00> : vector<64x64xf32>
    %273 = tpu.matmul %268, %261, %cst_125 {dimension_numbers = #tpu.dot_dimension_numbers<[1], [1], [0], [0], [0, 0, 1, 0], [], []>} : vector<64x16xf32>, vector<64x16xf32>, vector<64x64xf32> -> vector<64x64xf32>
    %cst_126 = arith.constant dense<0.000000e+00> : vector<64x128xf32>
    %274 = tpu.matmul %272, %264, %cst_126 {dimension_numbers = #tpu.dot_dimension_numbers<[1], [1], [0], [0], [0, 0, 1, 0], [], []>} : vector<64x16xf32>, vector<128x16xf32>, vector<64x128xf32> -> vector<64x128xf32>
    %c127_i32_127 = arith.constant 127 : i32
    %275 = tpu.dynamic_rotate %274 by %c127_i32_127 dim 1 : vector<64x128xf32>, i32 -> vector<64x128xf32>
    %c1_i32_128 = arith.constant 1 : i32
    %276 = vector.broadcast %c1_i32_128 : i32 to vector<64x1xi32>
    %277 = arith.andi %10, %276 : vector<64x1xi32>
    %c0_i32_129 = arith.constant 0 : i32
    %278 = vector.broadcast %c0_i32_129 : i32 to vector<64x1xi32>
    %279 = arith.cmpi ne, %277, %278 : vector<64x1xi32>
    %280 = vector.shape_cast %279 : vector<64x1xi1> to vector<64x1xi1>
    %281 = vector.broadcast %280 : vector<64x1xi1> to vector<64x128xi1>
    %282 = arith.select %281, %275, %274 : vector<64x128xi1>, vector<64x128xf32>
    %c126_i32_130 = arith.constant 126 : i32
    %283 = tpu.dynamic_rotate %282 by %c126_i32_130 dim 1 : vector<64x128xf32>, i32 -> vector<64x128xf32>
    %c2_i32_131 = arith.constant 2 : i32
    %284 = vector.broadcast %c2_i32_131 : i32 to vector<64x1xi32>
    %285 = arith.andi %10, %284 : vector<64x1xi32>
    %c0_i32_132 = arith.constant 0 : i32
    %286 = vector.broadcast %c0_i32_132 : i32 to vector<64x1xi32>
    %287 = arith.cmpi ne, %285, %286 : vector<64x1xi32>
    %288 = vector.shape_cast %287 : vector<64x1xi1> to vector<64x1xi1>
    %289 = vector.broadcast %288 : vector<64x1xi1> to vector<64x128xi1>
    %290 = arith.select %289, %283, %282 : vector<64x128xi1>, vector<64x128xf32>
    %c124_i32_133 = arith.constant 124 : i32
    %291 = tpu.dynamic_rotate %290 by %c124_i32_133 dim 1 : vector<64x128xf32>, i32 -> vector<64x128xf32>
    %c4_i32_134 = arith.constant 4 : i32
    %292 = vector.broadcast %c4_i32_134 : i32 to vector<64x1xi32>
    %293 = arith.andi %10, %292 : vector<64x1xi32>
    %c0_i32_135 = arith.constant 0 : i32
    %294 = vector.broadcast %c0_i32_135 : i32 to vector<64x1xi32>
    %295 = arith.cmpi ne, %293, %294 : vector<64x1xi32>
    %296 = vector.shape_cast %295 : vector<64x1xi1> to vector<64x1xi1>
    %297 = vector.broadcast %296 : vector<64x1xi1> to vector<64x128xi1>
    %298 = arith.select %297, %291, %290 : vector<64x128xi1>, vector<64x128xf32>
    %c120_i32_136 = arith.constant 120 : i32
    %299 = tpu.dynamic_rotate %298 by %c120_i32_136 dim 1 : vector<64x128xf32>, i32 -> vector<64x128xf32>
    %c8_i32_137 = arith.constant 8 : i32
    %300 = vector.broadcast %c8_i32_137 : i32 to vector<64x1xi32>
    %301 = arith.andi %10, %300 : vector<64x1xi32>
    %c0_i32_138 = arith.constant 0 : i32
    %302 = vector.broadcast %c0_i32_138 : i32 to vector<64x1xi32>
    %303 = arith.cmpi ne, %301, %302 : vector<64x1xi32>
    %304 = vector.shape_cast %303 : vector<64x1xi1> to vector<64x1xi1>
    %305 = vector.broadcast %304 : vector<64x1xi1> to vector<64x128xi1>
    %306 = arith.select %305, %299, %298 : vector<64x128xi1>, vector<64x128xf32>
    %c112_i32_139 = arith.constant 112 : i32
    %307 = tpu.dynamic_rotate %306 by %c112_i32_139 dim 1 : vector<64x128xf32>, i32 -> vector<64x128xf32>
    %c16_i32_140 = arith.constant 16 : i32
    %308 = vector.broadcast %c16_i32_140 : i32 to vector<64x1xi32>
    %309 = arith.andi %10, %308 : vector<64x1xi32>
    %c0_i32_141 = arith.constant 0 : i32
    %310 = vector.broadcast %c0_i32_141 : i32 to vector<64x1xi32>
    %311 = arith.cmpi ne, %309, %310 : vector<64x1xi32>
    %312 = vector.shape_cast %311 : vector<64x1xi1> to vector<64x1xi1>
    %313 = vector.broadcast %312 : vector<64x1xi1> to vector<64x128xi1>
    %314 = arith.select %313, %307, %306 : vector<64x128xi1>, vector<64x128xf32>
    %c96_i32_142 = arith.constant 96 : i32
    %315 = tpu.dynamic_rotate %314 by %c96_i32_142 dim 1 : vector<64x128xf32>, i32 -> vector<64x128xf32>
    %c32_i32_143 = arith.constant 32 : i32
    %316 = vector.broadcast %c32_i32_143 : i32 to vector<64x1xi32>
    %317 = arith.andi %10, %316 : vector<64x1xi32>
    %c0_i32_144 = arith.constant 0 : i32
    %318 = vector.broadcast %c0_i32_144 : i32 to vector<64x1xi32>
    %319 = arith.cmpi ne, %317, %318 : vector<64x1xi32>
    %320 = vector.shape_cast %319 : vector<64x1xi1> to vector<64x1xi1>
    %321 = vector.broadcast %320 : vector<64x1xi1> to vector<64x128xi1>
    %322 = arith.select %321, %315, %314 : vector<64x128xi1>, vector<64x128xf32>
    %323 = vector.extract_strided_slice %322 {offsets = [0, 0], sizes = [64, 64], strides = [1, 1]} : vector<64x128xf32> to vector<64x64xf32>
    %324 = arith.addf %273, %323 : vector<64x64xf32>
    %cst_145 = arith.constant dense<0xFF800000> : vector<64xf32>
    %325 = vector.multi_reduction <maximumf>, %324, %cst_145 [1] : vector<64x64xf32> to vector<64xf32>
    %326 = vector.shape_cast %325 : vector<64xf32> to vector<64x1xf32>
    %327 = vector.broadcast %326 : vector<64x1xf32> to vector<64x64xf32>
    %328 = arith.subf %324, %327 : vector<64x64xf32>
    %329 = math.exp %328 : vector<64x64xf32>
    %cst_146 = arith.constant dense<0.000000e+00> : vector<64xf32>
    %330 = vector.multi_reduction <add>, %329, %cst_146 [1] : vector<64x64xf32> to vector<64xf32>
    %331 = vector.shape_cast %330 : vector<64xf32> to vector<64x1xf32>
    %332 = tpu.reciprocal %331 {approx = true} : vector<64x1xf32> -> vector<64x1xf32>
    %333 = arith.mulf %331, %332 : vector<64x1xf32>
    %cst_147 = arith.constant 2.000000e+00 : f32
    %334 = vector.broadcast %cst_147 : f32 to vector<64x1xf32>
    %335 = arith.subf %334, %333 : vector<64x1xf32>
    %336 = arith.mulf %332, %335 : vector<64x1xf32>
    %337 = vector.broadcast %336 : vector<64x1xf32> to vector<64x64xf32>
    %338 = arith.mulf %329, %337 : vector<64x64xf32>
    %c0_148 = arith.constant 0 : index
    %c3_149 = arith.constant 3 : index
    %c0_150 = arith.constant 0 : index
    %c0_151 = arith.constant 0 : index
    %339 = vector.load %arg11[%c0_148, %c3_149, %c0_150, %c0_151] : memref<1x4x64x64xf32, #tpu.memory_space<vmem>>, vector<1x1x64x64xf32>
    %340 = vector.shape_cast %339 : vector<1x1x64x64xf32> to vector<64x64xf32>
    %341 = vector.shape_cast %338 : vector<64x64xf32> to vector<1x1x64x64xf32>
    tpu.vector_store %arg11[%c0_148, %c3_149, %c0_150, %c0_151], %341 {strides = array<i32>} : memref<1x4x64x64xf32, #tpu.memory_space<vmem>>, vector<1x1x64x64xf32>,
    %cst_152 = arith.constant dense<0.000000e+00> : vector<64x16xf32>
    %342 = tpu.matmul %338, %262, %cst_152 {dimension_numbers = #tpu.dot_dimension_numbers<[1], [0], [0], [1], [0, 0, 1, 1], [], []>} : vector<64x64xf32>, vector<64x16xf32>, vector<64x16xf32> -> vector<64x16xf32>
    %343 = tpu.concatenate %93, %176, %259, %342 in 1 : vector<64x16xf32>, vector<64x16xf32>, vector<64x16xf32>, vector<64x16xf32> -> vector<64x64xf32>
    %c0_153 = arith.constant 0 : index
    %c0_154 = arith.constant 0 : index
    %c0_155 = arith.constant 0 : index
    %344 = vector.load %arg8[%c0_153, %c0_154, %c0_155] : memref<1x64x64xf32, #tpu.memory_space<vmem>>, vector<1x64x64xf32>
    %345 = vector.shape_cast %344 : vector<1x64x64xf32> to vector<64x64xf32>
    %cst_156 = arith.constant dense<0.000000e+00> : vector<64x64xf32>
    %346 = tpu.matmul %343, %345, %cst_156 {dimension_numbers = #tpu.dot_dimension_numbers<[1], [0], [0], [1], [0, 0, 1, 1], [], []>} : vector<64x64xf32>, vector<64x64xf32>, vector<64x64xf32> -> vector<64x64xf32>
    %c0_i32_157 = arith.constant 0 : i32
    %347 = arith.cmpi eq, %arg1, %c0_i32_157 : i32
    %348 = arith.extui %347 : i1 to i32
    %c0_i32_158 = arith.constant 0 : i32
    %349 = arith.cmpi ne, %348, %c0_i32_158 : i32
    scf.if %349 {
      %c0_165 = arith.constant 0 : index
      %c0_166 = arith.constant 0 : index
      %356 = vector.load %arg9[%c0_165, %c0_166] : memref<1x64xf32, #tpu.memory_space<vmem>>, vector<1x64xf32>
      %357 = vector.shape_cast %356 : vector<1x64xf32> to vector<1x64xf32>
      %358 = vector.broadcast %357 : vector<1x64xf32> to vector<64x64xf32>
      %c0_167 = arith.constant 0 : index
      %c0_168 = arith.constant 0 : index
      %c0_169 = arith.constant 0 : index
      %359 = vector.load %arg10[%c0_167, %c0_168, %c0_169] : memref<1x64x64xf32, #tpu.memory_space<vmem>>, vector<1x64x64xf32>
      %360 = vector.shape_cast %359 : vector<1x64x64xf32> to vector<64x64xf32>
      %361 = vector.shape_cast %358 : vector<64x64xf32> to vector<1x64x64xf32>
      tpu.vector_store %arg10[%c0_167, %c0_168, %c0_169], %361 {strides = array<i32>} : memref<1x64x64xf32, #tpu.memory_space<vmem>>, vector<1x64x64xf32>,
    } else {
    }
    %c0_159 = arith.constant 0 : index
    %c0_160 = arith.constant 0 : index
    %c0_161 = arith.constant 0 : index
    %350 = vector.load %arg10[%c0_159, %c0_160, %c0_161] : memref<1x64x64xf32, #tpu.memory_space<vmem>>, vector<1x64x64xf32>
    %351 = vector.shape_cast %350 : vector<1x64x64xf32> to vector<64x64xf32>
    %352 = arith.addf %351, %346 : vector<64x64xf32>
    %c0_162 = arith.constant 0 : index
    %c0_163 = arith.constant 0 : index
    %c0_164 = arith.constant 0 : index
    %353 = vector.load %arg10[%c0_162, %c0_163, %c0_164] : memref<1x64x64xf32, #tpu.memory_space<vmem>>, vector<1x64x64xf32>
    %354 = vector.shape_cast %353 : vector<1x64x64xf32> to vector<64x64xf32>
    %355 = vector.shape_cast %352 : vector<64x64xf32> to vector<1x64x64xf32>
    tpu.vector_store %arg10[%c0_162, %c0_163, %c0_164], %355 {strides = array<i32>} : memref<1x64x64xf32, #tpu.memory_space<vmem>>, vector<1x64x64xf32>,
    return
  }
  func.func @transform_0(%arg0: i32, %arg1: i32) -> (i32, i32, i32) {
    %c0_i32 = arith.constant 0 : i32
    %c0_i32_0 = arith.constant 0 : i32
    %c0_i32_1 = arith.constant 0 : i32
    return %arg0, %c0_i32, %c0_i32_0 : i32, i32, i32
  }
  func.func @transform_1(%arg0: i32, %arg1: i32) -> (i32, i32, i32) {
    %c0_i32 = arith.constant 0 : i32
    %c0_i32_0 = arith.constant 0 : i32
    %c0_i32_1 = arith.constant 0 : i32
    return %arg1, %c0_i32, %c0_i32_0 : i32, i32, i32
  }
  func.func @transform_2(%arg0: i32, %arg1: i32) -> (i32, i32, i32) {
    %c0_i32 = arith.constant 0 : i32
    %c0_i32_0 = arith.constant 0 : i32
    %c0_i32_1 = arith.constant 0 : i32
    return %arg1, %c0_i32, %c0_i32_0 : i32, i32, i32
  }
  func.func @transform_3(%arg0: i32, %arg1: i32) -> (i32, i32, i32, i32) {
    %c0_i32 = arith.constant 0 : i32
    %c0_i32_0 = arith.constant 0 : i32
    %c0_i32_1 = arith.constant 0 : i32
    %c0_i32_2 = arith.constant 0 : i32
    return %arg1, %c0_i32, %c0_i32_0, %c0_i32_1 : i32, i32, i32, i32
  }
  func.func @transform_4(%arg0: i32, %arg1: i32) -> (i32, i32, i32, i32) {
    %c0_i32 = arith.constant 0 : i32
    %c0_i32_0 = arith.constant 0 : i32
    %c0_i32_1 = arith.constant 0 : i32
    %c0_i32_2 = arith.constant 0 : i32
    return %arg1, %c0_i32, %c0_i32_0, %c0_i32_1 : i32, i32, i32, i32
  }
  func.func @transform_5(%arg0: i32, %arg1: i32) -> (i32, i32, i32, i32) {
    %c0_i32 = arith.constant 0 : i32
    %c0_i32_0 = arith.constant 0 : i32
    %c0_i32_1 = arith.constant 0 : i32
    %c0_i32_2 = arith.constant 0 : i32
    return %arg1, %c0_i32, %c0_i32_0, %c0_i32_1 : i32, i32, i32, i32
  }
  func.func @transform_6(%arg0: i32, %arg1: i32) -> (i32, i32, i32) {
    %c0_i32 = arith.constant 0 : i32
    %c0_i32_0 = arith.constant 0 : i32
    %c0_i32_1 = arith.constant 0 : i32
    return %arg1, %c0_i32, %c0_i32_0 : i32, i32, i32
  }
  func.func @transform_7(%arg0: i32, %arg1: i32) -> (i32, i32) {
    %c0_i32 = arith.constant 0 : i32
    %c0_i32_0 = arith.constant 0 : i32
    %c0_i32_1 = arith.constant 0 : i32
    return %c0_i32, %c0_i32_0 : i32, i32
  }
  func.func @transform_8(%arg0: i32, %arg1: i32) -> (i32, i32, i32) {
    %c0_i32 = arith.constant 0 : i32
    %c0_i32_0 = arith.constant 0 : i32
    %c0_i32_1 = arith.constant 0 : i32
    return %arg0, %c0_i32, %c0_i32_0 : i32, i32, i32
  }
  func.func @transform_9(%arg0: i32, %arg1: i32) -> (i32, i32, i32, i32) {
    %c0_i32 = arith.constant 0 : i32
    %c0_i32_0 = arith.constant 0 : i32
    %c0_i32_1 = arith.constant 0 : i32
    return %arg0, %arg1, %c0_i32, %c0_i32_0 : i32, i32, i32, i32
  }
}

</mosaic_0001>

<bundles_post_ra>
// kernel: tpu_custom_call.1
= control target key start
LH: loop header
LB: loop body
LE: loop exit
PB: predicated region body
PF: predicated region fallthrough
CT: control target
= control target key end

     0   :  { %s8876_s0 = inlined_call_operand.vmem [shape: f32[2,64,64], index: 0, kind: input, shape index: {}]   ;;  %s8877_s1 = inlined_call_operand.vmem [shape: f32[1,64,64], index: 1, kind: input, shape index: {}]   ;;  %s8878_s2 = inlined_call_operand.vmem [shape: f32[1,64,128], index: 2, kind: input, shape index: {}]   ;;  %s8879_s3 = inlined_call_operand.vmem [shape: f32[1,4,128,16], index: 3, kind: input, shape index: {}]   ;;  %s8880_s4 = inlined_call_operand.vmem [shape: f32[1,4,1,16], index: 4, kind: input, shape index: {}]   ;;  %s8881_s5 = inlined_call_operand.vmem [shape: f32[1,4,1,16], index: 5, kind: input, shape index: {}]   ;;  %s8882_s6 = inlined_call_operand.vmem [shape: f32[1,64,64], index: 6, kind: input, shape index: {}]   ;;  %s8883_s7 = inlined_call_operand.vmem [shape: f32[1,64], index: 7, kind: input, shape index: {}]   ;;  %s8884_s8 = inlined_call_operand.hbm [shape: f32[2,64,64], index: 8, kind: output, shape index: {0}]   ;;  %s8885_s9 = inlined_call_operand.hbm [shape: f32[2,4,64,64], index: 9, kind: output, shape index: {1}]  }
   0x1   :  { %8941 = sst [smem:[#allocation25_spill]] %s8876_s0 }
   0x2   :  { %8942 = sst [smem:[#allocation26_spill]] %s8877_s1 }
   0x3   :  { %8943 = sst [smem:[#allocation27_spill]] %s8878_s2 }
   0x4   :  { %8944 = sst [smem:[#allocation28_spill]] %s8881_s5 }
   0x5   :  { %15 = vsyncpa [#allocation3], 0 }
   0x6   :  { %17 = vsyncpa [#allocation3 + $0x1], 0 }
   0x7   :  { %18 = vsyncpa [#allocation5], 0 }
   0x8   :  { %20 = vsyncpa [#allocation5 + $0x1], 0  ;;  %s6802_s30 = smov 0   ;;  %s6804_s10 = smov 0  }
   0x9   :  { %s6806_s11 = smov 0   ;;  %s6808_s12 = smov 0  }
   0xa   :  { %s6810_s13 = smov 0   ;;  %s6812_s14 = smov 0  }
   0xb LB: > { %s4791_s15 = sadd.s32 4294967295, %s6735_s14   ;;  %s4792_s16 = sadd.s32 4294967294, %s6735_s14   ;;  %s6735_s14 = sphi %s6812_s14, %s26_s14   ;;  %s6731_s13 = sphi %s6810_s13, %s9282_s13   ;;  %s6727_s12 = sphi %s6808_s12, %s9281_s12   ;;  %s6723_s11 = sphi %s6806_s11, %s9280_s11   ;;  %s6719_s10 = sphi %s6804_s10, %s9279_s10   ;;  %s6715_s30 = sphi %s6802_s30, %s9278_s30  }
   0xc   : > { %s38_s17 = sadd.s32 1, %s6731_s13  ;;  %s248_s18 = sadd.s32 1, %s6723_s11 }
   0xd   : > { %p40_p0 = scmp.ge.s32.totalorder %s38_s17, 2  ;;  %p258_p1 = scmp.ne.s32.totalorder %s6723_s11, %s6719_s10 }
   0xe   : > { %p259_p2 = scmp.eq.s32.totalorder %s4791_s15, 1  ;;  %p264_p3 = scmp.ne.s32.totalorder %s6719_s10, %s6715_s30 }
   0xf   : > { %s9284_s17 = smov (%p40_p0, %s38_s17), 0  ;;  %p265_p5 = scmp.eq.s32.totalorder %s4792_s16, 1 }
  0x10   : > { %8945 = sst [smem:[#allocation8_spill]] %s9284_s17  ;;  %p6842_p4 = por %p259_p2, %p258_p1 }
  0x11   : > { %s245_s20 = ssub.s32 %s6731_s13, %s9284_s17  ;;  %p4801_p6 = scmp.ge.s32.totalorder %s6735_s14, 1 }
  0x12   : > { %p246_p7 = scmp.eq.s32.totalorder %s245_s20, 0  ;;  %p6849_p8 = por %p265_p5, %p264_p3 }
  0x13   : > { %p368_p9 = scmp.lt.s32.totalorder %s6735_s14, 3 }
  0x14   : > { %s6855_s22 = scalar_select %p246_p7, %s6723_s11, %s248_s18  }
  0x15   : > { %p369_p10 = pnand %p4801_p6, %p368_p9 }
  0x17   : > { %372 = sbr.rel (%p369_p10) target bundleno = 6038 (0x1796), region = 52 }
  0x1e   : > { %s8948_s1 = sld [smem:[#allocation26_spill]]  ;;  %s8949_s2 = sld [smem:[#allocation27_spill]]  ;;  %vm8887_vm0 = vcmask 523264   ;;  %v747_v25 = vld [vmem:[%s8879_s3] sm:$0xff]  ;;  %v748_v26 = vld [vmem:[%s8879_s3 + $0x8] sm:$0xff]  ;;  %vm8886_vm1 = vcmask 130048  }
  0x1f   : > { %p437_p11 = scmp.lt.s32.totalorder %s6727_s12, 1  ;;  %s8950_s0 = sld [smem:[#allocation25_spill]]  ;;  %v5908_v27 = vpack.c.bf16 %v748_v26, %v747_v25  ;;  %vm6923_vm2 = vmpackc.low %vm8886_vm1, %vm8886_vm1  ;;  %v749_v31 = vld [vmem:[%s8879_s3 + $0x10] sm:$0xff]  ;;  %v750_v32 = vld [vmem:[%s8879_s3 + $0x18] sm:$0xff] }
  0x20   : > { %v5914_v35 = vpack.c.bf16 %v750_v32, %v749_v31  ;;  %v751_v38 = vld [vmem:[%s8879_s3 + $0x20] sm:$0xff]  ;;  %v752_v39 = vld [vmem:[%s8879_s3 + $0x28] sm:$0xff]  ;;  %v753_v42 = vld [vmem:[%s8879_s3 + $0x30] sm:$0xff]  ;;  %s8953_s5 = sld [smem:[#allocation28_spill]]  ;;  %s8934_s20 = smov 127  }
  0x21   : > { %s438_s15 = scalar_select %p437_p11, %s6727_s12, 1  ;;  %v5920_v41 = vpack.c.bf16 %v752_v39, %v751_v38  ;;  %v754_v43 = vld [vmem:[%s8879_s3 + $0x38] sm:$0xff]  ;;  %v755_v45 = vld [vmem:[%s8879_s3 + $0x40] sm:$0xff]  ;;  %v756_v46 = vld [vmem:[%s8879_s3 + $0x48] sm:$0xff] }
  0x22   : > { %v5926_v44 = vpack.c.bf16 %v754_v43, %v753_v42  ;;  %v5932_v47 = vpack.c.bf16 %v756_v46, %v755_v45  ;;  %v757_v48 = vld [vmem:[%s8879_s3 + $0x50] sm:$0xff]  ;;  %v758_v49 = vld [vmem:[%s8879_s3 + $0x58] sm:$0xff]  ;;  %v759_v51 = vld [vmem:[%s8879_s3 + $0x60] sm:$0xff]  ;;  %s8920_s23 = smov 126   ;;  %s8924_s24 = smov 112  }
  0x23   : > { %s5117_s26 = sshll.u32 %s438_s15, 6  ;;  %v5938_v50 = vpack.c.bf16 %v758_v49, %v757_v48  ;;  %v760_v52 = vld [vmem:[%s8879_s3 + $0x68] sm:$0xff]  ;;  %v761_v54 = vld [vmem:[%s8879_s3 + $0x70] sm:$0xff]  ;;  %v762_v55 = vld [vmem:[%s8879_s3 + $0x78] sm:$0xff]  ;;  %v730_v48 = vlaneseq  ;;  %s8916_s15 = smov 120  }
  0x24   : > { %v479_v0 = vld [vmem:[%s8948_s1] sm:$0xff]  ;;  %v480_v1 = vld [vmem:[%s8948_s1 + $0x8] sm:$0xff]  ;;  %v481_v5 = vld [vmem:[%s8948_s1 + $0x10] sm:$0xff]  ;;  %v5944_v53 = vpack.c.bf16 %v760_v52, %v759_v51  ;;  %v5950_v56 = vpack.c.bf16 %v762_v55, %v761_v54  ;;  %s8914_s25 = smov 96   ;;  %s6743_s27 = smov 64  }
  0x25   : > { %v617_v2 = vld [vmem:[%s8949_s2] sm:$0xff]  ;;  %v5876_v3 = vpack.c.bf16 %v480_v1, %v479_v0  ;;  %v618_v4 = vld [vmem:[%s8949_s2 + $0x8] sm:$0xff]  ;;  %v482_v6 = vld [vmem:[%s8948_s1 + $0x18] sm:$0xff]  ;;  %s6898_s29 = scalar_lea.vmem %s8950_s0, %s5117_s26  ;;  %v7143_v49 = vshrl.u32 %v730_v48, 7  ;;  %s8922_s16 = smov 16  }
  0x26   : > { %v5892_v7 = vpack.c.bf16 %v618_v4, %v617_v2  ;;  %v5880_v8 = vpack.c.bf16 %v482_v6, %v481_v5  ;;  %v619_v9 = vld [vmem:[%s8949_s2 + $0x10] sm:$0xff]  ;;  %v620_v10 = vld [vmem:[%s8949_s2 + $0x18] sm:$0xff]  ;;  %v483_v11 = vld [vmem:[%s8948_s1 + $0x20] sm:$0xff]  ;;  %s7473_s18 = sand.u32 1, %s6719_s10   ;;  %s9115_s28 = smov 127  }
  0x27   : > { %5877 = vmatprep.subr.bf16.mxu0 %v5876_v3  ;;  %v5896_v12 = vpack.c.bf16 %v620_v10, %v619_v9  ;;  %v484_v13 = vld [vmem:[%s8948_s1 + $0x28] sm:$0xff]  ;;  %v621_v14 = vld [vmem:[%s8949_s2 + $0x20] sm:$0xff]  ;;  %v485_v18 = vld [vmem:[%s8948_s1 + $0x30] sm:$0xff]  ;;  %v732_v52 = vadd.s32 8, %v7143_v49  ;;  %s5119_s0 = sshll.u32 %s6727_s12, 12 }
  0x28   : > { %v622_v15 = vld [vmem:[%s8949_s2 + $0x28] sm:$0xff]  ;;  %5893 = vmatprep.subr.bf16.mxu1 %v5892_v7  ;;  %5879 = vmatpush3.bf16.msra.mxu0 %v5876_v3  ;;  %v5884_v16 = vpack.c.bf16 %v484_v13, %v483_v11  ;;  %v486_v19 = vld [vmem:[%s8948_s1 + $0x38] sm:$0xff]  ;;  %v471_v20 = vld [vmem:[%s6898_s29] sm:$0xff]  ;;  %s6747_s1 = smov 80  }
  0x29   : > { %5895 = vmatpush3.bf16.msra.mxu1 %v5892_v7  ;;  %5881 = vmatprep.subr.bf16.mxu0 %v5880_v8  ;;  %v5900_v17 = vpack.c.bf16 %v622_v15, %v621_v14  ;;  %v623_v21 = vld [vmem:[%s8949_s2 + $0x30] sm:$0xff]  ;;  %v624_v22 = vld [vmem:[%s8949_s2 + $0x38] sm:$0xff]  ;;  %v5888_v23 = vpack.c.bf16 %v486_v19, %v485_v18  ;;  %v472_v29 = vld [vmem:[%s6898_s29 + $0x8] sm:$0xff]  ;;  %v7154_v54 = vsub.s32 63, %v732_v52 }
  0x2a   : > { %5897 = vmatprep.subr.bf16.mxu1 %v5896_v12  ;;  %5408 = vmatprep.mubr.msk.f32.mxu0 %vm8887_vm0, %v471_v20  ;;  %v5904_v24 = vpack.c.bf16 %v624_v22, %v623_v21  ;;  %v473_v30 = vld [vmem:[%s6898_s29 + $0x10] sm:$0xff]  ;;  %v474_v33 = vld [vmem:[%s6898_s29 + $0x18] sm:$0xff]  ;;  %v475_v34 = vld [vmem:[%s6898_s29 + $0x20] sm:$0xff] }
  0x2b   : > { %5436 = vmatprep.mubr.msk.f32.mxu1 %vm8887_vm0, %v471_v20  ;;  %v476_v36 = vld [vmem:[%s6898_s29 + $0x28] sm:$0xff]  ;;  %v477_v37 = vld [vmem:[%s6898_s29 + $0x30] sm:$0xff]  ;;  %v478_v40 = vld [vmem:[%s6898_s29 + $0x38] sm:$0xff]  ;;  %s8918_s29 = smov 124  }
  0x2c   : > { %5883 = vmatpush3.bf16.msra.mxu0 %v5880_v8  ;;  %v4823_v57 = vld [vmem:[%s8953_s5] ss:$0 sm:$0xff] }
  0x2d   : > { %5899 = vmatpush3.bf16.msra.mxu1 %v5896_v12  ;;  %5885 = vmatprep.subr.bf16.mxu0 %v5884_v16  ;;  %v4822_v58 = vld [vmem:[%s8880_s4] ss:$0 sm:$0xff] }
  0x2e   : > { %5901 = vmatprep.subr.bf16.mxu1 %v5900_v17 }
  0x30   : > { %5887 = vmatpush3.bf16.msra.mxu0 %v5884_v16 }
  0x31   : > { %5903 = vmatpush3.bf16.msra.mxu1 %v5900_v17  ;;  %5889 = vmatprep.subr.bf16.mxu0 %v5888_v23 }
  0x32   : > { %5905 = vmatprep.subr.bf16.mxu1 %v5904_v24 }
  0x34   : > { %5891 = vmatpush3.bf16.msra.mxu0 %v5888_v23 }
  0x35   : > { %5907 = vmatpush3.bf16.msra.mxu1 %v5904_v24  ;;  %5910 = vmatprep.subr.msk.bf16.mxu0 %vm6923_vm2, %v5908_v27 }
  0x37   : > { %5409 = vmatmul.mubr.msk.f32.vlgmr.msra.gmra.mrb[0].mxu0 %vm8887_vm0, %v472_v29 }
  0x38   : > { %5437 = vmatmul.mubr.msk.f32.vlgmr.msra.gmra.mrb[0].mxu1 %vm8887_vm0, %v472_v29  ;;  %5411 = vmatprep.mubr.msk.f32.mxu0 %vm8887_vm0, %v473_v30 }
  0x39   : > { %5439 = vmatprep.mubr.msk.f32.mxu1 %vm8887_vm0, %v473_v30 }
  0x3b   : > { %5412 = vmatmul.mubr.msk.f32.gmra.mrb[2].mxu0 %vm8887_vm0, %v474_v33 }
  0x3c   : > { %5440 = vmatmul.mubr.msk.f32.gmra.mrb[2].mxu1 %vm8887_vm0, %v474_v33  ;;  %5414 = vmatprep.mubr.msk.f32.mxu0 %vm8887_vm0, %v475_v34 }
  0x3d   : > { %5442 = vmatprep.mubr.msk.f32.mxu1 %vm8887_vm0, %v475_v34  ;;  %5913 = vmatpush3.bf16.xpose.msk.msra.mxu0 %vm6923_vm2, %v5908_v27 }
  0x3e   : > { %5916 = vmatprep.subr.msk.bf16.mxu0 %vm6923_vm2, %v5914_v35 }
  0x3f   : > { %5415 = vmatmul.mubr.msk.f32.gmra.mrb[4].mxu0 %vm8887_vm0, %v476_v36 }
  0x40   : > { %5443 = vmatmul.mubr.msk.f32.gmra.mrb[4].mxu1 %vm8887_vm0, %v476_v36  ;;  %5417 = vmatprep.mubr.msk.f32.mxu0 %vm8887_vm0, %v477_v37 }
  0x41   : > { %5445 = vmatprep.mubr.msk.f32.mxu1 %vm8887_vm0, %v477_v37 }
  0x43   : > { %5418 = vmatmul.mubr.msk.f32.gmra.mrb[6].mxu0 %vm8887_vm0, %v478_v40 }
  0x44   : > { %5446 = vmatmul.mubr.msk.f32.gmra.mrb[6].mxu1 %vm8887_vm0, %v478_v40 }
  0x45   : > { %5919 = vmatpush3.bf16.xpose.msk.msra.mxu0 %vm6923_vm2, %v5914_v35 }
  0x46   : > { %5922 = vmatprep.subr.msk.bf16.mxu0 %vm6923_vm2, %v5920_v41 }
  0x4d   : > { %5925 = vmatpush3.bf16.xpose.msk.msra.mxu0 %vm6923_vm2, %v5920_v41 }
  0x4e   : > { %5928 = vmatprep.subr.msk.bf16.mxu0 %vm6923_vm2, %v5926_v44 }
  0x55   : > { %5931 = vmatpush3.bf16.xpose.msk.msra.mxu0 %vm6923_vm2, %v5926_v44 }
  0x56   : > { %5934 = vmatprep.subr.msk.bf16.mxu0 %vm6923_vm2, %v5932_v47 }
  0x5d   : > { %5937 = vmatpush3.bf16.xpose.msk.msra.mxu0 %vm6923_vm2, %v5932_v47 }
  0x5e   : > { %5940 = vmatprep.subr.msk.bf16.mxu0 %vm6923_vm2, %v5938_v50 }
  0x65   : > { %5943 = vmatpush3.bf16.xpose.msk.msra.mxu0 %vm6923_vm2, %v5938_v50  ;;  %v7146_v50 = vsub.s32 63, %v7143_v49 }
  0x66   : > { %5946 = vmatprep.subr.msk.bf16.mxu0 %vm6923_vm2, %v5944_v53 }
  0x67   : > { %v987_v51 = vand.u32 1, %v7146_v50 }
  0x69   : > { %vm7150_vm3 = vcmp.ne.s32.totalorder %v987_v51, 0 }
  0x6d   : > { %5949 = vmatpush3.bf16.xpose.msk.msra.mxu0 %vm6923_vm2, %v5944_v53 }
  0x6e   : > { %5952 = vmatprep.subr.msk.bf16.mxu0 %vm6923_vm2, %v5950_v56 }
  0x75   : > { %5955 = vmatpush3.bf16.xpose.msk.msra.mxu0 %vm6923_vm2, %v5950_v56 }
 0x10a   : > { %v7028_v59 = vpop.f32.mrb[0].mxu0 }
 0x10b   : > { %v7030_v60 = vpop.f32.mrb[0].mxu1  ;;  %v7032_v61 = vpop.f32.mrb[1].mxu0  ;;  %v786_v2 = vadd.f32 %v7028_v59, %v4823_v57  ;;  %v771_v25 = vadd.f32 %v7028_v59, %v4822_v58 }
 0x10c   : > { %v7034_v62 = vpop.f32.mrb[1].mxu1  ;;  %v785_v63 = vadd.f32 %v4823_v57, %v7032_v61  ;;  %v770_v0 = vadd.f32 %v4822_v58, %v7032_v61 }
 0x10d   : > { %v5956_v1 = vpack.c.bf16 %v7030_v60, %v7034_v62 }
 0x10e   : > { %5480 = vmatprep.mubr.msk.f32.mxu0 %vm8886_vm1, %v785_v63  ;;  %5508 = vmatprep.mubr.msk.f32.mxu1 %vm8886_vm1, %v770_v0  ;;  %v7043_v3 = vpop.f32.mrb[2].mxu0 }
 0x10f   : > { %5958 = vmatprep.subr.msk.bf16.mxu1 %vm6923_vm2, %v5956_v1  ;;  %5481 = vmatmul.mubr.msk.f32.vlgmr.msra.gmra.mrb[8].mxu0 %vm8886_vm1, %v786_v2  ;;  %v7048_v4 = vpop.f32.mrb[2].mxu1  ;;  %v7050_v5 = vpop.f32.mrb[3].mxu0  ;;  %v788_v6 = vadd.f32 %v7043_v3, %v4823_v57  ;;  %v773_v26 = vadd.f32 %v7043_v3, %v4822_v58  ;;  %v1043_v2 = vand.u32 2, %v7146_v50 }
 0x110   : > { %5961 = vmatpush3.bf16.xpose.msk.msra.mxu1 %vm6923_vm2, %v5956_v1  ;;  %v7055_v7 = vpop.f32.mrb[3].mxu1  ;;  %v787_v8 = vadd.f32 %v4823_v57, %v7050_v5  ;;  %v772_v24 = vadd.f32 %v4822_v58, %v7050_v5  ;;  %v733_v1 = vadd.s32 16, %v7143_v49 }
 0x111   : > { %v5962_v9 = vpack.c.bf16 %v7048_v4, %v7055_v7  ;;  %vm7179_vm5 = vcmp.ne.s32.totalorder %v1043_v2, 0  ;;  %v8968_v2 = vmov 0 }
 0x112   : > { %v7060_v10 = vpop.f32.mrb[4].mxu0  ;;  %5483 = vmatprep.mubr.msk.f32.mxu0 %vm8886_vm1, %v787_v8  ;;  %v735_v8 = vadd.s32 32, %v7143_v49 }
 0x113   : > { %5964 = vmatprep.subr.msk.bf16.mxu1 %vm6923_vm2, %v5962_v9  ;;  %v7065_v11 = vpop.f32.mrb[4].mxu1  ;;  %v7067_v12 = vpop.f32.mrb[5].mxu0  ;;  %5484 = vmatmul.mubr.msk.f32.gmra.mrb[10].mxu0 %vm8886_vm1, %v788_v6  ;;  %v790_v13 = vadd.f32 %v7060_v10, %v4823_v57  ;;  %v775_v29 = vadd.f32 %v7060_v10, %v4822_v58  ;;  %v7176_v6 = vsub.s32 63, %v733_v1 }
 0x114   : > { %v7071_v14 = vpop.f32.mrb[5].mxu1  ;;  %v789_v15 = vadd.f32 %v4823_v57, %v7067_v12  ;;  %v774_v27 = vadd.f32 %v4822_v58, %v7067_v12 }
 0x115   : > { %v5968_v16 = vpack.c.bf16 %v7065_v11, %v7071_v14 }
 0x116   : > { %5486 = vmatprep.mubr.msk.f32.mxu0 %vm8886_vm1, %v789_v15  ;;  %v7077_v17 = vpop.f32.mrb[6].mxu0  ;;  %v7184_v15 = vsub.s32 63, %v735_v8  ;;  %v7240_v8 = vpack.i.bf16 %v7030_v60, %v7034_v62  ;;  %v1045_v60 = vand.u32 2, %v7176_v6  ;;  %v737_v62 = vadd.s32 48, %v7143_v49 }
 0x117   : > { %v7079_v18 = vpop.f32.mrb[6].mxu1  ;;  %5487 = vmatmul.mubr.msk.f32.gmra.mrb[12].mxu0 %vm8886_vm1, %v790_v13  ;;  %v7082_v19 = vpop.f32.mrb[7].mxu0  ;;  %v792_v20 = vadd.f32 %v7077_v17, %v4823_v57  ;;  %v777_v31 = vadd.f32 %v7077_v17, %v4822_v58  ;;  %v989_v13 = vand.u32 1, %v7176_v6 }
 0x118   : > { %5967 = vmatpush3.bf16.xpose.msk.msra.mxu1 %vm6923_vm2, %v5962_v9  ;;  %v7087_v21 = vpop.f32.mrb[7].mxu1  ;;  %v791_v22 = vadd.f32 %v4823_v57, %v7082_v19  ;;  %v776_v30 = vadd.f32 %v4822_v58, %v7082_v19  ;;  %v988_v57 = vand.u32 1, %v7154_v54  ;;  %vm7264_vm12 = vcmp.ne.s32.totalorder %v1045_v60, 0 }
 0x119   : > { %5970 = vmatprep.subr.msk.bf16.mxu1 %vm6923_vm2, %v5968_v16  ;;  %v5974_v23 = vpack.c.bf16 %v7079_v18, %v7087_v21  ;;  %vm7189_vm6 = vcmp.ne.s32.totalorder %v989_v13, 0  ;;  %v7248_v13 = vpack.i.bf16 %v7065_v11, %v7071_v14  ;;  %v8972_v11 = vmov 0 }
 0x11a   : > { %5489 = vmatprep.mubr.msk.f32.mxu0 %vm8886_vm1, %v791_v22  ;;  %vm7161_vm4 = vcmp.ne.s32.totalorder %v988_v57, 0  ;;  %v8973_v11 = vsel %vm7264_vm12, 4294967295, %v8972_v11  ;;  %v1047_v14 = vand.u32 2, %v7184_v15  ;;  %v8980_v60 = vmov 0 }
 0x11b   : > { %5490 = vmatmul.mubr.msk.f32.gmra.mrb[14].mxu0 %vm8886_vm1, %v792_v20 }
 0x11c   : > { %vm7274_vm13 = vcmp.ne.s32.totalorder %v1047_v14, 0 }
 0x120   : > { %5973 = vmatpush3.bf16.xpose.msk.msra.mxu1 %vm6923_vm2, %v5968_v16 }
 0x121   : > { %5976 = vmatprep.subr.msk.bf16.mxu1 %vm6923_vm2, %v5974_v23 }
 0x128   : > { %5979 = vmatpush3.bf16.xpose.msk.msra.mxu1 %vm6923_vm2, %v5974_v23  ;;  %v991_v23 = vand.u32 1, %v7184_v15 }
 0x12a   : > { %vm7198_vm7 = vcmp.ne.s32.totalorder %v991_v23, 0  ;;  %v8970_v23 = vmov 0 }
 0x12f   : > { %5509 = vmatmul.mubr.msk.f32.vlgmr.msra.gmra.mrb[8].mxu1 %vm8886_vm1, %v771_v25 }
 0x130   : > { %5511 = vmatprep.mubr.msk.f32.mxu1 %vm8886_vm1, %v772_v24  ;;  %v734_v24 = vadd.s32 24, %v7143_v49 }
 0x133   : > { %5512 = vmatmul.mubr.msk.f32.gmra.mrb[10].mxu1 %vm8886_vm1, %v773_v26 }
 0x134   : > { %5514 = vmatprep.mubr.msk.f32.mxu1 %vm8886_vm1, %v774_v27 }
 0x137   : > { %5515 = vmatmul.mubr.msk.f32.gmra.mrb[12].mxu1 %vm8886_vm1, %v775_v29 }
 0x138   : > { %5517 = vmatprep.mubr.msk.f32.mxu1 %vm8886_vm1, %v776_v30  ;;  %v1044_v30 = vand.u32 2, %v7154_v54 }
 0x13a   : > { %vm7209_vm8 = vcmp.ne.s32.totalorder %v1044_v30, 0 }
 0x13b   : > { %5518 = vmatmul.mubr.msk.f32.gmra.mrb[14].mxu1 %vm8886_vm1, %v777_v31  ;;  %v7203_v31 = vsub.s32 63, %v734_v24  ;;  %v8974_v24 = vmov 0 }
 0x13c   : > { %v8975_v24 = vsel %vm7274_vm13, 4294967295, %v8974_v24 }
 0x13d   : > { %v990_v51 = vand.u32 1, %v7203_v31 }
 0x13f   : > { %vm7219_vm9 = vcmp.ne.s32.totalorder %v990_v51, 0 }
 0x1e2   : > { %v5482_v32 = vpop.f32.mrb[8].mxu0 }
 0x1e3   : > { %v932_v33 = vpop.f32.mrb[9].mxu0 }
 0x1e4   : > { %971 = vrot.lane.b32.xlu0 %v932_v33, %s8934_s20 }
 0x1e6   : > { %v7117_v34 = vpop.f32.mrb[10].mxu0 }
 0x1e7   : > { %v942_v35 = vpop.f32.mrb[11].mxu0 }
 0x1e8   : > { %973 = vrot.lane.b32.xlu0 %v5482_v32, %s8934_s20 }
 0x1ea   : > { %v7120_v36 = vpop.f32.mrb[12].mxu0 }
 0x1eb   : > { %v952_v37 = vpop.f32.mrb[13].mxu0 }
 0x1ec   : > { %979 = vrot.lane.b32.xlu0 %v952_v37, %s8934_s20 }
 0x1ee   : > { %v7123_v38 = vpop.f32.mrb[14].mxu0 }
 0x1ef   : > { %v7125_v39 = vpop.f32.mrb[15].mxu0 }
 0x202   : > { %v7127_v40 = vpop.f32.mrb[8].mxu1 }
 0x203   : > { %v7129_v41 = vpop.f32.mrb[9].mxu1 }
 0x206   : > { %v7131_v42 = vpop.f32.mrb[10].mxu1 }
 0x207   : > { %v7133_v43 = vpop.f32.mrb[11].mxu1 }
 0x20a   : > { %v7135_v44 = vpop.f32.mrb[12].mxu1 }
 0x20b   : > { %v7137_v45 = vpop.f32.mrb[13].mxu1 }
 0x20e   : > { %v7139_v46 = vpop.f32.mrb[14].mxu1 }
 0x20f   : > { %v7141_v47 = vpop.f32.mrb[15].mxu1 }
 0x256   : > { %v972_v55 = vpop.permute.xlu0 %971 }
 0x257   : > { %v1019_v56 = vsel %vm7150_vm3, %v972_v55, %v932_v33 }
 0x258   : > { %1027 = vrot.lane.b32.xlu1 %v1019_v56, %s8920_s23 }
 0x25a   : > { %v974_v58 = vpop.permute.xlu0 %973 }
 0x25b   : > { %v1020_v0 = vsel %vm7161_vm4, %v974_v58, %v5482_v32  ;;  %v736_v32 = vadd.s32 40, %v7143_v49 }
 0x25c   : > { %975 = vrot.lane.b32.xlu1 %v942_v35, %s8934_s20 }
 0x25d   : > { %v7214_v52 = vsub.s32 63, %v736_v32  ;;  %v8976_v32 = vmov 0 }
 0x25e   : > { %v980_v27 = vpop.permute.xlu0 %979 }
 0x25f   : > { %v1023_v48 = vsel %vm7198_vm7, %v980_v27, %v952_v37  ;;  %v992_v37 = vand.u32 1, %v7214_v52 }
 0x260   : > { %1029 = vrot.lane.b32.xlu1 %v1020_v0, %s8920_s23 }
 0x261   : > { %vm7228_vm10 = vcmp.ne.s32.totalorder %v992_v37, 0 }
 0x262   : > { %v8969_v2 = vsel %vm7228_vm10, 4294967295, %v8968_v2 }
 0x264   : > { %977 = vrot.lane.b32.xlu1 %v7117_v34, %s8934_s20 }
 0x268   : > { %981 = vrot.lane.b32.xlu1 %v7120_v36, %s8934_s20 }
 0x26c   : > { %983 = vrot.lane.b32.xlu1 %v7125_v39, %s8934_s20 }
 0x2ca   : > { %v1028_v16 = vpop.permute.xlu1 %1027 }
 0x2cb   : > { %v1075_v20 = vsel %vm7179_vm5, %v1028_v16, %v1019_v56  ;;  %v1099_v16 = vand.u32 4, %v7146_v50 }
 0x2cc   : > { %1083 = vrot.lane.b32.xlu0 %v1075_v20, %s8918_s29 }
 0x2cd   : > { %vm7255_vm11 = vcmp.ne.s32.totalorder %v1099_v16, 0 }
 0x2ce   : > { %v976_v25 = vpop.permute.xlu1 %975  ;;  %v8971_v23 = vsel %vm7255_vm11, 4294967295, %v8970_v23 }
 0x2cf   : > { %v1021_v26 = vsel %vm7189_vm6, %v976_v25, %v942_v35 }
 0x2d0   : > { %1031 = vrot.lane.b32.xlu0 %v1021_v26, %s8920_s23 }
 0x2d2   : > { %v1030_v33 = vpop.permute.xlu1 %1029 }
 0x2d3   : > { %v1076_v56 = vsel %vm7209_vm8, %v1030_v33, %v1020_v0 }
 0x2d4   : > { %1035 = vrot.lane.b32.xlu0 %v1023_v48, %s8920_s23 }
 0x2d6   : > { %v978_v55 = vpop.permute.xlu1 %977 }
 0x2d7   : > { %v1022_v58 = vsel %vm7219_vm9, %v978_v55, %v7117_v34  ;;  %v7244_v34 = vpack.i.bf16 %v7048_v4, %v7055_v7  ;;  %v8978_v55 = vmov 0 }
 0x2d8   : > { %1085 = vrot.lane.b32.xlu0 %v1076_v56, %s8918_s29 }
 0x2da   : > { %v982_v1 = vpop.permute.xlu1 %981 }
 0x2db   : > { %v1024_v0 = vsel %vm7228_vm10, %v982_v1, %v7120_v36  ;;  %v7252_v36 = vpack.i.bf16 %v7079_v18, %v7087_v21  ;;  %v7269_v18 = vsub.s32 63, %v737_v62  ;;  %v738_v1 = vadd.s32 56, %v7143_v49 }
 0x2dc   : > { %1033 = vrot.lane.b32.xlu0 %v1022_v58, %s8920_s23  ;;  %v1048_v62 = vand.u32 2, %v7214_v52 }
 0x2de   : > { %v984_v30 = vpop.permute.xlu1 %983 }
 0x2e0   : > { %1037 = vrot.lane.b32.xlu0 %v1024_v0, %s8920_s23 }
 0x2e4   : > { %985 = vrot.lane.b32.xlu0 %v7123_v38, %s8934_s20 }
 0x33e   : > { %v1084_v4 = vpop.permute.xlu0 %1083 }
 0x33f   : > { %v1131_v7 = vsel %vm7255_vm11, %v1084_v4, %v1075_v20  ;;  %v993_v20 = vand.u32 1, %v7269_v18  ;;  %v8982_v4 = vmov 0 }
 0x340   : > { %1139 = vrot.lane.b32.xlu1 %v1131_v7, %s8916_s15  ;;  %v1103_v7 = vand.u32 4, %v7184_v15  ;;  %v8986_v15 = vmov 0 }
 0x341   : > { %vm7282_vm14 = vcmp.ne.s32.totalorder %v993_v20, 0  ;;  %v8984_v20 = vmov 0 }
 0x342   : > { %v1032_v21 = vpop.permute.xlu0 %1031  ;;  %v8977_v32 = vsel %vm7282_vm14, 4294967295, %v8976_v32  ;;  %v1025_v33 = vsel %vm7282_vm14, %v984_v30, %v7125_v39  ;;  %v1101_v39 = vand.u32 4, %v7176_v6  ;;  %vm7325_vm14 = vcmp.ne.s32.totalorder %v1103_v7, 0 }
 0x343   : > { %v1077_v50 = vsel %vm7264_vm12, %v1032_v21, %v1021_v26  ;;  %v1100_v26 = vand.u32 4, %v7154_v54  ;;  %v1046_v54 = vand.u32 2, %v7203_v31  ;;  %v8987_v15 = vsel %vm7325_vm14, 4294967295, %v8986_v15 }
 0x344   : > { %1087 = vrot.lane.b32.xlu1 %v1077_v50, %s8918_s29  ;;  %vm7309_vm0 = vcmp.ne.s32.totalorder %v1101_v39, 0  ;;  %v1049_v30 = vand.u32 2, %v7269_v18  ;;  %v1102_v39 = vand.u32 4, %v7203_v31  ;;  %v8994_v31 = vmov 0 }
 0x345   : > { %vm7291_vm15 = vcmp.ne.s32.totalorder %v1100_v26, 0  ;;  %vm7302_vm1 = vcmp.ne.s32.totalorder %v1046_v54, 0  ;;  %v8983_v4 = vsel %vm7309_vm0, 4294967295, %v8982_v4 }
 0x346   : > { %v1036_v25 = vpop.permute.xlu0 %1035  ;;  %v8979_v55 = vsel %vm7291_vm15, 4294967295, %v8978_v55  ;;  %v8981_v60 = vsel %vm7302_vm1, 4294967295, %v8980_v60 }
 0x347   : > { %v1079_v27 = vsel %vm7274_vm13, %v1036_v25, %v1023_v48 }
 0x348   : > { %1091 = vrot.lane.b32.xlu1 %v1079_v27, %s8918_s29 }
 0x34a   : > { %v1086_v51 = vpop.permute.xlu0 %1085 }
 0x34b   : > { %v1132_v48 = vsel %vm7291_vm15, %v1086_v51, %v1076_v56  ;;  %v7307_v56 = vsub.s32 63, %v738_v1  ;;  %vm7319_vm15 = vcmp.ne.s32.totalorder %v1048_v62, 0  ;;  %v8992_v62 = vmov 0 }
 0x34c   : > { %1039 = vrot.lane.b32.xlu1 %v1025_v33, %s8920_s23  ;;  %v8985_v20 = vsel %vm7319_vm15, 4294967295, %v8984_v20 }
 0x34d   : > { %v994_v25 = vand.u32 1, %v7307_v56 }
 0x34e   : > { %v1034_v37 = vpop.permute.xlu0 %1033 }
 0x34f   : > { %v1078_v6 = vsel %vm7302_vm1, %v1034_v37, %v1022_v58  ;;  %vm7340_vm1 = vcmp.ne.s32.totalorder %v1049_v30, 0  ;;  %v8990_v37 = vmov 0 }
 0x350   : > { %1197 = vrot.lane.b32.xlu1 %v1132_v48, %s8924_s24  ;;  %v8988_v48 = vmov 0  ;;  %v8991_v37 = vsel %vm7340_vm1, 4294967295, %v8990_v37 }
 0x352   : > { %v1038_v49 = vpop.permute.xlu0 %1037 }
 0x353   : > { %v1080_v26 = vsel %vm7319_vm15, %v1038_v49, %v1024_v0 }
 0x356   : > { %v986_v51 = vpop.permute.xlu0 %985 }
 0x3b2   : > { %v1140_v16 = vpop.permute.xlu1 %1139 }
 0x3b3   : > { %1195 = vrot.lane.b32.xlu0 %v1140_v16, %s8924_s24 }
 0x3b6   : > { %v1088_v14 = vpop.permute.xlu1 %1087 }
 0x3b7   : > { %1089 = vrot.lane.b32.xlu0 %v1078_v6, %s8918_s29  ;;  %v1133_v21 = vsel %vm7309_vm0, %v1088_v14, %v1077_v50  ;;  %vm7335_vm0 = vcmp.ne.s32.totalorder %v994_v25, 0  ;;  %v1050_v14 = vand.u32 2, %v7307_v56 }
 0x3b8   : > { %1143 = vrot.lane.b32.xlu1 %v1133_v21, %s8916_s15  ;;  %v8989_v48 = vsel %vm7335_vm0, 4294967295, %v8988_v48  ;;  %v1026_v0 = vsel %vm7335_vm0, %v986_v51, %v7123_v38  ;;  %v1104_v38 = vand.u32 4, %v7214_v52  ;;  %v1105_v21 = vand.u32 4, %v7269_v18 }
 0x3ba   : > { %v1092_v58 = vpop.permute.xlu1 %1091  ;;  %vm7377_vm0 = vcmp.ne.s32.totalorder %v1105_v21, 0 }
 0x3bb   : > { %1093 = vrot.lane.b32.xlu0 %v1080_v26, %s8918_s29  ;;  %v1135_v50 = vsel %vm7325_vm14, %v1092_v58, %v1079_v27  ;;  %vm7354_vm14 = vcmp.ne.s32.totalorder %v1102_v39, 0  ;;  %v8998_v58 = vmov 0 }
 0x3bc   : > { %1147 = vrot.lane.b32.xlu1 %v1135_v50, %s8916_s15  ;;  %v8993_v62 = vsel %vm7354_vm14, 4294967295, %v8992_v62  ;;  %v8999_v58 = vsel %vm7377_vm0, 4294967295, %v8998_v58 }
 0x3be   : > { %v1040_v54 = vpop.permute.xlu1 %1039 }
 0x3bf   : > { %1041 = vrot.lane.b32.xlu0 %v1026_v0, %s8920_s23  ;;  %v1081_v27 = vsel %vm7340_vm1, %v1040_v54, %v1025_v33  ;;  %vm7363_vm1 = vcmp.ne.s32.totalorder %v1104_v38, 0  ;;  %s9044_s23 = smov 112  }
 0x3c0   : > { %1095 = vrot.lane.b32.xlu1 %v1081_v27, %s8918_s29  ;;  %v8995_v31 = vsel %vm7363_vm1, 4294967295, %v8994_v31 }
 0x3c2   : > { %v1198_v1 = vpop.permute.xlu1 %1197 }
 0x3c4   : > { %1253 = vrot.lane.b32.xlu1 %v1198_v1, %s8914_s25 }
 0x425   : > { %v1196_v16 = vpop.permute.xlu0 %1195 }
 0x426   : > { %1251 = vrot.lane.b32.xlu0 %v1196_v16, %s8914_s25 }
 0x429   : > { %v1090_v7 = vpop.permute.xlu0 %1089 }
 0x42a   : > { %v1144_v49 = vpop.permute.xlu1 %1143  ;;  %v1134_v33 = vsel %vm7354_vm14, %v1090_v7, %v1078_v6  ;;  %vm7373_vm14 = vcmp.ne.s32.totalorder %v1050_v14, 0  ;;  %v8996_v6 = vmov 0 }
 0x42b   : > { %1257 = vrot.lane.b32.xlu1 %v1134_v33, %s8914_s25  ;;  %1255 = vrot.lane.b32.xlu0 %v1144_v49, %s8914_s25  ;;  %v8997_v6 = vsel %vm7373_vm14, 4294967295, %v8996_v6  ;;  %s9051_s25 = smov 120  }
 0x42d   : > { %v1094_v25 = vpop.permute.xlu0 %1093 }
 0x42e   : > { %v1148_v30 = vpop.permute.xlu1 %1147  ;;  %v1136_v52 = vsel %vm7363_vm1, %v1094_v25, %v1080_v26  ;;  %vm9000_vm1 = vcmask 523264  }
 0x42f   : > { %1205 = vrot.lane.b32.xlu1 %v1136_v52, %s8924_s24  ;;  %1203 = vrot.lane.b32.xlu0 %v1148_v30, %s8924_s24  ;;  %vm9001_vm15 = vmmov %vm9000_vm1  ;;  %v9003_v30 = vmov 0 }
 0x431   : > { %v1042_v51 = vpop.permute.xlu0 %1041 }
 0x432   : > { %v1096_v50 = vpop.permute.xlu1 %1095  ;;  %v1082_v18 = vsel %vm7373_vm14, %v1042_v51, %v1026_v0 }
 0x433   : > { %1097 = vrot.lane.b32.xlu0 %v1082_v18, %s8918_s29  ;;  %v1137_v26 = vsel %vm7377_vm0, %v1096_v50, %v1081_v27  ;;  %v1106_v27 = vand.u32 4, %v7307_v56  ;;  %vm9002_vm0 = vmmov %vm9000_vm1  ;;  %s9045_s29 = smov 126  }
 0x434   : > { %1151 = vrot.lane.b32.xlu1 %v1137_v26, %s8916_s15  ;;  %vm9006_vm14 = vmmov %vm9002_vm0  ;;  %s9047_s15 = smov 124  }
 0x435   : > { %vm9007_vm13 = vmmov %vm9002_vm0 }
 0x436   : > { %v1254_v54 = vpop.permute.xlu1 %1253  ;;  %vm9024_vm12 = vmmov %vm9002_vm0 }
 0x437   : > { %v1427_v1 = vadd.f32 %v7127_v40, %v1254_v54  ;;  %vm9025_vm11 = vmmov %vm9002_vm0 }
 0x439   : > { %v1463_v39 = vsel %vm9000_vm1, %v1427_v1, -inf  ;;  %vm7399_vm1 = vcmp.ne.s32.totalorder %v1106_v27, 0 }
 0x43a   : > { %v9004_v30 = vsel %vm7399_vm1, 4294967295, %v9003_v30 }
 0x458   : > { %1464 = vmax.xlane.f32.xlu1 %v1463_v39 }
 0x498   : > { %v1252_v16 = vpop.permute.xlu0 %1251 }
 0x499   : > { %v1422_v38 = vadd.f32 %v7129_v41, %v1252_v16 }
 0x49b   : > { %v1460_v7 = vsel %vm9001_vm15, %v1422_v38, -inf  ;;  %vm9005_vm15 = vmmov %vm9002_vm0 }
 0x49c   : > { %1461 = vmax.xlane.f32.xlu0 %v1460_v7 }
 0x49d   : > { %v1256_v0 = vpop.permute.xlu0 %1255  ;;  %v1258_v49 = vpop.permute.xlu1 %1257 }
 0x49e   : > { %v7392_v33 = vadd.f32 %v7133_v43, %v1256_v0  ;;  %v1437_v14 = vadd.f32 %v7131_v42, %v1258_v49  ;;  %v4891_v0 = vld [vmem:[%s8953_s5 + $0x1] ss:$0 sm:$0xff] }
 0x4a0   : > { %v1466_v40 = vsel %vm9002_vm0, %v7392_v33, -inf  ;;  %v1469_v56 = vsel %vm9006_vm14, %v1437_v14, -inf  ;;  %vm9008_vm14 = vmmov %vm9002_vm0 }
 0x4a1   : > { %1467 = vmax.xlane.f32.xlu0 %v1466_v40  ;;  %v1204_v21 = vpop.permute.xlu0 %1203  ;;  %v1206_v25 = vpop.permute.xlu1 %1205 }
 0x4a2   : > { %v1442_v41 = vadd.f32 %v7137_v45, %v1204_v21  ;;  %v7404_v52 = vadd.f32 %v7135_v44, %v1206_v25 }
 0x4a4   : > { %v1472_v43 = vsel %vm9005_vm15, %v1442_v41, -inf  ;;  %v1475_v26 = vsel %vm9002_vm0, %v7404_v52, -inf  ;;  %vm9010_vm15 = vmmov %vm9002_vm0 }
 0x4a5   : > { %v1098_v42 = vpop.permute.xlu0 %1097  ;;  %1473 = vmax.xlane.f32.xlu1 %v1472_v43  ;;  %1470 = vmax.xlane.f32.xlu0 %v1469_v56 }
 0x4a6   : > { %v1138_v51 = vsel %vm7399_vm1, %v1098_v42, %v1082_v18  ;;  %v1152_v50 = vpop.permute.xlu1 %1151  ;;  %vm9023_vm1 = vmmov %vm9002_vm0 }
 0x4a7   : > { %v1452_v45 = vadd.f32 %v7141_v47, %v1152_v50  ;;  %v7414_v54 = vadd.f32 %v7139_v46, %v1138_v51 }
 0x4a9   : > { %1476 = vmax.xlane.f32.xlu0 %v1475_v26  ;;  %v1478_v44 = vsel %vm9007_vm13, %v1452_v45, -inf  ;;  %v1481_v39 = vsel %vm9008_vm14, %v7414_v54, -inf  ;;  %vm9009_vm13 = vmmov %vm9002_vm0 }
 0x4aa   : > { %1479 = vmax.xlane.f32.xlu1 %v1478_v44  ;;  %vm9011_vm14 = vmmov %vm9002_vm0 }
 0x4ad   : > { %1482 = vmax.xlane.f32.xlu0 %v1481_v39 }
 0x4bb   : > { %6358 = vrot.lane.b32.xlu1 %v7240_v8, %s6743_s27 }
 0x4bf   : > { %6368 = vrot.lane.b32.xlu1 %v7248_v13, %s6743_s27 }
 0x4c3   : > { %6363 = vrot.lane.b32.xlu0 %v7244_v34, %s6743_s27 }
 0x4e5   : > { %v1465_v46 = vpop.xlane.xlu1 %1464 }
 0x4e6   : > { %v1485_v47 = vsub.f32 %v1427_v1, %v1465_v46 }
 0x4e8   : > { %v1494_v18 = vmul.f32 1.442695, %v1485_v47 }
 0x4ea   : > { %6497 = vpow2.f32 %v1494_v18 }
 0x4f4   : > { %v7425_v16 = vpop.eup %6497 }
 0x4f5   : > { %v1511_v7 = vsel %vm9009_vm13, %v7425_v16, 0.0  ;;  %vm9012_vm13 = vmmov %vm9002_vm0 }
 0x4f6   : > { %1512 = vadd.xlane.f32.xlu0 %v1511_v7 }
 0x50c   : > { %1775 = vrot.lane.b32.xlu0 %v4891_v0, %s8922_s16 }
 0x529   : > { %v1462_v49 = vpop.xlane.xlu0 %1461 }
 0x52a   : > { %v1484_v27 = vsub.f32 %v1422_v38, %v1462_v49 }
 0x52c   : > { %v1492_v40 = vmul.f32 1.442695, %v1484_v27 }
 0x52e   : > { %6499 = vpow2.f32 %v1492_v40  ;;  %v1468_v1 = vpop.xlane.xlu0 %1467 }
 0x532   : > { %v1471_v21 = vpop.xlane.xlu0 %1470  ;;  %v1474_v25 = vpop.xlane.xlu1 %1473 }
 0x533   : > { %v1487_v43 = vsub.f32 %v1437_v14, %v1471_v21  ;;  %v1488_v56 = vsub.f32 %v1442_v41, %v1474_v25 }
 0x535   : > { %v1498_v42 = vmul.f32 1.442695, %v1487_v43  ;;  %v1500_v51 = vmul.f32 1.442695, %v1488_v56 }
 0x536   : > { %v1477_v50 = vpop.xlane.xlu0 %1476 }
 0x537   : > { %6501 = vpow2.f32 %v1498_v42  ;;  %v1480_v26 = vpop.xlane.xlu1 %1479 }
 0x538   : > { %v7433_v44 = vpop.eup %6499  ;;  %v1490_v39 = vsub.f32 %v1452_v45, %v1480_v26  ;;  %6503 = vpow2.f32 %v1500_v51 }
 0x539   : > { %v1508_v46 = vsel %vm9010_vm15, %v7433_v44, 0.0  ;;  %vm9013_vm15 = vmmov %vm9002_vm0 }
 0x53a   : > { %v1504_v38 = vmul.f32 1.442695, %v1490_v39  ;;  %v1483_v47 = vpop.xlane.xlu0 %1482  ;;  %1509 = vadd.xlane.f32.xlu1 %v1508_v46 }
 0x53b   : > { %v6359_v18 = vpop.permute.xlu1 %6358 }
 0x53c   : > { %v6361_v7 = vunpack.i.h.bf16 %v6359_v18  ;;  %v6360_v0 = vunpack.i.l.bf16 %v6359_v18  ;;  %6505 = vpow2.f32 %v1504_v38  ;;  %v1486_v38 = vsub.f32 %v7392_v33, %v1468_v1 }
 0x53e   : > { %v6364_v14 = vpop.permute.xlu0 %6363  ;;  %v5980_v41 = vpack.c.bf16 %v6361_v7, %v6360_v0  ;;  %v1496_v18 = vmul.f32 1.442695, %v1486_v38  ;;  %v1489_v7 = vsub.f32 %v7404_v52, %v1477_v50 }
 0x53f   : > { %v6366_v49 = vunpack.i.h.bf16 %v6364_v14  ;;  %v6365_v27 = vunpack.i.l.bf16 %v6364_v14  ;;  %v6369_v40 = vpop.permute.xlu1 %6368  ;;  %v1491_v14 = vsub.f32 %v7414_v54, %v1483_v47 }
 0x540   : > { %v6371_v21 = vunpack.i.h.bf16 %v6369_v40  ;;  %v6370_v25 = vunpack.i.l.bf16 %v6369_v40  ;;  %5981 = vmatprep.subr.bf16.mxu1 %v5980_v41  ;;  %6507 = vpow2.f32 %v1496_v18  ;;  %v1502_v0 = vmul.f32 1.442695, %v1489_v7 }
 0x541   : > { %v7437_v45 = vpop.eup %6501  ;;  %5983 = vmatpush3.bf16.msra.mxu1 %v5980_v41  ;;  %v5984_v43 = vpack.c.bf16 %v6366_v49, %v6365_v27  ;;  %v1506_v41 = vmul.f32 1.442695, %v1491_v14 }
 0x542   : > { %v1517_v56 = vsel %vm9002_vm0, %v7437_v45, 0.0  ;;  %v7441_v42 = vpop.eup %6503  ;;  %v5988_v51 = vpack.c.bf16 %v6371_v21, %v6370_v25  ;;  %6509 = vpow2.f32 %v1502_v0 }
 0x543   : > { %1518 = vadd.xlane.f32.xlu0 %v1517_v56  ;;  %5985 = vmatprep.subr.bf16.mxu1 %v5984_v43  ;;  %v1520_v26 = vsel %vm9011_vm14, %v7441_v42, 0.0  ;;  %6511 = vpow2.f32 %v1506_v41  ;;  %vm9014_vm14 = vmmov %vm9002_vm0  ;;  %v4889_v41 = vld [vmem:[%s8880_s4 + $0x1] ss:$0 sm:$0xff] }
 0x545   : > { %5987 = vmatpush3.bf16.msra.mxu1 %v5984_v43 }
 0x546   : > { %5989 = vmatprep.subr.bf16.mxu1 %v5988_v51  ;;  %v7445_v39 = vpop.eup %6505 }
 0x547   : > { %1521 = vadd.xlane.f32.xlu0 %v1520_v26  ;;  %v1526_v46 = vsel %vm9012_vm13, %v7445_v39, 0.0  ;;  %vm9015_vm13 = vmmov %vm9002_vm0 }
 0x549   : > { %5991 = vmatpush3.bf16.msra.mxu1 %v5988_v51 }
 0x54a   : > { %v7454_v49 = vpop.eup %6507 }
 0x54b   : > { %6373 = vrot.lane.b32.xlu1 %v7252_v36, %s6743_s27  ;;  %1527 = vadd.xlane.f32.xlu0 %v1526_v46  ;;  %v1514_v27 = vsel %vm9013_vm15, %v7454_v49, 0.0  ;;  %s4803_s27 = sshll.u32 %s7473_s18, 8  ;;  %vm9016_vm15 = vmmov %vm9002_vm0 }
 0x54c   : > { %v7458_v40 = vpop.eup %6509  ;;  %s7487_s26 = scalar_lea.vmem [#allocation4], %s4803_s27 }
 0x54d   : > { %v1523_v33 = vsel %vm9002_vm0, %v7458_v40, 0.0  ;;  %v7462_v52 = vpop.eup %6511  ;;  %s4596_s17 = sshll.u32 %s7487_s26, 4  ;;  %s8765_s17 = int_to_ptr.vmem [resolvable:$true] %s4596_s17 }
 0x54e   : > { %v1529_v54 = vsel %vm9014_vm14, %v7462_v52, 0.0  ;;  %vm9017_vm14 = vmmov %vm9002_vm0 }
 0x56f   : > { %1515 = vadd.xlane.f32.xlu1 %v1514_v27 }
 0x573   : > { %1524 = vadd.xlane.f32.xlu1 %v1523_v33  ;;  %v4872_v33 = vld [vmem:[%s8879_s3 + $0x80] sm:$0xff] }
 0x577   : > { %1530 = vadd.xlane.f32.xlu1 %v1529_v54  ;;  %v4873_v54 = vld [vmem:[%s8879_s3 + $0x88] sm:$0xff] }
 0x583   : > { %v1513_v1 = vpop.xlane.xlu0 %1512 }
 0x584   : > { %6513 = vrcp.f32 %v1513_v1 }
 0x587   : > { %v1776_v50 = vpop.permute.xlu0 %1775 }
 0x588   : > { %v1779_v47 = vadd.f32 %v7028_v59, %v1776_v50  ;;  %v1778_v21 = vadd.f32 %v1776_v50, %v7032_v61  ;;  %v1780_v25 = vadd.f32 %v1776_v50, %v7050_v5  ;;  %v1781_v43 = vadd.f32 %v7043_v3, %v1776_v50 }
 0x589   : > { %v1782_v26 = vadd.f32 %v1776_v50, %v7067_v12  ;;  %v1783_v46 = vadd.f32 %v7060_v10, %v1776_v50  ;;  %v1784_v7 = vadd.f32 %v1776_v50, %v7082_v19  ;;  %v1785_v0 = vadd.f32 %v7077_v17, %v1776_v50 }
 0x58a   : > { %1796 = vrot.lane.b32.xlu1 %v1779_v47, %s8924_s24  ;;  %1794 = vrot.lane.b32.xlu0 %v1778_v21, %s8924_s24  ;;  %v5996_v21 = vpack.c.bf16 %v4873_v54, %v4872_v33 }
 0x58e   : > { %v6514_v56 = vpop.eup %6513  ;;  %1798 = vrot.lane.b32.xlu1 %v1780_v25, %s8924_s24  ;;  %1800 = vrot.lane.b32.xlu0 %v1781_v43, %s8924_s24 }
 0x58f   : > { %v1541_v51 = vmul.f32 %v6514_v56, %v1513_v1 }
 0x591   : > { %v1549_v38 = vsub.f32 2.0, %v1541_v51 }
 0x592   : > { %1802 = vrot.lane.b32.xlu1 %v1782_v26, %s8924_s24  ;;  %1804 = vrot.lane.b32.xlu0 %v1783_v46, %s8924_s24 }
 0x593   : > { %v1557_v18 = vmul.f32 %v6514_v56, %v1549_v38  ;;  %v4874_v38 = vld [vmem:[%s8879_s3 + $0x90] sm:$0xff] }
 0x595   : > { %v1565_v14 = vmul.f32 %v7425_v16, %v1557_v18  ;;  %v4875_v18 = vld [vmem:[%s8879_s3 + $0x98] sm:$0xff] }
 0x596   : > { %1806 = vrot.lane.b32.xlu1 %v1784_v7, %s8924_s24  ;;  %1808 = vrot.lane.b32.xlu0 %v1785_v0, %s8924_s24 }
 0x597   : > { %1573 = vst.msk [vmem:[%s7487_s26 + $0x8] sm:$0xff] %vm9015_vm13, %v1565_v14  ;;  %vm9018_vm13 = vmmov %vm9002_vm0 }
 0x59a   : > { %1757 = vrot.lane.b32.xlu0 %v4889_v41, %s8922_s16  ;;  %v6002_v41 = vpack.c.bf16 %v4875_v18, %v4874_v38  ;;  %s8936_s16 = smov 48  }
 0x59e   : > { %6383 = vrot.lane.b32.xlu0 %v7244_v34, %s8924_s24  ;;  %s9067_s24 = smov 96  }
 0x5c7   : > { %v1510_v27 = vpop.xlane.xlu1 %1509 }
 0x5c8   : > { %6515 = vrcp.f32 %v1510_v27 }
 0x5cb   : > { %v6374_v16 = vpop.permute.xlu1 %6373 }
 0x5cc   : > { %v6376_v1 = vunpack.i.h.bf16 %v6374_v16  ;;  %v6375_v50 = vunpack.i.l.bf16 %v6374_v16 }
 0x5ce   : > { %v5992_v47 = vpack.c.bf16 %v6376_v1, %v6375_v50  ;;  %v4877_v1 = vld [vmem:[%s8879_s3 + $0xa8] sm:$0xff] }
 0x5d0   : > { %v1519_v25 = vpop.xlane.xlu0 %1518  ;;  %5993 = vmatprep.subr.bf16.mxu1 %v5992_v47 }
 0x5d1   : > { %6517 = vrcp.f32 %v1519_v25  ;;  %5995 = vmatpush3.bf16.msra.mxu1 %v5992_v47 }
 0x5d2   : > { %v6516_v43 = vpop.eup %6515  ;;  %5998 = vmatprep.subr.msk.bf16.mxu1 %vm6923_vm2, %v5996_v21 }
 0x5d3   : > { %v1540_v56 = vmul.f32 %v6516_v43, %v1510_v27 }
 0x5d4   : > { %v1522_v51 = vpop.xlane.xlu0 %1521 }
 0x5d5   : > { %v1548_v26 = vsub.f32 2.0, %v1540_v56  ;;  %6519 = vrcp.f32 %v1522_v51 }
 0x5d7   : > { %v1556_v46 = vmul.f32 %v6516_v43, %v1548_v26 }
 0x5d8   : > { %v1528_v7 = vpop.xlane.xlu0 %1527 }
 0x5d9   : > { %6521 = vrcp.f32 %v1528_v7  ;;  %v1564_v0 = vmul.f32 %v7433_v44, %v1556_v46  ;;  %v4876_v44 = vld [vmem:[%s8879_s3 + $0xa0] sm:$0xff] }
 0x5db   : > { %v6518_v16 = vpop.eup %6517  ;;  %1572 = vst.msk [vmem:[%s7487_s26] sm:$0xff] %vm9016_vm15, %v1564_v0  ;;  %5536 = vmatprep.mubr.msk.f32.mxu1 %vm9002_vm0, %v1564_v0  ;;  %vm9019_vm15 = vmmov %vm9002_vm0 }
 0x5dc   : > { %v1543_v27 = vmul.f32 %v6518_v16, %v1519_v25  ;;  %5537 = vmatmul.mubr.msk.f32.vlgmr.msra.gmra.mrb[16].mxu1 %vm9017_vm14, %v1565_v14  ;;  %v6008_v25 = vpack.c.bf16 %v4877_v1, %v4876_v44  ;;  %v4884_v44 = vld [vmem:[%s8879_s3 + $0xe0] sm:$0xff]  ;;  %v4885_v1 = vld [vmem:[%s8879_s3 + $0xe8] sm:$0xff]  ;;  %vm9020_vm14 = vmmov %vm9002_vm0 }
 0x5dd   : > { %6001 = vmatpush3.bf16.xpose.msk.msra.mxu1 %vm6923_vm2, %v5996_v21 }
 0x5de   : > { %v1551_v33 = vsub.f32 2.0, %v1543_v27  ;;  %6004 = vmatprep.subr.msk.bf16.mxu1 %vm6923_vm2, %v6002_v41  ;;  %v4883_v27 = vld [vmem:[%s8879_s3 + $0xd8] sm:$0xff] }
 0x5df   : > { %v6520_v54 = vpop.eup %6519 }
 0x5e0   : > { %v1559_v50 = vmul.f32 %v6518_v16, %v1551_v33  ;;  %v1544_v47 = vmul.f32 %v6520_v54, %v1522_v51  ;;  %v4878_v51 = vld [vmem:[%s8879_s3 + $0xb0] sm:$0xff] }
 0x5e2   : > { %v1552_v14 = vsub.f32 2.0, %v1544_v47  ;;  %v1567_v21 = vmul.f32 %v7437_v45, %v1559_v50  ;;  %v4879_v45 = vld [vmem:[%s8879_s3 + $0xb8] sm:$0xff]  ;;  %v6032_v47 = vpack.c.bf16 %v4885_v1, %v4884_v44 }
 0x5e3   : > { %v6522_v43 = vpop.eup %6521 }
 0x5e4   : > { %v1560_v56 = vmul.f32 %v6520_v54, %v1552_v14  ;;  %v1546_v26 = vmul.f32 %v6522_v43, %v1528_v7  ;;  %1575 = vst.msk [vmem:[%s7487_s26 + $0x18] sm:$0xff] %vm9018_vm13, %v1567_v21  ;;  %v6014_v7 = vpack.c.bf16 %v4879_v45, %v4878_v51  ;;  %vm9021_vm13 = vmmov %vm9002_vm0 }
 0x5e5   : > { %6007 = vmatpush3.bf16.xpose.msk.msra.mxu1 %vm6923_vm2, %v6002_v41  ;;  %v4881_v41 = vld [vmem:[%s8879_s3 + $0xc8] sm:$0xff] }
 0x5e6   : > { %v1554_v46 = vsub.f32 2.0, %v1546_v26  ;;  %6010 = vmatprep.subr.msk.bf16.mxu1 %vm6923_vm2, %v6008_v25  ;;  %v1568_v38 = vmul.f32 %v7441_v42, %v1560_v56  ;;  %v4880_v42 = vld [vmem:[%s8879_s3 + $0xc0] sm:$0xff]  ;;  %v4887_v56 = vld [vmem:[%s8879_s3 + $0xf8] sm:$0xff] }
 0x5e7   : > { %v6020_v16 = vpack.c.bf16 %v4881_v41, %v4880_v42 }
 0x5e8   : > { %v1562_v18 = vmul.f32 %v6522_v43, %v1554_v46  ;;  %1576 = vst.msk [vmem:[%s7487_s26 + $0x20] sm:$0xff] %vm9019_vm15, %v1568_v38  ;;  %v4886_v43 = vld [vmem:[%s8879_s3 + $0xf0] sm:$0xff]  ;;  %vm9022_vm15 = vmmov %vm9002_vm0 }
 0x5e9   : > { %v6038_v51 = vpack.c.bf16 %v4887_v56, %v4886_v43 }
 0x5ea   : > { %v1570_v0 = vmul.f32 %v7445_v39, %v1562_v18  ;;  %v4882_v39 = vld [vmem:[%s8879_s3 + $0xd0] sm:$0xff] }
 0x5eb   : > { %v6026_v33 = vpack.c.bf16 %v4883_v27, %v4882_v39 }
 0x5ec   : > { %1578 = vst.msk [vmem:[%s7487_s26 + $0x30] sm:$0xff] %vm9002_vm0, %v1570_v0 }
 0x5ed   : > { %6013 = vmatpush3.bf16.xpose.msk.msra.mxu1 %vm6923_vm2, %v6008_v25 }
 0x5ee   : > { %6016 = vmatprep.subr.msk.bf16.mxu1 %vm6923_vm2, %v6014_v7 }
 0x5f5   : > { %6019 = vmatpush3.bf16.xpose.msk.msra.mxu1 %vm6923_vm2, %v6014_v7 }
 0x5f6   : > { %6022 = vmatprep.subr.msk.bf16.mxu1 %vm6923_vm2, %v6020_v16 }
 0x5fc   : > { %v1516_v54 = vpop.xlane.xlu1 %1515  ;;  %v1795_v1 = vpop.permute.xlu0 %1794 }
 0x5fd   : > { %6523 = vrcp.f32 %v1516_v54  ;;  %6025 = vmatpush3.bf16.xpose.msk.msra.mxu1 %vm6923_vm2, %v6020_v16 }
 0x5fe   : > { %6028 = vmatprep.subr.msk.bf16.mxu1 %vm6923_vm2, %v6026_v33 }
 0x600   : > { %v1525_v50 = vpop.xlane.xlu1 %1524 }
 0x601   : > { %6525 = vrcp.f32 %v1525_v50 }
 0x604   : > { %v1531_v14 = vpop.xlane.xlu1 %1530 }
 0x605   : > { %6527 = vrcp.f32 %v1531_v14  ;;  %6031 = vmatpush3.bf16.xpose.msk.msra.mxu1 %vm6923_vm2, %v6026_v33 }
 0x606   : > { %6034 = vmatprep.subr.msk.bf16.mxu1 %vm6923_vm2, %v6032_v47 }
 0x607   : > { %v6524_v25 = vpop.eup %6523 }
 0x608   : > { %v1542_v26 = vmul.f32 %v6524_v25, %v1516_v54  ;;  %v1797_v44 = vpop.permute.xlu1 %1796 }
 0x60a   : > { %v1550_v46 = vsub.f32 2.0, %v1542_v26 }
 0x60b   : > { %v6526_v45 = vpop.eup %6525 }
 0x60c   : > { %v1558_v18 = vmul.f32 %v6524_v25, %v1550_v46  ;;  %v1545_v7 = vmul.f32 %v6526_v45, %v1525_v50 }
 0x60d   : > { %6037 = vmatpush3.bf16.xpose.msk.msra.mxu1 %vm6923_vm2, %v6032_v47 }
 0x60e   : > { %v1553_v42 = vsub.f32 2.0, %v1545_v7  ;;  %v1566_v41 = vmul.f32 %v7454_v49, %v1558_v18  ;;  %6040 = vmatprep.subr.msk.bf16.mxu1 %vm6923_vm2, %v6038_v51 }
 0x60f   : > { %v6528_v16 = vpop.eup %6527 }
 0x610   : > { %v1561_v39 = vmul.f32 %v6526_v45, %v1553_v42  ;;  %v1547_v27 = vmul.f32 %v6528_v16, %v1531_v14  ;;  %1574 = vst.msk [vmem:[%s7487_s26 + $0x10] sm:$0xff] %vm9020_vm14, %v1566_v41  ;;  %5539 = vmatprep.mubr.msk.f32.mxu1 %vm9021_vm13, %v1566_v41  ;;  %vm9026_vm14 = vmmov %vm9002_vm0 }
 0x611   : > { %5540 = vmatmul.mubr.msk.f32.gmra.mrb[18].mxu1 %vm9022_vm15, %v1567_v21  ;;  %v1799_v21 = vpop.permute.xlu1 %1798  ;;  %vm9027_vm13 = vmmov %vm9002_vm0  ;;  %vm9028_vm15 = vcmask 130048  }
 0x612   : > { %v1555_v33 = vsub.f32 2.0, %v1547_v27  ;;  %5542 = vmatprep.mubr.msk.f32.mxu1 %vm9002_vm0, %v1568_v38  ;;  %v1569_v54 = vmul.f32 %v7458_v40, %v1561_v39  ;;  %v1801_v40 = vpop.permute.xlu0 %1800  ;;  %vm9029_vm0 = vmmov %vm9028_vm15 }
 0x613   : > { %vm9033_vm10 = vmmov %vm9029_vm0 }
 0x614   : > { %v1563_v49 = vmul.f32 %v6528_v16, %v1555_v33  ;;  %1577 = vst.msk [vmem:[%s7487_s26 + $0x28] sm:$0xff] %vm9023_vm1, %v1569_v54  ;;  %vm9030_vm1 = vmmov %vm9029_vm0 }
 0x615   : > { %5543 = vmatmul.mubr.msk.f32.gmra.mrb[20].mxu1 %vm9024_vm12, %v1569_v54  ;;  %v1803_v38 = vpop.permute.xlu1 %1802  ;;  %vm9031_vm12 = vmmov %vm9029_vm0 }
 0x616   : > { %5545 = vmatprep.mubr.msk.f32.mxu1 %vm9025_vm11, %v1570_v0  ;;  %6043 = vmatpush3.bf16.xpose.msk.msra.mxu1 %vm6923_vm2, %v6038_v51  ;;  %v1571_v50 = vmul.f32 %v7462_v52, %v1563_v49  ;;  %v1805_v0 = vpop.permute.xlu0 %1804  ;;  %vm9032_vm11 = vmmov %vm9029_vm0 }
 0x618   : > { %1579 = vst.msk [vmem:[%s7487_s26 + $0x38] sm:$0xff] %vm9026_vm14, %v1571_v50  ;;  %vm9034_vm14 = vmmov %vm9029_vm0 }
 0x619   : > { %5546 = vmatmul.mubr.msk.f32.gmra.mrb[22].mxu1 %vm9027_vm13, %v1571_v50  ;;  %v1807_v47 = vpop.permute.xlu1 %1806  ;;  %vm9035_vm13 = vmmov %vm9029_vm0 }
 0x61a   : > { %5580 = vmatprep.mubr.msk.f32.mxu1 %vm9028_vm15, %v1795_v1  ;;  %v1809_v52 = vpop.permute.xlu0 %1808  ;;  %vm9048_vm15 = vmmov %vm9029_vm0 }
 0x61d   : > { %5581 = vmatmul.mubr.msk.f32.vlgmr.msra.gmra.mrb[24].mxu1 %vm9029_vm0, %v1797_v44 }
 0x61e   : > { %5583 = vmatprep.mubr.msk.f32.mxu1 %vm9030_vm1, %v1799_v21  ;;  %v1758_v33 = vpop.permute.xlu0 %1757  ;;  %vm9049_vm1 = vnez %v8969_v2 }
 0x61f   : > { %v1760_v44 = vadd.f32 %v1758_v33, %v7032_v61 }
 0x621   : > { %5584 = vmatmul.mubr.msk.f32.gmra.mrb[26].mxu1 %vm9031_vm12, %v1801_v40  ;;  %vm9050_vm12 = vnez %v8971_v23 }
 0x622   : > { %5586 = vmatprep.mubr.msk.f32.mxu1 %vm9032_vm11, %v1803_v38  ;;  %v6384_v50 = vpop.permute.xlu0 %6383  ;;  %vm9052_vm11 = vmmov %vm9029_vm0 }
 0x623   : > { %v6386_v40 = vunpack.i.h.bf16 %v6384_v50  ;;  %v6385_v38 = vunpack.i.l.bf16 %v6384_v50 }
 0x625   : > { %5587 = vmatmul.mubr.msk.f32.gmra.mrb[28].mxu1 %vm9033_vm10, %v1805_v0  ;;  %vm9046_vm10 = vmmov %vm9029_vm0 }
 0x626   : > { %5589 = vmatprep.mubr.msk.f32.mxu1 %vm9034_vm14, %v1807_v47  ;;  %vm9053_vm14 = vmmov %vm9029_vm0 }
 0x629   : > { %5590 = vmatmul.mubr.msk.f32.gmra.mrb[30].mxu1 %vm9035_vm13, %v1809_v52  ;;  %vm9054_vm13 = vmmov %vm9029_vm0 }
 0x6af   : > { %v7614_v14 = vpop.f32.mrb[16].mxu1 }
 0x6b0   : > { %9036 = vst [vmem:[#allocation9_spill] sm:$0xff] %v7614_v14  ;;  %v7616_v25 = vpop.f32.mrb[17].mxu1 }
 0x6b1   : > { %9037 = vst [vmem:[#allocation10_spill] sm:$0xff] %v7616_v25 }
 0x6e4   : > { %v7618_v43 = vpop.f32.mrb[18].mxu1 }
 0x6e5   : > { %9038 = vst [vmem:[#allocation11_spill] sm:$0xff] %v7618_v43  ;;  %v7620_v56 = vpop.f32.mrb[19].mxu1 }
 0x6e6   : > { %9039 = vst [vmem:[#allocation12_spill] sm:$0xff] %v7620_v56 }
 0x6e8   : > { %v7622_v26 = vpop.f32.mrb[20].mxu1 }
 0x6e9   : > { %9040 = vst [vmem:[#allocation13_spill] sm:$0xff] %v7622_v26  ;;  %v7624_v46 = vpop.f32.mrb[21].mxu1 }
 0x6ea   : > { %9041 = vst [vmem:[#allocation14_spill] sm:$0xff] %v7624_v46 }
 0x6ec   : > { %v7626_v51 = vpop.f32.mrb[22].mxu1 }
 0x6ed   : > { %9042 = vst [vmem:[#allocation15_spill] sm:$0xff] %v7626_v51  ;;  %v7628_v45 = vpop.f32.mrb[23].mxu1  ;;  %v1761_v51 = vadd.f32 %v7028_v59, %v1758_v33 }
 0x6ee   : > { %9043 = vst [vmem:[#allocation16_spill] sm:$0xff] %v7628_v45  ;;  %v6050_v45 = vpack.c.bf16 %v6386_v40, %v6385_v38  ;;  %v1762_v40 = vadd.f32 %v1758_v33, %v7050_v5  ;;  %v1764_v38 = vadd.f32 %v1758_v33, %v7067_v12 }
 0x6f0   : > { %v5582_v18 = vpop.f32.mrb[24].mxu1 }
 0x6f1   : > { %v1940_v7 = vpop.f32.mrb[25].mxu1 }
 0x6f2   : > { %1979 = vrot.lane.b32.xlu1 %v1940_v7, %s8934_s20 }
 0x6f4   : > { %v7631_v42 = vpop.f32.mrb[26].mxu1 }
 0x6f5   : > { %v7633_v41 = vpop.f32.mrb[27].mxu1 }
 0x6f6   : > { %6378 = vrot.lane.b32.xlu1 %v7240_v8, %s9044_s23 }
 0x6f8   : > { %v7637_v16 = vpop.f32.mrb[28].mxu1 }
 0x6f9   : > { %v7639_v39 = vpop.f32.mrb[29].mxu1 }
 0x6fa   : > { %1981 = vrot.lane.b32.xlu1 %v5582_v18, %s8934_s20 }
 0x6fc   : > { %v7642_v27 = vpop.f32.mrb[30].mxu1 }
 0x6fd   : > { %v7644_v54 = vpop.f32.mrb[31].mxu1 }
 0x6fe   : > { %6388 = vrot.lane.b32.xlu1 %v7248_v13, %s9044_s23 }
 0x702   : > { %2131 = vrot.lane.b32.xlu1 %v1760_v44, %s9044_s23 }
 0x706   : > { %1983 = vrot.lane.b32.xlu1 %v7633_v41, %s8934_s20 }
 0x764   : > { %v1980_v49 = vpop.permute.xlu1 %1979 }
 0x765   : > { %v1995_v1 = vsel %vm7150_vm3, %v1980_v49, %v1940_v7 }
 0x766   : > { %2003 = vrot.lane.b32.xlu0 %v1995_v1, %s9045_s29 }
 0x768   : > { %v6379_v21 = vpop.permute.xlu1 %6378 }
 0x769   : > { %v6381_v0 = vunpack.i.h.bf16 %v6379_v21  ;;  %v6380_v47 = vunpack.i.l.bf16 %v6379_v21 }
 0x76a   : > { %6393 = vrot.lane.b32.xlu0 %v7252_v36, %s9044_s23 }
 0x76b   : > { %v6044_v52 = vpack.c.bf16 %v6381_v0, %v6380_v47  ;;  %v1766_v0 = vadd.f32 %v1758_v33, %v7082_v19 }
 0x76c   : > { %v1982_v44 = vpop.permute.xlu1 %1981 }
 0x76d   : > { %6046 = vmatprep.subr.msk.bf16.mxu0 %vm6923_vm2, %v6044_v52  ;;  %v1996_v7 = vsel %vm7161_vm4, %v1982_v44, %v5582_v18  ;;  %v1763_v44 = vadd.f32 %v7043_v3, %v1758_v33 }
 0x76e   : > { %2133 = vrot.lane.b32.xlu0 %v1761_v51, %s9044_s23  ;;  %6049 = vmatpush3.bf16.xpose.msk.msra.mxu0 %vm6923_vm2, %v6044_v52 }
 0x76f   : > { %2005 = vrot.lane.b32.xlu1 %v1996_v7, %s9045_s29  ;;  %6052 = vmatprep.subr.msk.bf16.mxu0 %vm6923_vm2, %v6050_v45 }
 0x770   : > { %v6389_v49 = vpop.permute.xlu1 %6388 }
 0x771   : > { %v6391_v50 = vunpack.i.h.bf16 %v6389_v49  ;;  %v6390_v21 = vunpack.i.l.bf16 %v6389_v49 }
 0x772   : > { %1987 = vrot.lane.b32.xlu0 %v7639_v39, %s8934_s20 }
 0x773   : > { %2135 = vrot.lane.b32.xlu1 %v1762_v40, %s9044_s23  ;;  %v6056_v51 = vpack.c.bf16 %v6391_v50, %v6390_v21 }
 0x774   : > { %v2132_v18 = vpop.permute.xlu1 %2131 }
 0x775   : > { %5608 = vmatprep.mubr.msk.f32.mxu0 %vm9046_vm10, %v2132_v18  ;;  %v1765_v18 = vadd.f32 %v7060_v10, %v1758_v33  ;;  %vm9055_vm10 = vmmov %vm9029_vm0 }
 0x776   : > { %6055 = vmatpush3.bf16.xpose.msk.msra.mxu0 %vm6923_vm2, %v6050_v45 }
 0x777   : > { %2139 = vrot.lane.b32.xlu1 %v1764_v38, %s9044_s23  ;;  %6058 = vmatprep.subr.msk.bf16.mxu0 %vm6923_vm2, %v6056_v51  ;;  %v1767_v38 = vadd.f32 %v7077_v17, %v1758_v33 }
 0x778   : > { %v1984_v49 = vpop.permute.xlu1 %1983 }
 0x77b   : > { %2143 = vrot.lane.b32.xlu1 %v1766_v0, %s9044_s23 }
 0x77e   : > { %6061 = vmatpush3.bf16.xpose.msk.msra.mxu0 %vm6923_vm2, %v6056_v51 }
 0x77f   : > { %1985 = vrot.lane.b32.xlu1 %v7631_v42, %s8934_s20 }
 0x783   : > { %1989 = vrot.lane.b32.xlu1 %v7637_v16, %s8934_s20 }
 0x787   : > { %1991 = vrot.lane.b32.xlu1 %v7644_v54, %s8934_s20 }
 0x7d8   : > { %v2004_v45 = vpop.permute.xlu0 %2003 }
 0x7d9   : > { %v2019_v47 = vsel %vm7179_vm5, %v2004_v45, %v1995_v1 }
 0x7da   : > { %2027 = vrot.lane.b32.xlu0 %v2019_v47, %s9047_s15 }
 0x7dc   : > { %v6394_v52 = vpop.permute.xlu0 %6393 }
 0x7dd   : > { %v6396_v50 = vunpack.i.h.bf16 %v6394_v52  ;;  %v6395_v21 = vunpack.i.l.bf16 %v6394_v52  ;;  %v1997_v52 = vsel %vm7189_vm6, %v1984_v49, %v7633_v41 }
 0x7de   : > { %2137 = vrot.lane.b32.xlu0 %v1763_v44, %s9044_s23 }
 0x7df   : > { %v6062_v40 = vpack.c.bf16 %v6396_v50, %v6395_v21 }
 0x7e0   : > { %v2134_v1 = vpop.permute.xlu0 %2133 }
 0x7e1   : > { %v2006_v51 = vpop.permute.xlu1 %2005  ;;  %6064 = vmatprep.subr.msk.bf16.mxu0 %vm6923_vm2, %v6062_v40 }
 0x7e2   : > { %6067 = vmatpush3.bf16.xpose.msk.msra.mxu0 %vm6923_vm2, %v6062_v40  ;;  %2141 = vrot.lane.b32.xlu0 %v1765_v18, %s9044_s23  ;;  %v2020_v40 = vsel %vm7209_vm8, %v2006_v51, %v1996_v7 }
 0x7e4   : > { %v1988_v44 = vpop.permute.xlu0 %1987 }
 0x7e5   : > { %v2136_v0 = vpop.permute.xlu1 %2135  ;;  %v1999_v33 = vsel %vm7198_vm7, %v1988_v44, %v7639_v39 }
 0x7e6   : > { %2145 = vrot.lane.b32.xlu0 %v1767_v38, %s9044_s23 }
 0x7e9   : > { %v2140_v45 = vpop.permute.xlu1 %2139  ;;  %5609 = vmatmul.mubr.msk.f32.vlgmr.msra.gmra.mrb[16].mxu0 %vm9048_vm15, %v2134_v1  ;;  %vm9056_vm15 = vmmov %vm9029_vm0 }
 0x7ea   : > { %5611 = vmatprep.mubr.msk.f32.mxu0 %vm9029_vm0, %v2136_v0  ;;  %2007 = vrot.lane.b32.xlu0 %v1997_v52, %s9045_s29  ;;  %vm9057_vm0 = vnez %v8973_v11 }
 0x7ed   : > { %v2144_v50 = vpop.permute.xlu1 %2143 }
 0x7ee   : > { %2011 = vrot.lane.b32.xlu0 %v1999_v33, %s9045_s29 }
 0x7f1   : > { %v1986_v21 = vpop.permute.xlu1 %1985 }
 0x7f2   : > { %2029 = vrot.lane.b32.xlu0 %v2020_v40, %s9047_s15  ;;  %v1998_v41 = vsel %vm7219_vm9, %v1986_v21, %v7631_v42 }
 0x7f5   : > { %v1990_v49 = vpop.permute.xlu1 %1989 }
 0x7f6   : > { %2009 = vrot.lane.b32.xlu0 %v1998_v41, %s9045_s29  ;;  %v2000_v18 = vsel %vm9049_vm1, %v1990_v49, %v7637_v16 }
 0x7f9   : > { %v1992_v44 = vpop.permute.xlu1 %1991 }
 0x7fa   : > { %2013 = vrot.lane.b32.xlu0 %v2000_v18, %s9045_s29 }
 0x7fe   : > { %1993 = vrot.lane.b32.xlu0 %v7642_v27, %s8934_s20  ;;  %s8938_s20 = smov 32  }
 0x84c   : > { %v2028_v39 = vpop.permute.xlu0 %2027 }
 0x84d   : > { %v2043_v7 = vsel %vm9050_vm12, %v2028_v39, %v2019_v47  ;;  %vm9058_vm12 = vnez %v8975_v24 }
 0x84e   : > { %2051 = vrot.lane.b32.xlu1 %v2043_v7, %s9051_s25 }
 0x850   : > { %v2138_v51 = vpop.permute.xlu0 %2137 }
 0x851   : > { %5612 = vmatmul.mubr.msk.f32.gmra.mrb[18].mxu0 %vm9052_vm11, %v2138_v51  ;;  %vm9059_vm11 = vnez %v8977_v32 }
 0x852   : > { %5614 = vmatprep.mubr.msk.f32.mxu0 %vm9053_vm14, %v2140_v45  ;;  %v2001_v45 = vsel %vm9059_vm11, %v1992_v44, %v7644_v54  ;;  %vm9060_vm14 = vnez %v8979_v55 }
 0x854   : > { %v2142_v42 = vpop.permute.xlu0 %2141 }
 0x855   : > { %5615 = vmatmul.mubr.msk.f32.gmra.mrb[20].mxu0 %vm9054_vm13, %v2142_v42  ;;  %vm9061_vm13 = vnez %v8981_v60 }
 0x856   : > { %5617 = vmatprep.mubr.msk.f32.mxu0 %vm9055_vm10, %v2144_v50  ;;  %vm9062_vm10 = vnez %v8985_v20 }
 0x858   : > { %v2146_v16 = vpop.permute.xlu0 %2145 }
 0x859   : > { %5618 = vmatmul.mubr.msk.f32.gmra.mrb[22].mxu0 %vm9056_vm15, %v2146_v16  ;;  %vm9063_vm15 = vnez %v8989_v48 }
 0x85c   : > { %v2008_v1 = vpop.permute.xlu0 %2007 }
 0x85d   : > { %v2021_v38 = vsel %vm9057_vm0, %v2008_v1, %v1997_v52 }
 0x85e   : > { %2031 = vrot.lane.b32.xlu1 %v2021_v38, %s9047_s15 }
 0x860   : > { %v2012_v47 = vpop.permute.xlu0 %2011 }
 0x861   : > { %v2023_v0 = vsel %vm9058_vm12, %v2012_v47, %v1999_v33 }
 0x862   : > { %2035 = vrot.lane.b32.xlu1 %v2023_v0, %s9047_s15 }
 0x864   : > { %v2030_v50 = vpop.permute.xlu0 %2029 }
 0x865   : > { %v2044_v21 = vsel %vm9060_vm14, %v2030_v50, %v2020_v40  ;;  %vm9064_vm14 = vnez %v8983_v4 }
 0x866   : > { %2015 = vrot.lane.b32.xlu1 %v2001_v45, %s9045_s29 }
 0x868   : > { %v2010_v49 = vpop.permute.xlu0 %2009 }
 0x869   : > { %v2022_v51 = vsel %vm9061_vm13, %v2010_v49, %v1998_v41  ;;  %vm9065_vm13 = vnez %v8987_v15 }
 0x86a   : > { %2077 = vrot.lane.b32.xlu1 %v2044_v21, %s9044_s23 }
 0x86c   : > { %v2014_v33 = vpop.permute.xlu0 %2013 }
 0x86d   : > { %v2024_v54 = vsel %vm9062_vm10, %v2014_v33, %v2000_v18  ;;  %vm9066_vm10 = vnez %v8991_v37 }
 0x870   : > { %v1994_v42 = vpop.permute.xlu0 %1993 }
 0x871   : > { %v2002_v40 = vsel %vm9063_vm15, %v1994_v42, %v7642_v27 }
 0x8bc   : > { %v5610_v52 = vpop.f32.mrb[16].mxu0 }
 0x8bd   : > { %v2261_v39 = vpop.f32.mrb[17].mxu0 }
 0x8c0   : > { %v2052_v7 = vpop.permute.xlu1 %2051 }
 0x8c1   : > { %2075 = vrot.lane.b32.xlu0 %v2052_v7, %s9044_s23 }
 0x8c5   : > { %2033 = vrot.lane.b32.xlu0 %v2022_v51, %s9047_s15 }
 0x8c9   : > { %2037 = vrot.lane.b32.xlu0 %v2024_v54, %s9047_s15 }
 0x8cd   : > { %2017 = vrot.lane.b32.xlu0 %v2002_v40, %s9045_s29 }
 0x8d0   : > { %v2032_v16 = vpop.permute.xlu1 %2031 }
 0x8d1   : > { %v2045_v1 = vsel %vm9064_vm14, %v2032_v16, %v2021_v38  ;;  %vm9070_vm14 = vnez %v8997_v6 }
 0x8d2   : > { %2055 = vrot.lane.b32.xlu1 %v2045_v1, %s9051_s25 }
 0x8d4   : > { %v2036_v41 = vpop.permute.xlu1 %2035 }
 0x8d5   : > { %v2047_v47 = vsel %vm9065_vm13, %v2036_v41, %v2023_v0  ;;  %vm9068_vm13 = vnez %v8993_v62 }
 0x8d6   : > { %2059 = vrot.lane.b32.xlu1 %v2047_v47, %s9051_s25 }
 0x8d8   : > { %v2016_v18 = vpop.permute.xlu1 %2015 }
 0x8d9   : > { %v2025_v44 = vsel %vm9066_vm10, %v2016_v18, %v2001_v45  ;;  %vm9069_vm10 = vnez %v8995_v31 }
 0x8da   : > { %2039 = vrot.lane.b32.xlu1 %v2025_v44, %s9047_s15 }
 0x8dc   : > { %v2078_v27 = vpop.permute.xlu1 %2077 }
 0x8de   : > { %2101 = vrot.lane.b32.xlu1 %v2078_v27, %s9067_s24 }
 0x924   : > { %v5613_v50 = vpop.f32.mrb[18].mxu0 }
 0x925   : > { %v2271_v21 = vpop.f32.mrb[19].mxu0 }
 0x928   : > { %v5616_v38 = vpop.f32.mrb[20].mxu0 }
 0x929   : > { %v2281_v49 = vpop.f32.mrb[21].mxu0 }
 0x92c   : > { %v5619_v7 = vpop.f32.mrb[22].mxu0 }
 0x92d   : > { %v2291_v33 = vpop.f32.mrb[23].mxu0 }
 0x933   : > { %v2076_v42 = vpop.permute.xlu0 %2075 }
 0x934   : > { %2099 = vrot.lane.b32.xlu0 %v2076_v42, %s9067_s24 }
 0x937   : > { %v2034_v0 = vpop.permute.xlu0 %2033 }
 0x938   : > { %v2046_v16 = vsel %vm9068_vm13, %v2034_v0, %v2022_v51  ;;  %vm9071_vm13 = vnez %v8999_v58 }
 0x939   : > { %2105 = vrot.lane.b32.xlu1 %v2046_v16, %s9067_s24 }
 0x93b   : > { %v2038_v45 = vpop.permute.xlu0 %2037 }
 0x93c   : > { %v2048_v1 = vsel %vm9069_vm10, %v2038_v45, %v2024_v54  ;;  %vm9072_vm10 = vcmask 523264  }
 0x93d   : > { %2085 = vrot.lane.b32.xlu1 %v2048_v1, %s9044_s23  ;;  %vm9073_vm15 = vmmov %vm9072_vm10 }
 0x93e   : > { %vm9078_vm11 = vmmov %vm9072_vm10 }
 0x93f   : > { %v2018_v18 = vpop.permute.xlu0 %2017  ;;  %vm9095_vm12 = vmmov %vm9072_vm10 }
 0x940   : > { %v2026_v27 = vsel %vm9070_vm14, %v2018_v18, %v2002_v40  ;;  %vm9075_vm14 = vmmov %vm9072_vm10 }
 0x941   : > { %vm9096_vm0 = vmmov %vm9072_vm10 }
 0x944   : > { %v2056_v41 = vpop.permute.xlu1 %2055 }
 0x945   : > { %2103 = vrot.lane.b32.xlu0 %v2056_v41, %s9067_s24 }
 0x948   : > { %v2060_v47 = vpop.permute.xlu1 %2059 }
 0x949   : > { %2083 = vrot.lane.b32.xlu0 %v2060_v47, %s9044_s23 }
 0x94c   : > { %v2040_v42 = vpop.permute.xlu1 %2039 }
 0x94d   : > { %v2049_v51 = vsel %vm9071_vm13, %v2040_v42, %v2025_v44  ;;  %2041 = vrot.lane.b32.xlu0 %v2026_v27, %s9047_s15  ;;  %vm9074_vm13 = vmmov %vm9072_vm10 }
 0x94e   : > { %2063 = vrot.lane.b32.xlu1 %v2049_v51, %s9051_s25 }
 0x950   : > { %v2102_v54 = vpop.permute.xlu1 %2101 }
 0x951   : > { %v2267_v0 = vadd.f32 %v5610_v52, %v2102_v54 }
 0x953   : > { %v2303_v16 = vsel %vm9072_vm10, %v2267_v0, -inf }
 0x972   : > { %2304 = vmax.xlane.f32.xlu1 %v2303_v16 }
 0x9a6   : > { %v2100_v45 = vpop.permute.xlu0 %2099 }
 0x9a7   : > { %v2262_v1 = vadd.f32 %v2261_v39, %v2100_v45 }
 0x9a9   : > { %v2300_v41 = vsel %vm9073_vm15, %v2262_v1, -inf  ;;  %vm9076_vm15 = vnez %v9004_v30 }
 0x9aa   : > { %2301 = vmax.xlane.f32.xlu0 %v2300_v41 }
 0x9ab   : > { %v2106_v47 = vpop.permute.xlu1 %2105 }
 0x9ac   : > { %v2277_v26 = vadd.f32 %v5613_v50, %v2106_v47 }
 0x9ae   : > { %v2309_v39 = vsel %vm9075_vm14, %v2277_v26, -inf  ;;  %vm9080_vm14 = vmmov %vm9072_vm10 }
 0x9af   : > { %v2086_v42 = vpop.permute.xlu1 %2085 }
 0x9b0   : > { %v7788_v54 = vadd.f32 %v5616_v38, %v2086_v42 }
 0x9b7   : > { %v2104_v40 = vpop.permute.xlu0 %2103 }
 0x9b8   : > { %v7784_v18 = vadd.f32 %v2271_v21, %v2104_v40 }
 0x9ba   : > { %v2306_v44 = vsel %vm9074_vm13, %v7784_v18, -inf  ;;  %vm9077_vm13 = vmmov %vm9072_vm10 }
 0x9bb   : > { %2307 = vmax.xlane.f32.xlu0 %v2306_v44  ;;  %v2084_v51 = vpop.permute.xlu0 %2083  ;;  %v2315_v40 = vsel %vm9077_vm13, %v7788_v54, -inf  ;;  %vm9081_vm13 = vmmov %vm9072_vm10 }
 0x9bc   : > { %v2282_v52 = vadd.f32 %v2281_v49, %v2084_v51  ;;  %v4967_v51 = vld [vmem:[%s8953_s5 + $0x2] ss:$0 sm:$0xff] }
 0x9be   : > { %v2312_v16 = vsel %vm9072_vm10, %v2282_v52, -inf }
 0x9bf   : > { %v2042_v45 = vpop.permute.xlu0 %2041  ;;  %2313 = vmax.xlane.f32.xlu1 %v2312_v16  ;;  %2310 = vmax.xlane.f32.xlu0 %v2309_v39 }
 0x9c0   : > { %v2050_v21 = vsel %vm9076_vm15, %v2042_v45, %v2026_v27  ;;  %v2064_v50 = vpop.permute.xlu1 %2063  ;;  %vm9094_vm15 = vmmov %vm9072_vm10 }
 0x9c1   : > { %v2292_v41 = vadd.f32 %v2291_v33, %v2064_v50  ;;  %v7794_v47 = vadd.f32 %v5619_v7, %v2050_v21 }
 0x9c3   : > { %2316 = vmax.xlane.f32.xlu0 %v2315_v40  ;;  %v2318_v38 = vsel %vm9078_vm11, %v2292_v41, -inf  ;;  %v2321_v49 = vsel %vm9072_vm10, %v7794_v47, -inf  ;;  %vm9079_vm11 = vmmov %vm9072_vm10 }
 0x9c4   : > { %2319 = vmax.xlane.f32.xlu1 %v2318_v38 }
 0x9c7   : > { %2322 = vmax.xlane.f32.xlu0 %v2321_v49 }
 0x9d5   : > { %6398 = vrot.lane.b32.xlu1 %v7240_v8, %s8936_s16 }
 0x9d9   : > { %6408 = vrot.lane.b32.xlu1 %v7248_v13, %s8936_s16 }
 0x9dd   : > { %6403 = vrot.lane.b32.xlu0 %v7244_v34, %s8936_s16 }
 0x9ff   : > { %v2305_v7 = vpop.xlane.xlu1 %2304 }
 0xa00   : > { %v2325_v33 = vsub.f32 %v2267_v0, %v2305_v7 }
 0xa02   : > { %v2334_v27 = vmul.f32 1.442695, %v2325_v33 }
 0xa04   : > { %6529 = vpow2.f32 %v2334_v27 }
 0xa0e   : > { %v7807_v44 = vpop.eup %6529 }
 0xa0f   : > { %v2351_v42 = vsel %vm9079_vm11, %v7807_v44, 0.0  ;;  %vm9082_vm11 = vmmov %vm9072_vm10 }
 0xa10   : > { %2352 = vadd.xlane.f32.xlu0 %v2351_v42 }
 0xa26   : > { %2616 = vrot.lane.b32.xlu0 %v4967_v51, %s8938_s20 }
 0xa37   : > { %v2302_v16 = vpop.xlane.xlu0 %2301 }
 0xa38   : > { %v2324_v39 = vsub.f32 %v2262_v1, %v2302_v16 }
 0xa3a   : > { %v2332_v45 = vmul.f32 1.442695, %v2324_v39 }
 0xa3c   : > { %6531 = vpow2.f32 %v2332_v45 }
 0xa46   : > { %v7815_v0 = vpop.eup %6531 }
 0xa47   : > { %v2348_v21 = vsel %vm9080_vm14, %v7815_v0, 0.0  ;;  %vm9083_vm14 = vmmov %vm9072_vm10 }
 0xa48   : > { %v2308_v50 = vpop.xlane.xlu0 %2307  ;;  %2349 = vadd.xlane.f32.xlu1 %v2348_v21 }
 0xa4c   : > { %v2311_v40 = vpop.xlane.xlu0 %2310  ;;  %v2314_v38 = vpop.xlane.xlu1 %2313 }
 0xa4d   : > { %v2327_v49 = vsub.f32 %v2277_v26, %v2311_v40  ;;  %v2328_v7 = vsub.f32 %v2282_v52, %v2314_v38 }
 0xa4f   : > { %v2338_v33 = vmul.f32 1.442695, %v2327_v49  ;;  %v2340_v27 = vmul.f32 1.442695, %v2328_v7 }
 0xa50   : > { %v2317_v42 = vpop.xlane.xlu0 %2316 }
 0xa51   : > { %6533 = vpow2.f32 %v2338_v33  ;;  %v2320_v51 = vpop.xlane.xlu1 %2319 }
 0xa52   : > { %v2330_v46 = vsub.f32 %v2292_v41, %v2320_v51  ;;  %6535 = vpow2.f32 %v2340_v27  ;;  %v2329_v27 = vsub.f32 %v7788_v54, %v2317_v42 }
 0xa54   : > { %v2344_v1 = vmul.f32 1.442695, %v2330_v46  ;;  %v2323_v16 = vpop.xlane.xlu0 %2322  ;;  %v2342_v51 = vmul.f32 1.442695, %v2329_v27 }
 0xa55   : > { %v6399_v39 = vpop.permute.xlu1 %6398 }
 0xa56   : > { %v6401_v45 = vunpack.i.h.bf16 %v6399_v39  ;;  %v6400_v43 = vunpack.i.l.bf16 %v6399_v39  ;;  %6537 = vpow2.f32 %v2344_v1  ;;  %v2331_v1 = vsub.f32 %v7794_v47, %v2323_v16 }
 0xa58   : > { %v6404_v56 = vpop.permute.xlu0 %6403  ;;  %v6068_v14 = vpack.c.bf16 %v6401_v45, %v6400_v43  ;;  %v2346_v39 = vmul.f32 1.442695, %v2331_v1 }
 0xa59   : > { %v6406_v21 = vunpack.i.h.bf16 %v6404_v56  ;;  %v6405_v25 = vunpack.i.l.bf16 %v6404_v56  ;;  %6413 = vrot.lane.b32.xlu1 %v7252_v36, %s8936_s16  ;;  %v6409_v26 = vpop.permute.xlu1 %6408  ;;  %s9147_s16 = smov 48  }
 0xa5a   : > { %v6411_v52 = vunpack.i.h.bf16 %v6409_v26  ;;  %v6410_v40 = vunpack.i.l.bf16 %v6409_v26  ;;  %6069 = vmatprep.subr.bf16.mxu0 %v6068_v14 }
 0xa5b   : > { %v7821_v38 = vpop.eup %6533  ;;  %6071 = vmatpush3.bf16.msra.mxu0 %v6068_v14  ;;  %v6072_v46 = vpack.c.bf16 %v6406_v21, %v6405_v25  ;;  %v2326_v25 = vsub.f32 %v7784_v18, %v2308_v50 }
 0xa5c   : > { %v2357_v41 = vsel %vm9081_vm13, %v7821_v38, 0.0  ;;  %v7825_v49 = vpop.eup %6535  ;;  %v6076_v43 = vpack.c.bf16 %v6411_v52, %v6410_v40  ;;  %vm9084_vm13 = vmmov %vm9072_vm10 }
 0xa5d   : > { %2358 = vadd.xlane.f32.xlu0 %v2357_v41  ;;  %6073 = vmatprep.subr.bf16.mxu0 %v6072_v46  ;;  %v2360_v56 = vsel %vm9072_vm10, %v7825_v49, 0.0  ;;  %v2336_v33 = vmul.f32 1.442695, %v2326_v25 }
 0xa5f   : > { %6075 = vmatpush3.bf16.msra.mxu0 %v6072_v46  ;;  %6539 = vpow2.f32 %v2336_v33 }
 0xa60   : > { %6077 = vmatprep.subr.bf16.mxu0 %v6076_v43  ;;  %v7829_v7 = vpop.eup %6537  ;;  %6541 = vpow2.f32 %v2342_v51 }
 0xa61   : > { %2361 = vadd.xlane.f32.xlu0 %v2360_v56  ;;  %v2366_v14 = vsel %vm9082_vm11, %v7829_v7, 0.0  ;;  %6543 = vpow2.f32 %v2346_v39  ;;  %vm9085_vm11 = vmmov %vm9072_vm10  ;;  %v4965_v39 = vld [vmem:[%s8880_s4 + $0x2] ss:$0 sm:$0xff] }
 0xa63   : > { %6079 = vmatpush3.bf16.msra.mxu0 %v6076_v43 }
 0xa65   : > { %2367 = vadd.xlane.f32.xlu0 %v2366_v14 }
 0xa69   : > { %v7836_v45 = vpop.eup %6539 }
 0xa6a   : > { %v2354_v21 = vsel %vm9083_vm14, %v7836_v45, 0.0  ;;  %v7840_v26 = vpop.eup %6541  ;;  %vm9086_vm14 = vmmov %vm9072_vm10 }
 0xa6b   : > { %v2363_v18 = vsel %vm9084_vm13, %v7840_v26, 0.0  ;;  %v7844_v50 = vpop.eup %6543  ;;  %vm9087_vm13 = vmmov %vm9072_vm10 }
 0xa6c   : > { %v2369_v54 = vsel %vm9072_vm10, %v7844_v50, 0.0 }
 0xa7d   : > { %2355 = vadd.xlane.f32.xlu1 %v2354_v21 }
 0xa81   : > { %2364 = vadd.xlane.f32.xlu1 %v2363_v18 }
 0xa85   : > { %2370 = vadd.xlane.f32.xlu1 %v2369_v54  ;;  %v4949_v54 = vld [vmem:[%s8879_s3 + $0x108] sm:$0xff] }
 0xa9d   : > { %v2353_v47 = vpop.xlane.xlu0 %2352 }
 0xa9e   : > { %6545 = vrcp.f32 %v2353_v47 }
 0xaa1   : > { %v2617_v42 = vpop.permute.xlu0 %2616 }
 0xaa2   : > { %v2620_v16 = vadd.f32 %v7028_v59, %v2617_v42  ;;  %v2619_v52 = vadd.f32 %v2617_v42, %v7032_v61  ;;  %v2621_v40 = vadd.f32 %v2617_v42, %v7050_v5  ;;  %v2622_v46 = vadd.f32 %v7043_v3, %v2617_v42 }
 0xaa3   : > { %v2623_v56 = vadd.f32 %v2617_v42, %v7067_v12  ;;  %v2624_v14 = vadd.f32 %v7060_v10, %v2617_v42  ;;  %v2625_v27 = vadd.f32 %v2617_v42, %v7082_v19  ;;  %v2626_v51 = vadd.f32 %v7077_v17, %v2617_v42 }
 0xaa4   : > { %2637 = vrot.lane.b32.xlu1 %v2620_v16, %s9067_s24  ;;  %2635 = vrot.lane.b32.xlu0 %v2619_v52, %s9067_s24 }
 0xaa8   : > { %v6546_v41 = vpop.eup %6545  ;;  %2639 = vrot.lane.b32.xlu1 %v2621_v40, %s9067_s24  ;;  %2641 = vrot.lane.b32.xlu0 %v2622_v46, %s9067_s24 }
 0xaa9   : > { %v2381_v43 = vmul.f32 %v6546_v41, %v2353_v47 }
 0xaab   : > { %v2389_v25 = vsub.f32 2.0, %v2381_v43 }
 0xaac   : > { %2643 = vrot.lane.b32.xlu1 %v2623_v56, %s9067_s24  ;;  %2645 = vrot.lane.b32.xlu0 %v2624_v14, %s9067_s24  ;;  %v4950_v56 = vld [vmem:[%s8879_s3 + $0x110] sm:$0xff]  ;;  %v4951_v14 = vld [vmem:[%s8879_s3 + $0x118] sm:$0xff] }
 0xaad   : > { %v2397_v33 = vmul.f32 %v6546_v41, %v2389_v25 }
 0xaaf   : > { %v2405_v1 = vmul.f32 %v7807_v44, %v2397_v33  ;;  %v4948_v44 = vld [vmem:[%s8879_s3 + $0x100] sm:$0xff]  ;;  %v6090_v33 = vpack.c.bf16 %v4951_v14, %v4950_v56 }
 0xab0   : > { %2647 = vrot.lane.b32.xlu1 %v2625_v27, %s9067_s24  ;;  %2649 = vrot.lane.b32.xlu0 %v2626_v51, %s9067_s24  ;;  %v6084_v52 = vpack.c.bf16 %v4949_v54, %v4948_v44  ;;  %v4952_v51 = vld [vmem:[%s8879_s3 + $0x120] sm:$0xff]  ;;  %v4954_v44 = vld [vmem:[%s8879_s3 + $0x130] sm:$0xff] }
 0xab1   : > { %4933 = vst.msk [vmem:[%s7487_s26 + $0x48] sm:$0xff] %vm9085_vm11, %v2405_v1  ;;  %v4955_v54 = vld [vmem:[%s8879_s3 + $0x138] sm:$0xff]  ;;  %v4956_v14 = vld [vmem:[%s8879_s3 + $0x140] sm:$0xff]  ;;  %vm9088_vm11 = vmmov %vm9072_vm10 }
 0xab4   : > { %2598 = vrot.lane.b32.xlu0 %v4965_v39, %s8938_s20 }
 0xab8   : > { %6423 = vrot.lane.b32.xlu0 %v7244_v34, %s9067_s24 }
 0xad5   : > { %v2350_v21 = vpop.xlane.xlu1 %2349 }
 0xad6   : > { %6547 = vrcp.f32 %v2350_v21 }
 0xad9   : > { %v6414_v18 = vpop.permute.xlu1 %6413 }
 0xada   : > { %v6416_v47 = vunpack.i.h.bf16 %v6414_v18  ;;  %v6415_v42 = vunpack.i.l.bf16 %v6414_v18 }
 0xadc   : > { %v6080_v16 = vpack.c.bf16 %v6416_v47, %v6415_v42 }
 0xade   : > { %6081 = vmatprep.subr.bf16.mxu0 %v6080_v16 }
 0xadf   : > { %6083 = vmatpush3.bf16.msra.mxu0 %v6080_v16  ;;  %v6102_v16 = vpack.c.bf16 %v4955_v54, %v4954_v44  ;;  %v4961_v54 = vld [vmem:[%s8879_s3 + $0x168] sm:$0xff] }
 0xae0   : > { %v6548_v40 = vpop.eup %6547  ;;  %6086 = vmatprep.subr.msk.bf16.mxu0 %vm6923_vm2, %v6084_v52 }
 0xae1   : > { %v2380_v46 = vmul.f32 %v6548_v40, %v2350_v21 }
 0xae3   : > { %v2388_v41 = vsub.f32 2.0, %v2380_v46 }
 0xae5   : > { %v2396_v43 = vmul.f32 %v6548_v40, %v2388_v41 }
 0xae7   : > { %v2404_v25 = vmul.f32 %v7815_v0, %v2396_v43  ;;  %v4953_v0 = vld [vmem:[%s8879_s3 + $0x128] sm:$0xff] }
 0xae8   : > { %v6096_v21 = vpack.c.bf16 %v4953_v0, %v4952_v51 }
 0xae9   : > { %4932 = vst.msk [vmem:[%s7487_s26 + $0x40] sm:$0xff] %vm9086_vm14, %v2404_v25  ;;  %5636 = vmatprep.mubr.msk.f32.mxu0 %vm9087_vm13, %v2404_v25  ;;  %v4957_v25 = vld [vmem:[%s8879_s3 + $0x148] sm:$0xff]  ;;  %vm9089_vm14 = vmmov %vm9072_vm10 }
 0xaea   : > { %v2359_v27 = vpop.xlane.xlu0 %2358  ;;  %5637 = vmatmul.mubr.msk.f32.vlgmr.msra.gmra.mrb[24].mxu0 %vm9072_vm10, %v2405_v1  ;;  %v6108_v0 = vpack.c.bf16 %v4957_v25, %v4956_v14  ;;  %vm9090_vm13 = vmmov %vm9072_vm10 }
 0xaeb   : > { %6549 = vrcp.f32 %v2359_v27  ;;  %6089 = vmatpush3.bf16.xpose.msk.msra.mxu0 %vm6923_vm2, %v6084_v52 }
 0xaec   : > { %6092 = vmatprep.subr.msk.bf16.mxu0 %vm6923_vm2, %v6090_v33 }
 0xaee   : > { %v2362_v39 = vpop.xlane.xlu0 %2361 }
 0xaef   : > { %6551 = vrcp.f32 %v2362_v39 }
 0xaf2   : > { %v2368_v18 = vpop.xlane.xlu0 %2367 }
 0xaf3   : > { %6553 = vrcp.f32 %v2368_v18  ;;  %6095 = vmatpush3.bf16.xpose.msk.msra.mxu0 %vm6923_vm2, %v6090_v33 }
 0xaf4   : > { %6098 = vmatprep.subr.msk.bf16.mxu0 %vm6923_vm2, %v6096_v21 }
 0xaf5   : > { %v6550_v1 = vpop.eup %6549 }
 0xaf6   : > { %v2383_v47 = vmul.f32 %v6550_v1, %v2359_v27 }
 0xaf8   : > { %v2391_v42 = vsub.f32 2.0, %v2383_v47 }
 0xaf9   : > { %v6552_v52 = vpop.eup %6551 }
 0xafa   : > { %v2399_v40 = vmul.f32 %v6550_v1, %v2391_v42  ;;  %v2384_v46 = vmul.f32 %v6552_v52, %v2362_v39  ;;  %v4959_v1 = vld [vmem:[%s8879_s3 + $0x158] sm:$0xff] }
 0xafb   : > { %6101 = vmatpush3.bf16.xpose.msk.msra.mxu0 %vm6923_vm2, %v6096_v21 }
 0xafc   : > { %v2392_v41 = vsub.f32 2.0, %v2384_v46  ;;  %6104 = vmatprep.subr.msk.bf16.mxu0 %vm6923_vm2, %v6102_v16  ;;  %v2407_v43 = vmul.f32 %v7821_v38, %v2399_v40  ;;  %v4962_v40 = vld [vmem:[%s8879_s3 + $0x170] sm:$0xff]  ;;  %v4963_v46 = vld [vmem:[%s8879_s3 + $0x178] sm:$0xff] }
 0xafd   : > { %v6554_v56 = vpop.eup %6553  ;;  %v6126_v14 = vpack.c.bf16 %v4963_v46, %v4962_v40 }
 0xafe   : > { %v2400_v33 = vmul.f32 %v6552_v52, %v2392_v41  ;;  %v2386_v27 = vmul.f32 %v6554_v56, %v2368_v18  ;;  %4935 = vst.msk [vmem:[%s7487_s26 + $0x58] sm:$0xff] %vm9088_vm11, %v2407_v43  ;;  %v4958_v18 = vld [vmem:[%s8879_s3 + $0x150] sm:$0xff]  ;;  %vm9091_vm11 = vmmov %vm9072_vm10 }
 0xb00   : > { %v2394_v51 = vsub.f32 2.0, %v2386_v27  ;;  %v2408_v39 = vmul.f32 %v7825_v49, %v2400_v33  ;;  %v6114_v49 = vpack.c.bf16 %v4959_v1, %v4958_v18 }
 0xb02   : > { %v2402_v21 = vmul.f32 %v6554_v56, %v2394_v51  ;;  %4936 = vst.msk [vmem:[%s7487_s26 + $0x60] sm:$0xff] %vm9089_vm14, %v2408_v39  ;;  %vm9092_vm14 = vmmov %vm9072_vm10 }
 0xb03   : > { %6107 = vmatpush3.bf16.xpose.msk.msra.mxu0 %vm6923_vm2, %v6102_v16 }
 0xb04   : > { %6110 = vmatprep.subr.msk.bf16.mxu0 %vm6923_vm2, %v6108_v0  ;;  %v2410_v38 = vmul.f32 %v7829_v7, %v2402_v21  ;;  %v4960_v7 = vld [vmem:[%s8879_s3 + $0x160] sm:$0xff] }
 0xb05   : > { %v6120_v42 = vpack.c.bf16 %v4961_v54, %v4960_v7 }
 0xb06   : > { %4938 = vst.msk [vmem:[%s7487_s26 + $0x70] sm:$0xff] %vm9090_vm13, %v2410_v38  ;;  %vm9093_vm13 = vmmov %vm9072_vm10 }
 0xb0a   : > { %v2356_v44 = vpop.xlane.xlu1 %2355 }
 0xb0b   : > { %6555 = vrcp.f32 %v2356_v44  ;;  %6113 = vmatpush3.bf16.xpose.msk.msra.mxu0 %vm6923_vm2, %v6108_v0 }
 0xb0c   : > { %6116 = vmatprep.subr.msk.bf16.mxu0 %vm6923_vm2, %v6114_v49 }
 0xb0e   : > { %v2365_v47 = vpop.xlane.xlu1 %2364 }
 0xb0f   : > { %6557 = vrcp.f32 %v2365_v47 }
 0xb12   : > { %v2371_v16 = vpop.xlane.xlu1 %2370 }
 0xb13   : > { %6559 = vrcp.f32 %v2371_v16  ;;  %6119 = vmatpush3.bf16.xpose.msk.msra.mxu0 %vm6923_vm2, %v6114_v49 }
 0xb14   : > { %6122 = vmatprep.subr.msk.bf16.mxu0 %vm6923_vm2, %v6120_v42 }
 0xb15   : > { %v6556_v52 = vpop.eup %6555 }
 0xb16   : > { %v2382_v41 = vmul.f32 %v6556_v52, %v2356_v44  ;;  %v2638_v7 = vpop.permute.xlu1 %2637  ;;  %v2636_v54 = vpop.permute.xlu0 %2635 }
 0xb18   : > { %v2390_v56 = vsub.f32 2.0, %v2382_v41 }
 0xb19   : > { %v6558_v25 = vpop.eup %6557 }
 0xb1a   : > { %v2398_v33 = vmul.f32 %v6556_v52, %v2390_v56  ;;  %v2385_v27 = vmul.f32 %v6558_v25, %v2365_v47 }
 0xb1b   : > { %6125 = vmatpush3.bf16.xpose.msk.msra.mxu0 %vm6923_vm2, %v6120_v42 }
 0xb1c   : > { %v2393_v51 = vsub.f32 2.0, %v2385_v27  ;;  %v2406_v0 = vmul.f32 %v7836_v45, %v2398_v33  ;;  %6128 = vmatprep.subr.msk.bf16.mxu0 %vm6923_vm2, %v6126_v14 }
 0xb1d   : > { %v6560_v21 = vpop.eup %6559 }
 0xb1e   : > { %v2401_v18 = vmul.f32 %v6558_v25, %v2393_v51  ;;  %v2387_v1 = vmul.f32 %v6560_v21, %v2371_v16  ;;  %4934 = vst.msk [vmem:[%s7487_s26 + $0x50] sm:$0xff] %vm9072_vm10, %v2406_v0  ;;  %5639 = vmatprep.mubr.msk.f32.mxu0 %vm9091_vm11, %v2406_v0  ;;  %vm9097_vm10 = vmmov %vm9096_vm0 }
 0xb1f   : > { %5640 = vmatmul.mubr.msk.f32.gmra.mrb[26].mxu0 %vm9092_vm14, %v2407_v43  ;;  %v2640_v43 = vpop.permute.xlu1 %2639  ;;  %vm9098_vm11 = vmmov %vm9096_vm0  ;;  %vm9099_vm14 = vcmask 130048  }
 0xb20   : > { %v2395_v49 = vsub.f32 2.0, %v2387_v1  ;;  %5642 = vmatprep.mubr.msk.f32.mxu0 %vm9093_vm13, %v2408_v39  ;;  %v2409_v44 = vmul.f32 %v7840_v26, %v2401_v18  ;;  %v2642_v26 = vpop.permute.xlu0 %2641  ;;  %vm9100_vm13 = vmmov %vm9099_vm14 }
 0xb22   : > { %v2403_v45 = vmul.f32 %v6560_v21, %v2395_v49  ;;  %4937 = vst.msk [vmem:[%s7487_s26 + $0x68] sm:$0xff] %vm9094_vm15, %v2409_v44  ;;  %vm9101_vm15 = vmmov %vm9100_vm13 }
 0xb23   : > { %5643 = vmatmul.mubr.msk.f32.gmra.mrb[28].mxu0 %vm9095_vm12, %v2409_v44  ;;  %v2644_v39 = vpop.permute.xlu1 %2643  ;;  %vm9102_vm12 = vmmov %vm9100_vm13 }
 0xb24   : > { %5645 = vmatprep.mubr.msk.f32.mxu0 %vm9096_vm0, %v2410_v38  ;;  %6131 = vmatpush3.bf16.xpose.msk.msra.mxu0 %vm6923_vm2, %v6126_v14  ;;  %v2411_v47 = vmul.f32 %v7844_v50, %v2403_v45  ;;  %v2646_v38 = vpop.permute.xlu0 %2645  ;;  %vm9103_vm0 = vmmov %vm9102_vm12 }
 0xb25   : > { %vm9104_vm1 = vmmov %vm9103_vm0 }
 0xb26   : > { %4939 = vst.msk [vmem:[%s7487_s26 + $0x78] sm:$0xff] %vm9097_vm10, %v2411_v47  ;;  %vm9105_vm10 = vmmov %vm9103_vm0 }
 0xb27   : > { %5646 = vmatmul.mubr.msk.f32.gmra.mrb[30].mxu0 %vm9098_vm11, %v2411_v47  ;;  %v2648_v42 = vpop.permute.xlu1 %2647  ;;  %vm9106_vm11 = vmmov %vm9103_vm0 }
 0xb28   : > { %5680 = vmatprep.mubr.msk.f32.mxu0 %vm9099_vm14, %v2636_v54  ;;  %v2650_v50 = vpop.permute.xlu0 %2649  ;;  %vm9117_vm14 = vmmov %vm9103_vm0 }
 0xb2b   : > { %5681 = vmatmul.mubr.msk.f32.vlgmr.msra.gmra.mrb[32].mxu0 %vm9100_vm13, %v2638_v7  ;;  %vm9118_vm13 = vmmov %vm9103_vm0 }
 0xb2c   : > { %5683 = vmatprep.mubr.msk.f32.mxu0 %vm9101_vm15, %v2640_v43  ;;  %v2599_v49 = vpop.permute.xlu0 %2598  ;;  %vm9119_vm15 = vnez %v8969_v2 }
 0xb2d   : > { %v2601_v7 = vadd.f32 %v2599_v49, %v7032_v61 }
 0xb2f   : > { %5684 = vmatmul.mubr.msk.f32.gmra.mrb[34].mxu0 %vm9102_vm12, %v2642_v26  ;;  %vm9120_vm12 = vnez %v8971_v23 }
 0xb30   : > { %5686 = vmatprep.mubr.msk.f32.mxu0 %vm9103_vm0, %v2644_v39  ;;  %v6424_v47 = vpop.permute.xlu0 %6423 }
 0xb31   : > { %v6426_v26 = vunpack.i.h.bf16 %v6424_v47  ;;  %v6425_v39 = vunpack.i.l.bf16 %v6424_v47 }
 0xb33   : > { %5687 = vmatmul.mubr.msk.f32.gmra.mrb[36].mxu0 %vm9104_vm1, %v2646_v38  ;;  %vm9116_vm1 = vmmov %vm9103_vm0 }
 0xb34   : > { %5689 = vmatprep.mubr.msk.f32.mxu0 %vm9105_vm10, %v2648_v42  ;;  %vm9121_vm10 = vmmov %vm9103_vm0 }
 0xb37   : > { %5690 = vmatmul.mubr.msk.f32.gmra.mrb[38].mxu0 %vm9106_vm11, %v2650_v50  ;;  %vm9122_vm11 = vmmov %vm9103_vm0 }
 0xbbd   : > { %v7990_v16 = vpop.f32.mrb[24].mxu0 }
 0xbbe   : > { %9107 = vst [vmem:[#allocation17_spill] sm:$0xff] %v7990_v16  ;;  %v7992_v52 = vpop.f32.mrb[25].mxu0 }
 0xbbf   : > { %9108 = vst [vmem:[#allocation18_spill] sm:$0xff] %v7992_v52 }
 0xbf2   : > { %v7994_v40 = vpop.f32.mrb[26].mxu0 }
 0xbf3   : > { %9109 = vst [vmem:[#allocation19_spill] sm:$0xff] %v7994_v40  ;;  %v7996_v46 = vpop.f32.mrb[27].mxu0 }
 0xbf4   : > { %9110 = vst [vmem:[#allocation20_spill] sm:$0xff] %v7996_v46 }
 0xbf6   : > { %v7998_v41 = vpop.f32.mrb[28].mxu0 }
 0xbf7   : > { %9111 = vst [vmem:[#allocation21_spill] sm:$0xff] %v7998_v41  ;;  %v8000_v56 = vpop.f32.mrb[29].mxu0 }
 0xbf8   : > { %9112 = vst [vmem:[#allocation22_spill] sm:$0xff] %v8000_v56 }
 0xbfa   : > { %v8002_v14 = vpop.f32.mrb[30].mxu0 }
 0xbfb   : > { %9113 = vst [vmem:[#allocation23_spill] sm:$0xff] %v8002_v14  ;;  %v8004_v25 = vpop.f32.mrb[31].mxu0  ;;  %v2602_v14 = vadd.f32 %v7028_v59, %v2599_v49 }
 0xbfc   : > { %9114 = vst [vmem:[#allocation24_spill] sm:$0xff] %v8004_v25  ;;  %v6138_v25 = vpack.c.bf16 %v6426_v26, %v6425_v39  ;;  %v2605_v26 = vadd.f32 %v2599_v49, %v7067_v12  ;;  %v2607_v39 = vadd.f32 %v2599_v49, %v7082_v19 }
 0xbfe   : > { %v5682_v33 = vpop.f32.mrb[32].mxu0 }
 0xbff   : > { %v2781_v27 = vpop.f32.mrb[33].mxu0 }
 0xc00   : > { %2820 = vrot.lane.b32.xlu1 %v2781_v27, %s9115_s28 }
 0xc02   : > { %v8007_v51 = vpop.f32.mrb[34].mxu0 }
 0xc03   : > { %v8009_v0 = vpop.f32.mrb[35].mxu0 }
 0xc04   : > { %6418 = vrot.lane.b32.xlu1 %v7240_v8, %s9067_s24 }
 0xc06   : > { %v8013_v21 = vpop.f32.mrb[36].mxu0 }
 0xc07   : > { %v8015_v18 = vpop.f32.mrb[37].mxu0 }
 0xc08   : > { %2822 = vrot.lane.b32.xlu1 %v5682_v33, %s9115_s28 }
 0xc0a   : > { %v8018_v1 = vpop.f32.mrb[38].mxu0 }
 0xc0b   : > { %v8020_v44 = vpop.f32.mrb[39].mxu0 }
 0xc0c   : > { %6428 = vrot.lane.b32.xlu1 %v7248_v13, %s9067_s24 }
 0xc10   : > { %2972 = vrot.lane.b32.xlu1 %v2601_v7, %s9067_s24 }
 0xc14   : > { %2824 = vrot.lane.b32.xlu1 %v8009_v0, %s9115_s28 }
 0xc72   : > { %v2821_v45 = vpop.permute.xlu1 %2820 }
 0xc73   : > { %v2836_v54 = vsel %vm7150_vm3, %v2821_v45, %v2781_v27 }
 0xc74   : > { %2844 = vrot.lane.b32.xlu0 %v2836_v54, %s9045_s29 }
 0xc76   : > { %v6419_v43 = vpop.permute.xlu1 %6418 }
 0xc77   : > { %v6421_v38 = vunpack.i.h.bf16 %v6419_v43  ;;  %v6420_v42 = vunpack.i.l.bf16 %v6419_v43  ;;  %v2603_v43 = vadd.f32 %v2599_v49, %v7050_v5 }
 0xc78   : > { %6433 = vrot.lane.b32.xlu0 %v7252_v36, %s9067_s24 }
 0xc79   : > { %v6132_v50 = vpack.c.bf16 %v6421_v38, %v6420_v42 }
 0xc7a   : > { %v2823_v7 = vpop.permute.xlu1 %2822 }
 0xc7b   : > { %v2837_v41 = vsel %vm7161_vm4, %v2823_v7, %v5682_v33  ;;  %6134 = vmatprep.subr.msk.bf16.mxu1 %vm6923_vm2, %v6132_v50 }
 0xc7c   : > { %2974 = vrot.lane.b32.xlu0 %v2602_v14, %s9067_s24  ;;  %6137 = vmatpush3.bf16.xpose.msk.msra.mxu1 %vm6923_vm2, %v6132_v50  ;;  %v2604_v50 = vadd.f32 %v7043_v3, %v2599_v49 }
 0xc7d   : > { %2846 = vrot.lane.b32.xlu1 %v2837_v41, %s9045_s29  ;;  %6140 = vmatprep.subr.msk.bf16.mxu1 %vm6923_vm2, %v6138_v25 }
 0xc7e   : > { %v6429_v27 = vpop.permute.xlu1 %6428 }
 0xc7f   : > { %v6431_v45 = vunpack.i.h.bf16 %v6429_v27  ;;  %v6430_v47 = vunpack.i.l.bf16 %v6429_v27 }
 0xc80   : > { %2828 = vrot.lane.b32.xlu0 %v8015_v18, %s9115_s28 }
 0xc81   : > { %2976 = vrot.lane.b32.xlu1 %v2603_v43, %s9067_s24  ;;  %v6144_v14 = vpack.c.bf16 %v6431_v45, %v6430_v47  ;;  %v2606_v43 = vadd.f32 %v7060_v10, %v2599_v49 }
 0xc82   : > { %v2973_v33 = vpop.permute.xlu1 %2972 }
 0xc83   : > { %5708 = vmatprep.mubr.msk.f32.mxu1 %vm9116_vm1, %v2973_v33  ;;  %vm9123_vm1 = vmmov %vm9103_vm0 }
 0xc84   : > { %6143 = vmatpush3.bf16.xpose.msk.msra.mxu1 %vm6923_vm2, %v6138_v25 }
 0xc85   : > { %2980 = vrot.lane.b32.xlu1 %v2605_v26, %s9067_s24  ;;  %6146 = vmatprep.subr.msk.bf16.mxu1 %vm6923_vm2, %v6144_v14 }
 0xc86   : > { %v2825_v7 = vpop.permute.xlu1 %2824 }
 0xc89   : > { %2984 = vrot.lane.b32.xlu1 %v2607_v39, %s9067_s24  ;;  %v2838_v39 = vsel %vm7189_vm6, %v2825_v7, %v8009_v0 }
 0xc8c   : > { %6149 = vmatpush3.bf16.xpose.msk.msra.mxu1 %vm6923_vm2, %v6144_v14  ;;  %v2608_v14 = vadd.f32 %v7077_v17, %v2599_v49 }
 0xc8d   : > { %2826 = vrot.lane.b32.xlu1 %v8007_v51, %s9115_s28 }
 0xc91   : > { %2830 = vrot.lane.b32.xlu1 %v8013_v21, %s9115_s28 }
 0xc95   : > { %2832 = vrot.lane.b32.xlu1 %v8020_v44, %s9115_s28 }
 0xce6   : > { %v2845_v25 = vpop.permute.xlu0 %2844 }
 0xce7   : > { %v2860_v38 = vsel %vm7179_vm5, %v2845_v25, %v2836_v54 }
 0xce8   : > { %2868 = vrot.lane.b32.xlu0 %v2860_v38, %s9047_s15 }
 0xcea   : > { %v6434_v42 = vpop.permute.xlu0 %6433 }
 0xceb   : > { %v6436_v27 = vunpack.i.h.bf16 %v6434_v42  ;;  %v6435_v45 = vunpack.i.l.bf16 %v6434_v42 }
 0xcec   : > { %2978 = vrot.lane.b32.xlu0 %v2604_v50, %s9067_s24 }
 0xced   : > { %v6150_v47 = vpack.c.bf16 %v6436_v27, %v6435_v45 }
 0xcee   : > { %v2975_v54 = vpop.permute.xlu0 %2974 }
 0xcef   : > { %v2847_v33 = vpop.permute.xlu1 %2846  ;;  %6152 = vmatprep.subr.msk.bf16.mxu1 %vm6923_vm2, %v6150_v47 }
 0xcf0   : > { %6155 = vmatpush3.bf16.xpose.msk.msra.mxu1 %vm6923_vm2, %v6150_v47  ;;  %2982 = vrot.lane.b32.xlu0 %v2606_v43, %s9067_s24  ;;  %v2861_v27 = vsel %vm7209_vm8, %v2847_v33, %v2837_v41 }
 0xcf2   : > { %v2829_v42 = vpop.permute.xlu0 %2828 }
 0xcf3   : > { %v2977_v26 = vpop.permute.xlu1 %2976  ;;  %v2840_v50 = vsel %vm7198_vm7, %v2829_v42, %v8015_v18 }
 0xcf4   : > { %2986 = vrot.lane.b32.xlu0 %v2608_v14, %s9067_s24 }
 0xcf7   : > { %v2981_v25 = vpop.permute.xlu1 %2980  ;;  %5709 = vmatmul.mubr.msk.f32.vlgmr.msra.gmra.mrb[32].mxu1 %vm9117_vm14, %v2975_v54  ;;  %vm9124_vm14 = vmmov %vm9103_vm0 }
 0xcf8   : > { %5711 = vmatprep.mubr.msk.f32.mxu1 %vm9118_vm13, %v2977_v26  ;;  %2848 = vrot.lane.b32.xlu0 %v2838_v39, %s9045_s29  ;;  %vm9125_vm13 = vnez %v8973_v11 }
 0xcfb   : > { %v2985_v49 = vpop.permute.xlu1 %2984 }
 0xcfc   : > { %2852 = vrot.lane.b32.xlu0 %v2840_v50, %s9045_s29 }
 0xcff   : > { %v2827_v45 = vpop.permute.xlu1 %2826 }
 0xd00   : > { %2870 = vrot.lane.b32.xlu0 %v2861_v27, %s9047_s15  ;;  %v2839_v0 = vsel %vm7219_vm9, %v2827_v45, %v8007_v51 }
 0xd03   : > { %v2831_v7 = vpop.permute.xlu1 %2830 }
 0xd04   : > { %2850 = vrot.lane.b32.xlu0 %v2839_v0, %s9045_s29  ;;  %v2841_v18 = vsel %vm9119_vm15, %v2831_v7, %v8013_v21 }
 0xd07   : > { %v2833_v26 = vpop.permute.xlu1 %2832 }
 0xd08   : > { %2854 = vrot.lane.b32.xlu0 %v2841_v18, %s9045_s29 }
 0xd0c   : > { %2834 = vrot.lane.b32.xlu0 %v8018_v1, %s9115_s28 }
 0xd5a   : > { %v2869_v41 = vpop.permute.xlu0 %2868 }
 0xd5b   : > { %v2884_v47 = vsel %vm9120_vm12, %v2869_v41, %v2860_v38  ;;  %vm9126_vm12 = vnez %v8975_v24 }
 0xd5c   : > { %2892 = vrot.lane.b32.xlu1 %v2884_v47, %s9051_s25 }
 0xd5e   : > { %v2979_v43 = vpop.permute.xlu0 %2978 }
 0xd5f   : > { %5712 = vmatmul.mubr.msk.f32.gmra.mrb[34].mxu1 %vm9103_vm0, %v2979_v43  ;;  %vm9127_vm0 = vnez %v8977_v32 }
 0xd60   : > { %5714 = vmatprep.mubr.msk.f32.mxu1 %vm9121_vm10, %v2981_v25  ;;  %v2842_v25 = vsel %vm9127_vm0, %v2833_v26, %v8020_v44  ;;  %vm9128_vm10 = vnez %v8979_v55 }
 0xd62   : > { %v2983_v51 = vpop.permute.xlu0 %2982 }
 0xd63   : > { %5715 = vmatmul.mubr.msk.f32.gmra.mrb[36].mxu1 %vm9122_vm11, %v2983_v51  ;;  %vm9129_vm11 = vnez %v8981_v60 }
 0xd64   : > { %5717 = vmatprep.mubr.msk.f32.mxu1 %vm9123_vm1, %v2985_v49  ;;  %vm9130_vm1 = vnez %v8985_v20 }
 0xd66   : > { %v2987_v21 = vpop.permute.xlu0 %2986 }
 0xd67   : > { %5718 = vmatmul.mubr.msk.f32.gmra.mrb[38].mxu1 %vm9124_vm14, %v2987_v21  ;;  %vm9131_vm14 = vnez %v8989_v48 }
 0xd6a   : > { %v2849_v33 = vpop.permute.xlu0 %2848 }
 0xd6b   : > { %v2862_v54 = vsel %vm9125_vm13, %v2849_v33, %v2838_v39 }
 0xd6c   : > { %2872 = vrot.lane.b32.xlu1 %v2862_v54, %s9047_s15 }
 0xd6e   : > { %v2853_v38 = vpop.permute.xlu0 %2852 }
 0xd6f   : > { %v2864_v14 = vsel %vm9126_vm12, %v2853_v38, %v2840_v50 }
 0xd70   : > { %2876 = vrot.lane.b32.xlu1 %v2864_v14, %s9047_s15 }
 0xd72   : > { %v2871_v42 = vpop.permute.xlu0 %2870 }
 0xd73   : > { %v2885_v49 = vsel %vm9128_vm10, %v2871_v42, %v2861_v27  ;;  %vm9132_vm10 = vnez %v8983_v4 }
 0xd74   : > { %2856 = vrot.lane.b32.xlu1 %v2842_v25, %s9045_s29 }
 0xd76   : > { %v2851_v45 = vpop.permute.xlu0 %2850 }
 0xd77   : > { %v2863_v47 = vsel %vm9129_vm11, %v2851_v45, %v2839_v0  ;;  %vm9133_vm11 = vnez %v8987_v15 }
 0xd78   : > { %2918 = vrot.lane.b32.xlu1 %v2885_v49, %s9044_s23 }
 0xd7a   : > { %v2855_v50 = vpop.permute.xlu0 %2854 }
 0xd7b   : > { %v2865_v44 = vsel %vm9130_vm1, %v2855_v50, %v2841_v18  ;;  %vm9134_vm1 = vnez %v8991_v37 }
 0xd7e   : > { %v2835_v43 = vpop.permute.xlu0 %2834 }
 0xd7f   : > { %v2843_v27 = vsel %vm9131_vm14, %v2835_v43, %v8018_v1  ;;  %vm9135_vm14 = vnez %v8993_v62 }
 0xdca   : > { %v5710_v39 = vpop.f32.mrb[32].mxu1 }
 0xdcb   : > { %v3102_v7 = vpop.f32.mrb[33].mxu1 }
 0xdce   : > { %v2893_v41 = vpop.permute.xlu1 %2892 }
 0xdcf   : > { %2916 = vrot.lane.b32.xlu0 %v2893_v41, %s9044_s23 }
 0xdd3   : > { %2874 = vrot.lane.b32.xlu0 %v2863_v47, %s9047_s15 }
 0xdd7   : > { %2878 = vrot.lane.b32.xlu0 %v2865_v44, %s9047_s15 }
 0xddb   : > { %2858 = vrot.lane.b32.xlu0 %v2843_v27, %s9045_s29 }
 0xdde   : > { %v2873_v51 = vpop.permute.xlu1 %2872 }
 0xddf   : > { %v2886_v21 = vsel %vm9132_vm10, %v2873_v51, %v2862_v54 }
 0xde0   : > { %2896 = vrot.lane.b32.xlu1 %v2886_v21, %s9051_s25 }
 0xde2   : > { %v2877_v0 = vpop.permute.xlu1 %2876 }
 0xde3   : > { %v2888_v33 = vsel %vm9133_vm11, %v2877_v0, %v2864_v14  ;;  %vm9137_vm11 = vnez %v8997_v6 }
 0xde4   : > { %2900 = vrot.lane.b32.xlu1 %v2888_v33, %s9051_s25 }
 0xde6   : > { %v2857_v18 = vpop.permute.xlu1 %2856 }
 0xde7   : > { %v2866_v38 = vsel %vm9134_vm1, %v2857_v18, %v2842_v25  ;;  %vm9136_vm1 = vnez %v8995_v31 }
 0xde8   : > { %2880 = vrot.lane.b32.xlu1 %v2866_v38, %s9047_s15 }
 0xdea   : > { %v2919_v1 = vpop.permute.xlu1 %2918 }
 0xdec   : > { %2942 = vrot.lane.b32.xlu1 %v2919_v1, %s9067_s24 }
 0xe32   : > { %v5713_v26 = vpop.f32.mrb[34].mxu1 }
 0xe33   : > { %v3112_v42 = vpop.f32.mrb[35].mxu1 }
 0xe36   : > { %v5716_v54 = vpop.f32.mrb[36].mxu1 }
 0xe37   : > { %v3122_v49 = vpop.f32.mrb[37].mxu1 }
 0xe3a   : > { %v5719_v45 = vpop.f32.mrb[38].mxu1 }
 0xe3b   : > { %v3132_v41 = vpop.f32.mrb[39].mxu1 }
 0xe41   : > { %v2917_v50 = vpop.permute.xlu0 %2916 }
 0xe42   : > { %2940 = vrot.lane.b32.xlu0 %v2917_v50, %s9067_s24 }
 0xe45   : > { %v2875_v14 = vpop.permute.xlu0 %2874 }
 0xe46   : > { %v2887_v43 = vsel %vm9135_vm14, %v2875_v14, %v2863_v47  ;;  %vm9138_vm14 = vnez %v8999_v58 }
 0xe47   : > { %2946 = vrot.lane.b32.xlu1 %v2887_v43, %s9067_s24 }
 0xe49   : > { %v2879_v25 = vpop.permute.xlu0 %2878 }
 0xe4a   : > { %v2889_v51 = vsel %vm9136_vm1, %v2879_v25, %v2865_v44  ;;  %vm9139_vm1 = vcmask 523264  }
 0xe4b   : > { %2926 = vrot.lane.b32.xlu1 %v2889_v51, %s9044_s23  ;;  %vm9140_vm10 = vmmov %vm9139_vm1 }
 0xe4c   : > { %vm9145_vm0 = vmmov %vm9139_vm1 }
 0xe4d   : > { %v2859_v33 = vpop.permute.xlu0 %2858  ;;  %vm9163_vm12 = vmmov %vm9145_vm0 }
 0xe4e   : > { %v2867_v18 = vsel %vm9137_vm11, %v2859_v33, %v2843_v27  ;;  %vm9142_vm11 = vmmov %vm9139_vm1 }
 0xe4f   : > { %vm9164_vm13 = vmmov %vm9145_vm0 }
 0xe52   : > { %v2897_v21 = vpop.permute.xlu1 %2896 }
 0xe53   : > { %2944 = vrot.lane.b32.xlu0 %v2897_v21, %s9067_s24 }
 0xe56   : > { %v2901_v0 = vpop.permute.xlu1 %2900 }
 0xe57   : > { %2924 = vrot.lane.b32.xlu0 %v2901_v0, %s9044_s23 }
 0xe5a   : > { %v2881_v1 = vpop.permute.xlu1 %2880 }
 0xe5b   : > { %v2890_v47 = vsel %vm9138_vm14, %v2881_v1, %v2866_v38  ;;  %2882 = vrot.lane.b32.xlu0 %v2867_v18, %s9047_s15  ;;  %vm9141_vm14 = vmmov %vm9139_vm1 }
 0xe5c   : > { %2904 = vrot.lane.b32.xlu1 %v2890_v47, %s9051_s25 }
 0xe5e   : > { %v2943_v44 = vpop.permute.xlu1 %2942 }
 0xe5f   : > { %v3108_v50 = vadd.f32 %v5710_v39, %v2943_v44 }
 0xe61   : > { %v3144_v14 = vsel %vm9139_vm1, %v3108_v50, -inf }
 0xe80   : > { %3145 = vmax.xlane.f32.xlu1 %v3144_v14 }
 0xeb4   : > { %v2941_v43 = vpop.permute.xlu0 %2940 }
 0xeb5   : > { %v3103_v25 = vadd.f32 %v3102_v7, %v2941_v43 }
 0xeb7   : > { %v3141_v51 = vsel %vm9140_vm10, %v3103_v25, -inf  ;;  %vm9143_vm10 = vnez %v9004_v30 }
 0xeb8   : > { %3142 = vmax.xlane.f32.xlu0 %v3141_v51 }
 0xeb9   : > { %v2947_v21 = vpop.permute.xlu1 %2946 }
 0xeba   : > { %v3118_v33 = vadd.f32 %v5713_v26, %v2947_v21 }
 0xebc   : > { %v3150_v7 = vsel %vm9142_vm11, %v3118_v33, -inf  ;;  %vm9148_vm11 = vmmov %vm9145_vm0 }
 0xebd   : > { %v2927_v1 = vpop.permute.xlu1 %2926 }
 0xebe   : > { %v8164_v44 = vadd.f32 %v5716_v54, %v2927_v1 }
 0xec5   : > { %v2945_v27 = vpop.permute.xlu0 %2944 }
 0xec6   : > { %v8160_v0 = vadd.f32 %v3112_v42, %v2945_v27 }
 0xec8   : > { %v3147_v38 = vsel %vm9141_vm14, %v8160_v0, -inf  ;;  %vm9144_vm14 = vmmov %vm9139_vm1 }
 0xec9   : > { %3148 = vmax.xlane.f32.xlu0 %v3147_v38  ;;  %v2925_v47 = vpop.permute.xlu0 %2924  ;;  %v3156_v27 = vsel %vm9144_vm14, %v8164_v44, -inf  ;;  %vm9149_vm14 = vmmov %vm9145_vm0 }
 0xeca   : > { %v3123_v39 = vadd.f32 %v3122_v49, %v2925_v47  ;;  %v5043_v47 = vld [vmem:[%s8953_s5 + $0x3] ss:$0 sm:$0xff]  ;;  %s8762_s5 = scalar_lea.hbm %s8885_s9, %s5119_s0 }
 0xecc   : > { %v3153_v14 = vsel %vm9139_vm1, %v3123_v39, -inf  ;;  %vm9146_vm1 = vmmov %vm9145_vm0 }
 0xecd   : > { %v2883_v43 = vpop.permute.xlu0 %2882  ;;  %3154 = vmax.xlane.f32.xlu1 %v3153_v14  ;;  %3151 = vmax.xlane.f32.xlu0 %v3150_v7 }
 0xece   : > { %v2891_v42 = vsel %vm9143_vm10, %v2883_v43, %v2867_v18  ;;  %v2905_v26 = vpop.permute.xlu1 %2904  ;;  %vm9162_vm10 = vmmov %vm9145_vm0 }
 0xecf   : > { %v3133_v51 = vadd.f32 %v3132_v41, %v2905_v26  ;;  %v8170_v21 = vadd.f32 %v5719_v45, %v2891_v42 }
 0xed1   : > { %3157 = vmax.xlane.f32.xlu0 %v3156_v27  ;;  %v3159_v54 = vsel %vm9145_vm0, %v3133_v51, -inf  ;;  %v3162_v49 = vsel %vm9146_vm1, %v8170_v21, -inf  ;;  %vm9150_vm1 = vmmov %vm9145_vm0 }
 0xed2   : > { %3160 = vmax.xlane.f32.xlu1 %v3159_v54 }
 0xed5   : > { %3163 = vmax.xlane.f32.xlu0 %v3162_v49 }
 0xee3   : > { %6438 = vrot.lane.b32.xlu1 %v7240_v8, %s8938_s20 }
 0xee7   : > { %6448 = vrot.lane.b32.xlu1 %v7248_v13, %s8938_s20 }
 0xeeb   : > { %6443 = vrot.lane.b32.xlu0 %v7244_v34, %s8938_s20 }
 0xf0d   : > { %v3146_v45 = vpop.xlane.xlu1 %3145 }
 0xf0e   : > { %v3166_v41 = vsub.f32 %v3108_v50, %v3146_v45 }
 0xf10   : > { %v3175_v18 = vmul.f32 1.442695, %v3166_v41 }
 0xf12   : > { %6561 = vpow2.f32 %v3175_v18 }
 0xf1c   : > { %v8183_v38 = vpop.eup %6561 }
 0xf1d   : > { %v3192_v1 = vsel %vm9145_vm0, %v8183_v38, 0.0 }
 0xf1e   : > { %3193 = vadd.xlane.f32.xlu0 %v3192_v1 }
 0xf34   : > { %3457 = vrot.lane.b32.xlu0 %v5043_v47, %s9147_s16 }
 0xf45   : > { %v3143_v14 = vpop.xlane.xlu0 %3142 }
 0xf46   : > { %v3165_v7 = vsub.f32 %v3103_v25, %v3143_v14 }
 0xf48   : > { %v3173_v43 = vmul.f32 1.442695, %v3165_v7 }
 0xf4a   : > { %6563 = vpow2.f32 %v3173_v43 }
 0xf54   : > { %v8191_v42 = vpop.eup %6563 }
 0xf55   : > { %v3189_v50 = vsel %vm9148_vm11, %v8191_v42, 0.0  ;;  %vm9151_vm11 = vmmov %vm9145_vm0 }
 0xf56   : > { %v3149_v26 = vpop.xlane.xlu0 %3148  ;;  %3190 = vadd.xlane.f32.xlu1 %v3189_v50 }
 0xf5a   : > { %v3152_v27 = vpop.xlane.xlu0 %3151  ;;  %v3155_v54 = vpop.xlane.xlu1 %3154 }
 0xf5b   : > { %v3168_v49 = vsub.f32 %v3118_v33, %v3152_v27  ;;  %v3169_v45 = vsub.f32 %v3123_v39, %v3155_v54 }
 0xf5d   : > { %v3179_v41 = vmul.f32 1.442695, %v3168_v49  ;;  %v3181_v18 = vmul.f32 1.442695, %v3169_v45 }
 0xf5e   : > { %v3158_v1 = vpop.xlane.xlu0 %3157 }
 0xf5f   : > { %6565 = vpow2.f32 %v3179_v41  ;;  %v3161_v47 = vpop.xlane.xlu1 %3160 }
 0xf60   : > { %v3171_v56 = vsub.f32 %v3133_v51, %v3161_v47  ;;  %6567 = vpow2.f32 %v3181_v18  ;;  %v3170_v18 = vsub.f32 %v8164_v44, %v3158_v1 }
 0xf62   : > { %v3185_v25 = vmul.f32 1.442695, %v3171_v56  ;;  %v3164_v14 = vpop.xlane.xlu0 %3163  ;;  %v3183_v47 = vmul.f32 1.442695, %v3170_v18 }
 0xf63   : > { %v6439_v7 = vpop.permute.xlu1 %6438 }
 0xf64   : > { %v6441_v43 = vunpack.i.h.bf16 %v6439_v7  ;;  %v6440_v40 = vunpack.i.l.bf16 %v6439_v7  ;;  %6569 = vpow2.f32 %v3185_v25  ;;  %v3172_v25 = vsub.f32 %v8170_v21, %v3164_v14 }
 0xf66   : > { %v6444_v46 = vpop.permute.xlu0 %6443  ;;  %v6156_v16 = vpack.c.bf16 %v6441_v43, %v6440_v40  ;;  %v3187_v7 = vmul.f32 1.442695, %v3172_v25 }
 0xf67   : > { %v6446_v50 = vunpack.i.h.bf16 %v6444_v46  ;;  %v6445_v52 = vunpack.i.l.bf16 %v6444_v46  ;;  %6453 = vrot.lane.b32.xlu1 %v7252_v36, %s8938_s20  ;;  %v6449_v33 = vpop.permute.xlu1 %6448 }
 0xf68   : > { %v6451_v39 = vunpack.i.h.bf16 %v6449_v33  ;;  %v6450_v27 = vunpack.i.l.bf16 %v6449_v33  ;;  %6157 = vmatprep.subr.bf16.mxu1 %v6156_v16 }
 0xf69   : > { %v8197_v54 = vpop.eup %6565  ;;  %6159 = vmatpush3.bf16.msra.mxu1 %v6156_v16  ;;  %v6160_v56 = vpack.c.bf16 %v6446_v50, %v6445_v52  ;;  %v3167_v52 = vsub.f32 %v8160_v0, %v3149_v26 }
 0xf6a   : > { %v3198_v51 = vsel %vm9149_vm14, %v8197_v54, 0.0  ;;  %v8201_v49 = vpop.eup %6567  ;;  %v6164_v40 = vpack.c.bf16 %v6451_v39, %v6450_v27  ;;  %vm9152_vm14 = vmmov %vm9145_vm0 }
 0xf6b   : > { %3199 = vadd.xlane.f32.xlu0 %v3198_v51  ;;  %6161 = vmatprep.subr.bf16.mxu1 %v6160_v56  ;;  %v3201_v46 = vsel %vm9150_vm1, %v8201_v49, 0.0  ;;  %v3177_v41 = vmul.f32 1.442695, %v3167_v52  ;;  %vm9153_vm1 = vmmov %vm9145_vm0 }
 0xf6d   : > { %6163 = vmatpush3.bf16.msra.mxu1 %v6160_v56  ;;  %6571 = vpow2.f32 %v3177_v41 }
 0xf6e   : > { %6165 = vmatprep.subr.bf16.mxu1 %v6164_v40  ;;  %v8205_v45 = vpop.eup %6569  ;;  %6573 = vpow2.f32 %v3183_v47 }
 0xf6f   : > { %3202 = vadd.xlane.f32.xlu0 %v3201_v46  ;;  %v3207_v16 = vsel %vm9145_vm0, %v8205_v45, 0.0  ;;  %6575 = vpow2.f32 %v3187_v7  ;;  %v5041_v7 = vld [vmem:[%s8880_s4 + $0x3] ss:$0 sm:$0xff] }
 0xf71   : > { %6167 = vmatpush3.bf16.msra.mxu1 %v6164_v40 }
 0xf73   : > { %3208 = vadd.xlane.f32.xlu0 %v3207_v16 }
 0xf77   : > { %v8212_v43 = vpop.eup %6571 }
 0xf78   : > { %v3195_v50 = vsel %vm9151_vm11, %v8212_v43, 0.0  ;;  %v8216_v33 = vpop.eup %6573  ;;  %vm9154_vm11 = vmmov %vm9145_vm0 }
 0xf79   : > { %v3204_v0 = vsel %vm9152_vm14, %v8216_v33, 0.0  ;;  %v8220_v26 = vpop.eup %6575  ;;  %vm9155_vm14 = vmmov %vm9145_vm0 }
 0xf7a   : > { %v3210_v44 = vsel %vm9153_vm1, %v8220_v26, 0.0  ;;  %vm9156_vm1 = vmmov %vm9145_vm0 }
 0xf8b   : > { %3196 = vadd.xlane.f32.xlu1 %v3195_v50 }
 0xf8f   : > { %3205 = vadd.xlane.f32.xlu1 %v3204_v0 }
 0xf93   : > { %3211 = vadd.xlane.f32.xlu1 %v3210_v44  ;;  %v5025_v44 = vld [vmem:[%s8879_s3 + $0x188] sm:$0xff] }
 0xfab   : > { %v3194_v21 = vpop.xlane.xlu0 %3193 }
 0xfac   : > { %6577 = vrcp.f32 %v3194_v21 }
 0xfaf   : > { %v3458_v1 = vpop.permute.xlu0 %3457 }
 0xfb0   : > { %v3461_v14 = vadd.f32 %v7028_v59, %v3458_v1  ;;  %v3460_v39 = vadd.f32 %v3458_v1, %v7032_v61  ;;  %v3462_v27 = vadd.f32 %v3458_v1, %v7050_v5  ;;  %v3463_v56 = vadd.f32 %v7043_v3, %v3458_v1 }
 0xfb1   : > { %v3464_v46 = vadd.f32 %v3458_v1, %v7067_v12  ;;  %v3465_v16 = vadd.f32 %v7060_v10, %v3458_v1  ;;  %v3466_v18 = vadd.f32 %v3458_v1, %v7082_v19  ;;  %v3467_v47 = vadd.f32 %v7077_v17, %v3458_v1 }
 0xfb2   : > { %3478 = vrot.lane.b32.xlu1 %v3461_v14, %s6747_s1  ;;  %3476 = vrot.lane.b32.xlu0 %v3460_v39, %s6747_s1 }
 0xfb6   : > { %v6578_v51 = vpop.eup %6577  ;;  %3480 = vrot.lane.b32.xlu1 %v3462_v27, %s6747_s1  ;;  %3482 = vrot.lane.b32.xlu0 %v3463_v56, %s6747_s1 }
 0xfb7   : > { %v3222_v40 = vmul.f32 %v6578_v51, %v3194_v21 }
 0xfb9   : > { %v3230_v52 = vsub.f32 2.0, %v3222_v40 }
 0xfba   : > { %3484 = vrot.lane.b32.xlu1 %v3464_v46, %s6747_s1  ;;  %3486 = vrot.lane.b32.xlu0 %v3465_v16, %s6747_s1  ;;  %v5026_v46 = vld [vmem:[%s8879_s3 + $0x190] sm:$0xff]  ;;  %v5027_v16 = vld [vmem:[%s8879_s3 + $0x198] sm:$0xff] }
 0xfbb   : > { %v3238_v41 = vmul.f32 %v6578_v51, %v3230_v52 }
 0xfbd   : > { %v3246_v25 = vmul.f32 %v8183_v38, %v3238_v41  ;;  %v5024_v38 = vld [vmem:[%s8879_s3 + $0x180] sm:$0xff]  ;;  %v6178_v41 = vpack.c.bf16 %v5027_v16, %v5026_v46 }
 0xfbe   : > { %3488 = vrot.lane.b32.xlu1 %v3466_v18, %s6747_s1  ;;  %3490 = vrot.lane.b32.xlu0 %v3467_v47, %s6747_s1  ;;  %v6172_v39 = vpack.c.bf16 %v5025_v44, %v5024_v38  ;;  %v5028_v47 = vld [vmem:[%s8879_s3 + $0x1a0] sm:$0xff]  ;;  %v5030_v38 = vld [vmem:[%s8879_s3 + $0x1b0] sm:$0xff] }
 0xfbf   : > { %5009 = vst.msk [vmem:[%s7487_s26 + $0x88] sm:$0xff] %vm9145_vm0, %v3246_v25  ;;  %v5031_v44 = vld [vmem:[%s8879_s3 + $0x1b8] sm:$0xff]  ;;  %v5032_v16 = vld [vmem:[%s8879_s3 + $0x1c0] sm:$0xff] }
 0xfc2   : > { %3439 = vrot.lane.b32.xlu0 %v5041_v7, %s9147_s16 }
 0xfc6   : > { %6463 = vrot.lane.b32.xlu0 %v7244_v34, %s6747_s1 }
 0xfe3   : > { %v3191_v50 = vpop.xlane.xlu1 %3190 }
 0xfe4   : > { %6579 = vrcp.f32 %v3191_v50 }
 0xfe7   : > { %v6454_v0 = vpop.permute.xlu1 %6453 }
 0xfe8   : > { %v6456_v21 = vunpack.i.h.bf16 %v6454_v0  ;;  %v6455_v1 = vunpack.i.l.bf16 %v6454_v0 }
 0xfea   : > { %v6168_v14 = vpack.c.bf16 %v6456_v21, %v6455_v1 }
 0xfec   : > { %6169 = vmatprep.subr.bf16.mxu1 %v6168_v14 }
 0xfed   : > { %6171 = vmatpush3.bf16.msra.mxu1 %v6168_v14  ;;  %v6190_v14 = vpack.c.bf16 %v5031_v44, %v5030_v38  ;;  %v5037_v44 = vld [vmem:[%s8879_s3 + $0x1e8] sm:$0xff] }
 0xfee   : > { %v6580_v27 = vpop.eup %6579  ;;  %6174 = vmatprep.subr.msk.bf16.mxu1 %vm6923_vm2, %v6172_v39 }
 0xfef   : > { %v3221_v56 = vmul.f32 %v6580_v27, %v3191_v50 }
 0xff1   : > { %v3229_v51 = vsub.f32 2.0, %v3221_v56 }
 0xff3   : > { %v3237_v40 = vmul.f32 %v6580_v27, %v3229_v51 }
 0xff5   : > { %v3245_v52 = vmul.f32 %v8191_v42, %v3237_v40  ;;  %v5029_v42 = vld [vmem:[%s8879_s3 + $0x1a8] sm:$0xff] }
 0xff6   : > { %v6184_v50 = vpack.c.bf16 %v5029_v42, %v5028_v47 }
 0xff7   : > { %5008 = vst.msk [vmem:[%s7487_s26 + $0x80] sm:$0xff] %vm9154_vm11, %v3245_v52  ;;  %5736 = vmatprep.mubr.msk.f32.mxu1 %vm9155_vm14, %v3245_v52  ;;  %v5033_v52 = vld [vmem:[%s8879_s3 + $0x1c8] sm:$0xff]  ;;  %vm9157_vm11 = vmmov %vm9145_vm0 }
 0xff8   : > { %v3200_v18 = vpop.xlane.xlu0 %3199  ;;  %5737 = vmatmul.mubr.msk.f32.vlgmr.msra.gmra.mrb[40].mxu1 %vm9156_vm1, %v3246_v25  ;;  %v6196_v42 = vpack.c.bf16 %v5033_v52, %v5032_v16  ;;  %vm9158_vm14 = vmmov %vm9145_vm0 }
 0xff9   : > { %6581 = vrcp.f32 %v3200_v18  ;;  %6177 = vmatpush3.bf16.xpose.msk.msra.mxu1 %vm6923_vm2, %v6172_v39  ;;  %vm9159_vm1 = vmmov %vm9145_vm0 }
 0xffa   : > { %6180 = vmatprep.subr.msk.bf16.mxu1 %vm6923_vm2, %v6178_v41 }
 0xffc   : > { %v3203_v7 = vpop.xlane.xlu0 %3202 }
 0xffd   : > { %6583 = vrcp.f32 %v3203_v7 }
0x1000   : > { %v3209_v0 = vpop.xlane.xlu0 %3208 }
0x1001   : > { %6585 = vrcp.f32 %v3209_v0  ;;  %6183 = vmatpush3.bf16.xpose.msk.msra.mxu1 %vm6923_vm2, %v6178_v41 }
0x1002   : > { %6186 = vmatprep.subr.msk.bf16.mxu1 %vm6923_vm2, %v6184_v50 }
0x1003   : > { %v6582_v25 = vpop.eup %6581 }
0x1004   : > { %v3224_v21 = vmul.f32 %v6582_v25, %v3200_v18 }
0x1006   : > { %v3232_v1 = vsub.f32 2.0, %v3224_v21 }
0x1007   : > { %v6584_v39 = vpop.eup %6583 }
0x1008   : > { %v3240_v27 = vmul.f32 %v6582_v25, %v3232_v1  ;;  %v3225_v56 = vmul.f32 %v6584_v39, %v3203_v7  ;;  %v5035_v25 = vld [vmem:[%s8879_s3 + $0x1d8] sm:$0xff] }
0x1009   : > { %6189 = vmatpush3.bf16.xpose.msk.msra.mxu1 %vm6923_vm2, %v6184_v50 }
0x100a   : > { %v3233_v51 = vsub.f32 2.0, %v3225_v56  ;;  %6192 = vmatprep.subr.msk.bf16.mxu1 %vm6923_vm2, %v6190_v14  ;;  %v3248_v40 = vmul.f32 %v8197_v54, %v3240_v27  ;;  %v5038_v27 = vld [vmem:[%s8879_s3 + $0x1f0] sm:$0xff]  ;;  %v5039_v56 = vld [vmem:[%s8879_s3 + $0x1f8] sm:$0xff] }
0x100b   : > { %v6586_v46 = vpop.eup %6585  ;;  %v6214_v52 = vpack.c.bf16 %v5039_v56, %v5038_v27 }
0x100c   : > { %v3241_v41 = vmul.f32 %v6584_v39, %v3233_v51  ;;  %v3227_v18 = vmul.f32 %v6586_v46, %v3209_v0  ;;  %5011 = vst.msk [vmem:[%s7487_s26 + $0x98] sm:$0xff] %vm9145_vm0, %v3248_v40  ;;  %v5034_v0 = vld [vmem:[%s8879_s3 + $0x1d0] sm:$0xff] }
0x100e   : > { %v3235_v47 = vsub.f32 2.0, %v3227_v18  ;;  %v3249_v7 = vmul.f32 %v8201_v49, %v3241_v41  ;;  %v6202_v49 = vpack.c.bf16 %v5035_v25, %v5034_v0 }
0x1010   : > { %v3243_v50 = vmul.f32 %v6586_v46, %v3235_v47  ;;  %5012 = vst.msk [vmem:[%s7487_s26 + $0xa0] sm:$0xff] %vm9157_vm11, %v3249_v7  ;;  %vm9160_vm11 = vmmov %vm9145_vm0 }
0x1011   : > { %6195 = vmatpush3.bf16.xpose.msk.msra.mxu1 %vm6923_vm2, %v6190_v14 }
0x1012   : > { %6198 = vmatprep.subr.msk.bf16.mxu1 %vm6923_vm2, %v6196_v42  ;;  %v3251_v54 = vmul.f32 %v8205_v45, %v3243_v50  ;;  %v5036_v45 = vld [vmem:[%s8879_s3 + $0x1e0] sm:$0xff] }
0x1013   : > { %v6208_v1 = vpack.c.bf16 %v5037_v44, %v5036_v45 }
0x1014   : > { %5014 = vst.msk [vmem:[%s7487_s26 + $0xb0] sm:$0xff] %vm9158_vm14, %v3251_v54  ;;  %vm9161_vm14 = vmmov %vm9145_vm0 }
0x1018   : > { %v3197_v38 = vpop.xlane.xlu1 %3196 }
0x1019   : > { %6587 = vrcp.f32 %v3197_v38  ;;  %6201 = vmatpush3.bf16.xpose.msk.msra.mxu1 %vm6923_vm2, %v6196_v42 }
0x101a   : > { %6204 = vmatprep.subr.msk.bf16.mxu1 %vm6923_vm2, %v6202_v49 }
0x101c   : > { %v3206_v21 = vpop.xlane.xlu1 %3205 }
0x101d   : > { %6589 = vrcp.f32 %v3206_v21 }
0x1020   : > { %v3212_v14 = vpop.xlane.xlu1 %3211 }
0x1021   : > { %6591 = vrcp.f32 %v3212_v14  ;;  %6207 = vmatpush3.bf16.xpose.msk.msra.mxu1 %vm6923_vm2, %v6202_v49 }
0x1022   : > { %6210 = vmatprep.subr.msk.bf16.mxu1 %vm6923_vm2, %v6208_v1 }
0x1023   : > { %v6588_v39 = vpop.eup %6587 }
0x1024   : > { %v3223_v51 = vmul.f32 %v6588_v39, %v3197_v38  ;;  %v3477_v46 = vpop.permute.xlu0 %3476 }
0x1026   : > { %v3231_v16 = vsub.f32 2.0, %v3223_v51 }
0x1027   : > { %v6590_v41 = vpop.eup %6589 }
0x1028   : > { %v3239_v18 = vmul.f32 %v6588_v39, %v3231_v16  ;;  %v3226_v47 = vmul.f32 %v6590_v41, %v3206_v21  ;;  %v3483_v42 = vpop.permute.xlu0 %3482 }
0x1029   : > { %6213 = vmatpush3.bf16.xpose.msk.msra.mxu1 %vm6923_vm2, %v6208_v1 }
0x102a   : > { %v3234_v50 = vsub.f32 2.0, %v3226_v47  ;;  %v3247_v0 = vmul.f32 %v8212_v43, %v3239_v18  ;;  %6216 = vmatprep.subr.msk.bf16.mxu1 %vm6923_vm2, %v6214_v52  ;;  %v3479_v43 = vpop.permute.xlu1 %3478 }
0x102b   : > { %v6592_v25 = vpop.eup %6591 }
0x102c   : > { %v3242_v49 = vmul.f32 %v6590_v41, %v3234_v50  ;;  %v3228_v38 = vmul.f32 %v6592_v25, %v3212_v14  ;;  %v3487_v45 = vpop.permute.xlu0 %3486  ;;  %5010 = vst.msk [vmem:[%s7487_s26 + $0x90] sm:$0xff] %vm9159_vm1, %v3247_v0  ;;  %5739 = vmatprep.mubr.msk.f32.mxu1 %vm9145_vm0, %v3247_v0  ;;  %vm9165_vm1 = vmmov %vm9145_vm0 }
0x102d   : > { %5740 = vmatmul.mubr.msk.f32.gmra.mrb[42].mxu1 %vm9160_vm11, %v3248_v40  ;;  %vm9166_vm11 = vcmask 130048  }
0x102e   : > { %v3236_v44 = vsub.f32 2.0, %v3228_v38  ;;  %5742 = vmatprep.mubr.msk.f32.mxu1 %vm9161_vm14, %v3249_v7  ;;  %v3250_v21 = vmul.f32 %v8216_v33, %v3242_v49  ;;  %v3481_v7 = vpop.permute.xlu1 %3480 }
0x1030   : > { %v3244_v1 = vmul.f32 %v6592_v25, %v3236_v44  ;;  %v3491_v39 = vpop.permute.xlu0 %3490  ;;  %5013 = vst.msk [vmem:[%s7487_s26 + $0xa8] sm:$0xff] %vm9162_vm10, %v3250_v21  ;;  %vm9169_vm10 = vmmov %vm9166_vm11 }
0x1031   : > { %5743 = vmatmul.mubr.msk.f32.gmra.mrb[44].mxu1 %vm9163_vm12, %v3250_v21  ;;  %vm9167_vm12 = vmmov %vm9166_vm11 }
0x1032   : > { %5745 = vmatprep.mubr.msk.f32.mxu1 %vm9164_vm13, %v3251_v54  ;;  %6219 = vmatpush3.bf16.xpose.msk.msra.mxu1 %vm6923_vm2, %v6214_v52  ;;  %v3252_v14 = vmul.f32 %v8220_v26, %v3244_v1  ;;  %vm9168_vm13 = vmmov %vm9166_vm11  ;;  %v3485_v26 = vpop.permute.xlu1 %3484 }
0x1033   : > { %vm9170_vm14 = vmmov %vm9169_vm10 }
0x1034   : > { %v3440_v40 = vpop.permute.xlu0 %3439  ;;  %5015 = vst.msk [vmem:[%s7487_s26 + $0xb8] sm:$0xff] %vm9165_vm1, %v3252_v14  ;;  %vm9171_vm1 = vmmov %vm9169_vm10 }
0x1035   : > { %5746 = vmatmul.mubr.msk.f32.gmra.mrb[46].mxu1 %vm9145_vm0, %v3252_v14  ;;  %v8360_v33 = vadd.f32 %v7028_v59, %v3440_v40  ;;  %v8363_v27 = vadd.f32 %v7043_v3, %v3440_v40  ;;  %v8366_v54 = vadd.f32 %v7060_v10, %v3440_v40  ;;  %v8369_v56 = vadd.f32 %v7077_v17, %v3440_v40  ;;  %vm9172_vm0 = vmmov %vm9171_vm1 }
0x1036   : > { %5780 = vmatprep.mubr.msk.f32.mxu1 %vm9166_vm11, %v3477_v46  ;;  %v3489_v59 = vpop.permute.xlu1 %3488  ;;  %vm9173_vm11 = vmmov %vm9172_vm0  ;;  %v3444_v44 = vadd.f32 %v3440_v40, %v7050_v5  ;;  %v3446_v21 = vadd.f32 %v3440_v40, %v7067_v12 }
0x1038   : > { %v6464_v14 = vpop.permute.xlu0 %6463 }
0x1039   : > { %5781 = vmatmul.mubr.msk.f32.vlgmr.msra.gmra.mrb[48].mxu1 %vm9167_vm12, %v3479_v43  ;;  %v3448_v43 = vadd.f32 %v3440_v40, %v7082_v19  ;;  %v6465_v5 = vunpack.i.l.bf16 %v6464_v14  ;;  %vm9183_vm12 = vnez %v8973_v11 }
0x103a   : > { %5783 = vmatprep.mubr.msk.f32.mxu1 %vm9168_vm13, %v3481_v7  ;;  %v6466_v7 = vunpack.i.h.bf16 %v6464_v14  ;;  %vm9184_vm13 = vnez %v8975_v24 }
0x103c   : > { %v6226_v19 = vpack.c.bf16 %v6466_v7, %v6465_v5 }
0x103d   : > { %5784 = vmatmul.mubr.msk.f32.gmra.mrb[50].mxu1 %vm9169_vm10, %v3483_v42  ;;  %vm9185_vm10 = vnez %v8977_v32 }
0x103e   : > { %5786 = vmatprep.mubr.msk.f32.mxu1 %vm9170_vm14, %v3485_v26  ;;  %vm9186_vm14 = vnez %v8979_v55 }
0x1041   : > { %5787 = vmatmul.mubr.msk.f32.gmra.mrb[52].mxu1 %vm9171_vm1, %v3487_v45  ;;  %v3442_v45 = vadd.f32 %v3440_v40, %v7032_v61  ;;  %vm9187_vm1 = vnez %v8981_v60 }
0x1042   : > { %5789 = vmatprep.mubr.msk.f32.mxu1 %vm9172_vm0, %v3489_v59 }
0x1045   : > { %5790 = vmatmul.mubr.msk.f32.gmra.mrb[54].mxu1 %vm9173_vm11, %v3491_v39  ;;  %vm9189_vm11 = vnez %v8985_v20 }
0x10cb   : > { %v8378_v3 = vpop.f32.mrb[40].mxu1 }
0x10cc   : > { %v8380_v10 = vpop.f32.mrb[41].mxu1 }
0x1100   : > { %v8382_v17 = vpop.f32.mrb[42].mxu1 }
0x1101   : > { %v8384_v51 = vpop.f32.mrb[43].mxu1 }
0x1104   : > { %v8386_v46 = vpop.f32.mrb[44].mxu1 }
0x1105   : > { %v8388_v16 = vpop.f32.mrb[45].mxu1 }
0x1108   : > { %v8390_v52 = vpop.f32.mrb[46].mxu1 }
0x1109   : > { %v8392_v41 = vpop.f32.mrb[47].mxu1 }
0x110c   : > { %v5782_v18 = vpop.f32.mrb[48].mxu1 }
0x110d   : > { %v3622_v47 = vpop.f32.mrb[49].mxu1 }
0x110e   : > { %3661 = vrot.lane.b32.xlu1 %v3622_v47, %s9115_s28 }
0x1110   : > { %v8395_v42 = vpop.f32.mrb[50].mxu1 }
0x1111   : > { %v3632_v50 = vpop.f32.mrb[51].mxu1 }
0x1112   : > { %6458 = vrot.lane.b32.xlu1 %v7240_v8, %s6747_s1 }
0x1114   : > { %v8399_v0 = vpop.f32.mrb[52].mxu1 }
0x1115   : > { %v3642_v25 = vpop.f32.mrb[53].mxu1 }
0x1116   : > { %3663 = vrot.lane.b32.xlu1 %v5782_v18, %s9115_s28 }
0x1118   : > { %v8402_v49 = vpop.f32.mrb[54].mxu1 }
0x1119   : > { %v8404_v38 = vpop.f32.mrb[55].mxu1 }
0x111a   : > { %3665 = vrot.lane.b32.xlu1 %v3632_v50, %s9115_s28 }
0x111e   : > { %3669 = vrot.lane.b32.xlu1 %v3642_v25, %s9115_s28 }
0x1122   : > { %3813 = vrot.lane.b32.xlu1 %v3442_v45, %s6747_s1 }
0x1126   : > { %3817 = vrot.lane.b32.xlu1 %v3444_v44, %s6747_s1 }
0x112a   : > { %3821 = vrot.lane.b32.xlu1 %v3446_v21, %s6747_s1 }
0x112e   : > { %3825 = vrot.lane.b32.xlu1 %v3448_v43, %s6747_s1 }
0x1180   : > { %v3662_v1 = vpop.permute.xlu1 %3661 }
0x1181   : > { %v3677_v39 = vsel %vm7150_vm3, %v3662_v1, %v3622_v47  ;;  %vm9174_vm3 = vmmov %vm9172_vm0 }
0x1182   : > { %3685 = vrot.lane.b32.xlu0 %v3677_v39, %s9045_s29 }
0x1184   : > { %v6459_v61 = vpop.permute.xlu1 %6458 }
0x1185   : > { %v6461_v26 = vunpack.i.h.bf16 %v6459_v61  ;;  %v6460_v59 = vunpack.i.l.bf16 %v6459_v61 }
0x1186   : > { %6468 = vrot.lane.b32.xlu0 %v7248_v13, %s6747_s1 }
0x1187   : > { %v6220_v12 = vpack.c.bf16 %v6461_v26, %v6460_v59 }
0x1188   : > { %v3664_v45 = vpop.permute.xlu1 %3663 }
0x1189   : > { %v3678_v40 = vsel %vm7161_vm4, %v3664_v45, %v5782_v18  ;;  %6222 = vmatprep.subr.msk.bf16.mxu0 %vm6923_vm2, %v6220_v12  ;;  %vm9175_vm4 = vmmov %vm9172_vm0 }
0x118a   : > { %6473 = vrot.lane.b32.xlu0 %v7252_v36, %s6747_s1  ;;  %6225 = vmatpush3.bf16.xpose.msk.msra.mxu0 %vm6923_vm2, %v6220_v12 }
0x118b   : > { %3687 = vrot.lane.b32.xlu1 %v3678_v40, %s9045_s29  ;;  %6228 = vmatprep.subr.msk.bf16.mxu0 %vm6923_vm2, %v6226_v19 }
0x118c   : > { %v3666_v53 = vpop.permute.xlu1 %3665 }
0x118d   : > { %v3679_v47 = vsel %vm7189_vm6, %v3666_v53, %v3632_v50  ;;  %vm9177_vm6 = vmmov %vm9172_vm0 }
0x118e   : > { %3815 = vrot.lane.b32.xlu0 %v8360_v33, %s6747_s1 }
0x118f   : > { %3667 = vrot.lane.b32.xlu1 %v8395_v42, %s9115_s28 }
0x1190   : > { %v3670_v63 = vpop.permute.xlu1 %3669 }
0x1191   : > { %v3681_v18 = vsel %vm7198_vm7, %v3670_v63, %v3642_v25  ;;  %vm9179_vm7 = vmmov %vm9172_vm0 }
0x1192   : > { %3819 = vrot.lane.b32.xlu0 %v8363_v27, %s6747_s1  ;;  %6231 = vmatpush3.bf16.xpose.msk.msra.mxu0 %vm6923_vm2, %v6226_v19 }
0x1193   : > { %3671 = vrot.lane.b32.xlu1 %v8399_v0, %s9115_s28 }
0x1194   : > { %v3814_v22 = vpop.permute.xlu1 %3813 }
0x1195   : > { %5808 = vmatprep.mubr.msk.f32.mxu0 %vm9174_vm3, %v3814_v22  ;;  %vm9190_vm3 = vnez %v8987_v15 }
0x1196   : > { %3823 = vrot.lane.b32.xlu0 %v8366_v54, %s6747_s1 }
0x1197   : > { %3673 = vrot.lane.b32.xlu1 %v8404_v38, %s9115_s28 }
0x1198   : > { %v3818_v29 = vpop.permute.xlu1 %3817 }
0x119a   : > { %3827 = vrot.lane.b32.xlu0 %v8369_v56, %s6747_s1 }
0x119c   : > { %v3822_v33 = vpop.permute.xlu1 %3821 }
0x11a0   : > { %v3826_v44 = vpop.permute.xlu1 %3825 }
0x11f4   : > { %v3686_v27 = vpop.permute.xlu0 %3685 }
0x11f5   : > { %v3701_v50 = vsel %vm7179_vm5, %v3686_v27, %v3677_v39  ;;  %vm9176_vm5 = vmmov %vm9172_vm0 }
0x11f6   : > { %3709 = vrot.lane.b32.xlu0 %v3701_v50, %s9047_s15 }
0x11f8   : > { %v6469_v25 = vpop.permute.xlu0 %6468 }
0x11f9   : > { %v6471_v21 = vunpack.i.h.bf16 %v6469_v25  ;;  %v6470_v43 = vunpack.i.l.bf16 %v6469_v25 }
0x11fa   : > { %3689 = vrot.lane.b32.xlu0 %v3679_v47, %s9045_s29 }
0x11fb   : > { %v6232_v54 = vpack.c.bf16 %v6471_v21, %v6470_v43 }
0x11fc   : > { %v6474_v1 = vpop.permute.xlu0 %6473 }
0x11fd   : > { %v6476_v14 = vunpack.i.h.bf16 %v6474_v1  ;;  %v6475_v61 = vunpack.i.l.bf16 %v6474_v1  ;;  %v3688_v7 = vpop.permute.xlu1 %3687  ;;  %6234 = vmatprep.subr.msk.bf16.mxu0 %vm6923_vm2, %v6232_v54 }
0x11fe   : > { %6237 = vmatpush3.bf16.xpose.msk.msra.mxu0 %vm6923_vm2, %v6232_v54  ;;  %3693 = vrot.lane.b32.xlu0 %v3681_v18, %s9045_s29  ;;  %v3702_v56 = vsel %vm7209_vm8, %v3688_v7, %v3678_v40  ;;  %vm9180_vm8 = vmmov %vm9172_vm0 }
0x11ff   : > { %v6238_v9 = vpack.c.bf16 %v6476_v14, %v6475_v61 }
0x1200   : > { %v3816_v26 = vpop.permute.xlu0 %3815 }
0x1201   : > { %v3668_v39 = vpop.permute.xlu1 %3667  ;;  %6240 = vmatprep.subr.msk.bf16.mxu0 %vm6923_vm2, %v6238_v9 }
0x1202   : > { %3711 = vrot.lane.b32.xlu0 %v3702_v56, %s9047_s15  ;;  %v3680_v5 = vsel %vm7219_vm9, %v3668_v39, %v8395_v42  ;;  %vm9181_vm9 = vmmov %vm9172_vm0 }
0x1204   : > { %v3820_v12 = vpop.permute.xlu0 %3819 }
0x1205   : > { %v3672_v59 = vpop.permute.xlu1 %3671 }
0x1206   : > { %6243 = vmatpush3.bf16.xpose.msk.msra.mxu0 %vm6923_vm2, %v6238_v9  ;;  %3691 = vrot.lane.b32.xlu0 %v3680_v5, %s9045_s29  ;;  %v3682_v35 = vsel %vm9119_vm15, %v3672_v59, %v8399_v0  ;;  %vm9178_vm2 = vmmov %vm9172_vm0  ;;  %vm9182_vm15 = vnez %v8971_v23  ;;  %vm9188_vm0 = vnez %v8983_v4 }
0x1208   : > { %v3824_v28 = vpop.permute.xlu0 %3823 }
0x1209   : > { %v3674_v53 = vpop.permute.xlu1 %3673 }
0x120a   : > { %3695 = vrot.lane.b32.xlu0 %v3682_v35, %s9045_s29  ;;  %v3683_v23 = vsel %vm9185_vm10, %v3674_v53, %v8404_v38 }
0x120c   : > { %v3828_v57 = vpop.permute.xlu0 %3827 }
0x120d   : > { %5809 = vmatmul.mubr.msk.f32.vlgmr.msra.gmra.mrb[40].mxu0 %vm9175_vm4, %v3816_v26  ;;  %vm9191_vm4 = vnez %v8989_v48 }
0x120e   : > { %5811 = vmatprep.mubr.msk.f32.mxu0 %vm9176_vm5, %v3818_v29  ;;  %3675 = vrot.lane.b32.xlu0 %v8402_v49, %s9115_s28  ;;  %vm9192_vm5 = vnez %v8991_v37 }
0x1211   : > { %5812 = vmatmul.mubr.msk.f32.gmra.mrb[42].mxu0 %vm9177_vm6, %v3820_v12  ;;  %vm9193_vm6 = vnez %v8993_v62 }
0x1212   : > { %5814 = vmatprep.mubr.msk.f32.mxu0 %vm9178_vm2, %v3822_v33  ;;  %vm9194_vm2 = vnez %v8995_v31 }
0x1215   : > { %5815 = vmatmul.mubr.msk.f32.gmra.mrb[44].mxu0 %vm9179_vm7, %v3824_v28  ;;  %vm9195_vm7 = vnez %v8997_v6 }
0x1216   : > { %5817 = vmatprep.mubr.msk.f32.mxu0 %vm9180_vm8, %v3826_v44  ;;  %vm9196_vm8 = vnez %v8999_v58 }
0x1219   : > { %5818 = vmatmul.mubr.msk.f32.gmra.mrb[46].mxu0 %vm9181_vm9, %v3828_v57  ;;  %vm9197_vm9 = vcmask 523264  }
0x121a   : > { %vm9201_vm10 = vmmov %vm9197_vm9 }
0x1268   : > { %v3710_v2 = vpop.permute.xlu0 %3709 }
0x1269   : > { %v3725_v42 = vsel %vm9182_vm15, %v3710_v2, %v3701_v50  ;;  %vm9198_vm15 = vmmov %vm9197_vm9 }
0x126a   : > { %3733 = vrot.lane.b32.xlu1 %v3725_v42, %s9051_s25 }
0x126c   : > { %v3690_v0 = vpop.permute.xlu0 %3689 }
0x126d   : > { %v3703_v45 = vsel %vm9183_vm12, %v3690_v0, %v3679_v47  ;;  %vm9199_vm12 = vmmov %vm9197_vm9 }
0x126e   : > { %3713 = vrot.lane.b32.xlu1 %v3703_v45, %s9047_s15 }
0x1270   : > { %v3694_v19 = vpop.permute.xlu0 %3693 }
0x1271   : > { %v3705_v40 = vsel %vm9184_vm13, %v3694_v19, %v3681_v18  ;;  %vm9200_vm13 = vmmov %vm9197_vm9 }
0x1272   : > { %3717 = vrot.lane.b32.xlu1 %v3705_v40, %s9047_s15 }
0x1274   : > { %v3712_v63 = vpop.permute.xlu0 %3711 }
0x1275   : > { %v3726_v11 = vsel %vm9186_vm14, %v3712_v63, %v3702_v56  ;;  %vm9202_vm14 = vnez %v9004_v30 }
0x1276   : > { %3697 = vrot.lane.b32.xlu1 %v3683_v23, %s9045_s29 }
0x1278   : > { %v3692_v47 = vpop.permute.xlu0 %3691 }
0x1279   : > { %v3704_v18 = vsel %vm9187_vm1, %v3692_v47, %v3680_v5  ;;  %vm9203_vm1 = vmmov %vm9197_vm9 }
0x127a   : > { %3759 = vrot.lane.b32.xlu1 %v3726_v11, %s9044_s23 }
0x127c   : > { %v3696_v24 = vpop.permute.xlu0 %3695 }
0x127d   : > { %v3706_v55 = vsel %vm9189_vm11, %v3696_v24, %v3682_v35 }
0x1280   : > { %v3676_v25 = vpop.permute.xlu0 %3675 }
0x1281   : > { %v3684_v4 = vsel %vm9191_vm4, %v3676_v25, %v8402_v49 }
0x12dc   : > { %v3734_v22 = vpop.permute.xlu1 %3733 }
0x12dd   : > { %3757 = vrot.lane.b32.xlu0 %v3734_v22, %s9044_s23 }
0x12e0   : > { %v5810_v29 = vpop.f32.mrb[40].mxu0  ;;  %v3714_v33 = vpop.permute.xlu1 %3713 }
0x12e1   : > { %v3727_v32 = vsel %vm9188_vm0, %v3714_v33, %v3703_v45  ;;  %v3943_v38 = vpop.f32.mrb[41].mxu0  ;;  %3715 = vrot.lane.b32.xlu0 %v3704_v18, %s9047_s15  ;;  %vm9204_vm0 = vmmov %vm9203_vm1 }
0x12e2   : > { %3737 = vrot.lane.b32.xlu1 %v3727_v32, %s9051_s25  ;;  %vm9205_vm11 = vmmov %vm9204_vm0 }
0x12e3   : > { %vm9207_vm4 = vmmov %vm9204_vm0 }
0x12e4   : > { %v5813_v27 = vpop.f32.mrb[42].mxu0  ;;  %v3718_v50 = vpop.permute.xlu1 %3717 }
0x12e5   : > { %v3729_v60 = vsel %vm9190_vm3, %v3718_v50, %v3705_v40  ;;  %v3953_v44 = vpop.f32.mrb[43].mxu0  ;;  %3719 = vrot.lane.b32.xlu0 %v3706_v55, %s9047_s15  ;;  %vm9206_vm3 = vmmov %vm9204_vm0 }
0x12e6   : > { %3741 = vrot.lane.b32.xlu1 %v3729_v60, %s9051_s25 }
0x12e8   : > { %v5816_v21 = vpop.f32.mrb[44].mxu0  ;;  %v3698_v43 = vpop.permute.xlu1 %3697 }
0x12e9   : > { %v3707_v20 = vsel %vm9192_vm5, %v3698_v43, %v3683_v23  ;;  %v3963_v54 = vpop.f32.mrb[45].mxu0  ;;  %3699 = vrot.lane.b32.xlu0 %v3684_v4, %s9045_s29  ;;  %vm9208_vm5 = vmmov %vm9204_vm0  ;;  %s9214_s29 = smov 32  }
0x12ea   : > { %3721 = vrot.lane.b32.xlu1 %v3707_v20, %s9047_s15 }
0x12ec   : > { %v5819_v15 = vpop.f32.mrb[46].mxu0  ;;  %v3760_v1 = vpop.permute.xlu1 %3759 }
0x12ed   : > { %v3973_v14 = vpop.f32.mrb[47].mxu0 }
0x12ee   : > { %3783 = vrot.lane.b32.xlu1 %v3760_v1, %s9067_s24 }
0x134f   : > { %v3758_v61 = vpop.permute.xlu0 %3757 }
0x1350   : > { %3781 = vrot.lane.b32.xlu0 %v3758_v61, %s9067_s24 }
0x1353   : > { %v3716_v48 = vpop.permute.xlu0 %3715 }
0x1354   : > { %v3728_v49 = vsel %vm9193_vm6, %v3716_v48, %v3704_v18  ;;  %v3738_v7 = vpop.permute.xlu1 %3737  ;;  %vm9209_vm6 = vmmov %vm9204_vm0 }
0x1355   : > { %3787 = vrot.lane.b32.xlu1 %v3728_v49, %s9067_s24  ;;  %3785 = vrot.lane.b32.xlu0 %v3738_v7, %s9067_s24 }
0x1357   : > { %v3720_v37 = vpop.permute.xlu0 %3719 }
0x1358   : > { %v3730_v9 = vsel %vm9194_vm2, %v3720_v37, %v3706_v55  ;;  %v3742_v56 = vpop.permute.xlu1 %3741  ;;  %vm9210_vm2 = vmmov %vm9204_vm0 }
0x1359   : > { %3767 = vrot.lane.b32.xlu1 %v3730_v9, %s9044_s23  ;;  %3765 = vrot.lane.b32.xlu0 %v3742_v56, %s9044_s23  ;;  %s9211_s23 = smov 16  }
0x135b   : > { %v3700_v39 = vpop.permute.xlu0 %3699 }
0x135c   : > { %v3708_v5 = vsel %vm9195_vm7, %v3700_v39, %v3684_v4  ;;  %v3722_v62 = vpop.permute.xlu1 %3721  ;;  %vm9217_vm7 = vmmov %vm9204_vm0 }
0x135d   : > { %v3731_v26 = vsel %vm9196_vm8, %v3722_v62, %v3707_v20  ;;  %3723 = vrot.lane.b32.xlu0 %v3708_v5, %s9047_s15  ;;  %vm9218_vm8 = vmmov %vm9204_vm0  ;;  %s6748_s15 = smov [#allocation4]  }
0x135e   : > { %3745 = vrot.lane.b32.xlu1 %v3731_v26, %s9051_s25  ;;  %s6629_s25 = sshll.u32 %s6748_s15, 4  ;;  %s6630_s25 = int_to_ptr.vmem [resolvable:$false] %s6629_s25 }
0x135f   : > { %s6631_s24 = scalar_lea.vmem %s6630_s25, 8192  ;;  %p6632_p1 = scmp.lt.s32.totalorder %s8765_s17, %s6630_s25 }
0x1360   : > { %v3784_v59 = vpop.permute.xlu1 %3783 }
0x1361   : > { %v3949_v31 = vadd.f32 %v5810_v29, %v3784_v59 }
0x1363   : > { %v3985_v35 = vsel %vm9197_vm9, %v3949_v31, -inf  ;;  %vm9219_vm9 = vmmov %vm9204_vm0 }
0x1382   : > { %3986 = vmax.xlane.f32.xlu1 %v3985_v35 }
0x13c2   : > { %v3782_v12 = vpop.permute.xlu0 %3781 }
0x13c3   : > { %v8539_v28 = vadd.f32 %v3943_v38, %v3782_v12  ;;  %v9213_v12 = vld [vmem:[#allocation17_spill] sm:$0xff] }
0x13c5   : > { %v3982_v6 = vsel %vm9198_vm15, %v8539_v28, -inf  ;;  %vm9224_vm15 = vmmov %vm9204_vm0 }
0x13c6   : > { %3983 = vmax.xlane.f32.xlu0 %v3982_v6 }
0x13c7   : > { %v3786_v57 = vpop.permute.xlu0 %3785  ;;  %v3788_v2 = vpop.permute.xlu1 %3787 }
0x13c8   : > { %v8543_v58 = vadd.f32 %v3953_v44, %v3786_v57  ;;  %v3959_v42 = vadd.f32 %v5813_v27, %v3788_v2  ;;  %v9215_v2 = vld [vmem:[#allocation20_spill] sm:$0xff] }
0x13ca   : > { %v3988_v0 = vsel %vm9199_vm12, %v8543_v58, -inf  ;;  %v3991_v63 = vsel %vm9201_vm10, %v3959_v42, -inf  ;;  %vm9225_vm12 = vmmov %vm9204_vm0 }
0x13cb   : > { %3989 = vmax.xlane.f32.xlu0 %v3988_v0  ;;  %v3766_v45 = vpop.permute.xlu0 %3765  ;;  %v3768_v19 = vpop.permute.xlu1 %3767  ;;  %vm9227_vm10 = vmmov %vm9204_vm0 }
0x13cc   : > { %v8547_v40 = vadd.f32 %v3963_v54, %v3766_v45  ;;  %v3969_v53 = vadd.f32 %v5816_v21, %v3768_v19  ;;  %v9220_v19 = vld [vmem:[#allocation22_spill] sm:$0xff] }
0x13ce   : > { %v3994_v23 = vsel %vm9200_vm13, %v8547_v40, -inf  ;;  %v3997_v29 = vsel %vm9203_vm1, %v3969_v53, -inf  ;;  %vm9226_vm13 = vmmov %vm9204_vm0 }
0x13cf   : > { %v3724_v11 = vpop.permute.xlu0 %3723  ;;  %3995 = vmax.xlane.f32.xlu1 %v3994_v23  ;;  %3992 = vmax.xlane.f32.xlu0 %v3991_v63  ;;  %vm9229_vm1 = vmmov %vm9204_vm0 }
0x13d0   : > { %v3732_v47 = vsel %vm9202_vm14, %v3724_v11, %v3708_v5  ;;  %v3746_v22 = vpop.permute.xlu1 %3745  ;;  %vm9228_vm14 = vmmov %vm9204_vm0 }
0x13d1   : > { %v3974_v24 = vadd.f32 %v3973_v14, %v3746_v22  ;;  %v3979_v18 = vadd.f32 %v5819_v15, %v3732_v47 }
0x13d3   : > { %3998 = vmax.xlane.f32.xlu0 %v3997_v29  ;;  %v4000_v33 = vsel %vm9204_vm0, %v3974_v24, -inf  ;;  %v4003_v32 = vsel %vm9205_vm11, %v3979_v18, -inf  ;;  %vm9230_vm11 = vmmov %vm9204_vm0 }
0x13d4   : > { %4001 = vmax.xlane.f32.xlu1 %v4000_v33 }
0x13d7   : > { %4004 = vmax.xlane.f32.xlu0 %v4003_v32 }
0x140f   : > { %v3987_v55 = vpop.xlane.xlu1 %3986 }
0x1410   : > { %v4007_v20 = vsub.f32 %v3949_v31, %v3987_v55  ;;  %v9212_v31 = vld [vmem:[#allocation18_spill] sm:$0xff] }
0x1412   : > { %v4016_v61 = vmul.f32 1.442695, %v4007_v20 }
0x1453   : > { %v3984_v38 = vpop.xlane.xlu0 %3983 }
0x1458   : > { %v3990_v27 = vpop.xlane.xlu0 %3989 }
0x1459   : > { %v4008_v35 = vsub.f32 %v8543_v58, %v3990_v27 }
0x145b   : > { %v4018_v6 = vmul.f32 1.442695, %v4008_v35 }
0x145c   : > { %v3993_v50 = vpop.xlane.xlu0 %3992  ;;  %v3996_v25 = vpop.xlane.xlu1 %3995 }
0x145d   : > { %v4009_v60 = vsub.f32 %v3959_v42, %v3993_v50  ;;  %v4010_v57 = vsub.f32 %v8547_v40, %v3996_v25  ;;  %v9216_v42 = vld [vmem:[#allocation19_spill] sm:$0xff] }
0x145e   : > { %v9223_v40 = vld [vmem:[#allocation23_spill] sm:$0xff] }
0x145f   : > { %v4020_v30 = vmul.f32 1.442695, %v4009_v60 }
0x1460   : > { %v3999_v44 = vpop.xlane.xlu0 %3998 }
0x1461   : > { %6593 = vpow2.f32 %v4020_v30  ;;  %v4011_v4 = vsub.f32 %v3969_v53, %v3999_v44  ;;  %v4002_v21 = vpop.xlane.xlu1 %4001 }
0x1462   : > { %v4012_v43 = vsub.f32 %v3974_v24, %v4002_v21 }
0x1463   : > { %v4024_v54 = vmul.f32 1.442695, %v4011_v4 }
0x1464   : > { %v4026_v15 = vmul.f32 1.442695, %v4012_v43  ;;  %v4005_v1 = vpop.xlane.xlu0 %4004 }
0x1465   : > { %6595 = vpow2.f32 %v4024_v54  ;;  %v4013_v14 = vsub.f32 %v3979_v18, %v4005_v1 }
0x1466   : > { %6597 = vpow2.f32 %v4026_v15 }
0x1467   : > { %v4028_v48 = vmul.f32 1.442695, %v4013_v14 }
0x1469   : > { %6599 = vpow2.f32 %v4028_v48 }
0x146a   : > { %6601 = vpow2.f32 %v4016_v61 }
0x146b   : > { %v8557_v49 = vpop.eup %6593  ;;  %6603 = vpow2.f32 %v4018_v6 }
0x146c   : > { %v4039_v7 = vsel %vm9206_vm3, %v8557_v49, 0.0  ;;  %vm9231_vm3 = vmmov %vm9204_vm0 }
0x146d   : > { %4040 = vadd.xlane.f32.xlu0 %v4039_v7 }
0x146f   : > { %v8561_v37 = vpop.eup %6595 }
0x1470   : > { %v8563_v9 = vpop.eup %6597  ;;  %v4045_v56 = vsel %vm9207_vm4, %v8561_v37, 0.0  ;;  %vm9232_vm4 = vmmov %vm9204_vm0 }
0x1471   : > { %4046 = vadd.xlane.f32.xlu0 %v4045_v56  ;;  %v4048_v39 = vsel %vm9208_vm5, %v8563_v9, 0.0  ;;  %vm9233_vm5 = vmmov %vm9204_vm0 }
0x1472   : > { %4049 = vadd.xlane.f32.xlu1 %v4048_v39 }
0x1473   : > { %v8569_v5 = vpop.eup %6599 }
0x1474   : > { %v4051_v62 = vsel %vm9209_vm6, %v8569_v5, 0.0  ;;  %v8573_v26 = vpop.eup %6601  ;;  %vm9234_vm6 = vmmov %vm9204_vm0 }
0x1475   : > { %4052 = vadd.xlane.f32.xlu0 %v4051_v62  ;;  %v4033_v59 = vsel %vm9210_vm2, %v8573_v26, 0.0  ;;  %v8596_v58 = vpop.eup %6603  ;;  %vm9235_vm2 = vmmov %vm9204_vm0 }
0x1479   : > { %4034 = vadd.xlane.f32.xlu0 %v4033_v59 }
0x1483   : > { %6478 = vrot.lane.b32.xlu1 %v7240_v8, %s9211_s23  ;;  %v4006_v8 = vsub.f32 %v8539_v28, %v3984_v38 }
0x1487   : > { %6488 = vrot.lane.b32.xlu1 %v7248_v13, %s9211_s23  ;;  %v4022_v13 = vmul.f32 1.442695, %v4010_v57 }
0x1489   : > { %6605 = vpow2.f32 %v4022_v13 }
0x148f   : > { %6483 = vrot.lane.b32.xlu0 %v7244_v34, %s9211_s23  ;;  %v4014_v34 = vmul.f32 1.442695, %v4006_v8 }
0x1491   : > { %6607 = vpow2.f32 %v4014_v34 }
0x1493   : > { %4264 = vrot.lane.b32.xlu0 %v9212_v31, %s9211_s23  ;;  %v8602_v28 = vpop.eup %6605 }
0x1497   : > { %4266 = vrot.lane.b32.xlu0 %v9213_v12, %s9211_s23 }
0x149b   : > { %4296 = vrot.lane.b32.xlu0 %v8380_v10, %s9214_s29  ;;  %v4036_v10 = vsel %vm9217_vm7, %v8596_v58, 0.0  ;;  %v8608_v0 = vpop.eup %6607  ;;  %vm9236_vm7 = vmmov %vm9204_vm0 }
0x149c   : > { %v4030_v45 = vsel %vm9219_vm9, %v8608_v0, 0.0  ;;  %vm9238_vm9 = vmmov %vm9204_vm0 }
0x149f   : > { %4298 = vrot.lane.b32.xlu0 %v8378_v3, %s9214_s29  ;;  %v4042_v3 = vsel %vm9218_vm8, %v8602_v28, 0.0  ;;  %vm9237_vm8 = vmmov %vm9204_vm0 }
0x14a3   : > { %4268 = vrot.lane.b32.xlu0 %v9215_v2, %s9211_s23 }
0x14a7   : > { %4270 = vrot.lane.b32.xlu0 %v9216_v42, %s9211_s23 }
0x14ab   : > { %4300 = vrot.lane.b32.xlu0 %v8384_v51, %s9214_s29  ;;  %4037 = vadd.xlane.f32.xlu1 %v4036_v10  ;;  %v9221_v51 = vld [vmem:[#allocation21_spill] sm:$0xff] }
0x14af   : > { %4302 = vrot.lane.b32.xlu0 %v8382_v17, %s9214_s29  ;;  %4043 = vadd.xlane.f32.xlu1 %v4042_v3  ;;  %v9222_v17 = vld [vmem:[#allocation24_spill] sm:$0xff] }
0x14b3   : > { %4031 = vadd.xlane.f32.xlu1 %v4030_v45 }
0x14c4   : > { %6493 = vrot.lane.b32.xlu1 %v7252_v36, %s9211_s23 }
0x14c8   : > { %4272 = vrot.lane.b32.xlu1 %v9220_v19, %s9211_s23 }
0x14cc   : > { %4274 = vrot.lane.b32.xlu1 %v9221_v51, %s9211_s23 }
0x14d0   : > { %4304 = vrot.lane.b32.xlu1 %v8388_v16, %s9214_s29 }
0x14d4   : > { %4306 = vrot.lane.b32.xlu1 %v8386_v46, %s9214_s29 }
0x14d8   : > { %4276 = vrot.lane.b32.xlu1 %v9222_v17, %s9211_s23 }
0x14dc   : > { %4278 = vrot.lane.b32.xlu1 %v9223_v40, %s9211_s23  ;;  %s4564_s23 = scalar_lea.sflag [#allocation5], %s7473_s18 }
0x14e0   : > { %4308 = vrot.lane.b32.xlu1 %v8392_v41, %s9214_s29 }
0x14e4   : > { %4310 = vrot.lane.b32.xlu1 %v8390_v52, %s9214_s29  ;;  %s6625_s29 = scalar_lea.vmem %s8765_s17, 4096 }
0x14e5   : > { %p6626_p12 = scmp.ne.s32.totalorder %s8765_s17, %s6625_s29  ;;  %p6633_p2 = scmp.lt.s32.totalorder %s6631_s24, %s6625_s29 }
0x14e7   : > { %p6627_p13 = pnand %p6626_p12, %p6842_p4  ;;  %p6634_p3 = por %p6633_p2, %p6632_p1 }
0x14e9   : > { %p6628_p0 = pneg %p6627_p13 }
0x14eb   : > { %p6635_p5 = pnand %p6634_p3, %p6628_p0 }
0x14fa   : > { %v4041_v36 = vpop.xlane.xlu0 %4040 }
0x14fb   : > { %6609 = vrcp.f32 %v4041_v36 }
0x14fe   : > { %v4047_v53 = vpop.xlane.xlu0 %4046 }
0x14ff   : > { %6611 = vrcp.f32 %v4047_v53  ;;  %v4050_v16 = vpop.xlane.xlu1 %4049 }
0x1500   : > { %6613 = vrcp.f32 %v4050_v16 }
0x1502   : > { %v4053_v23 = vpop.xlane.xlu0 %4052 }
0x1503   : > { %6615 = vrcp.f32 %v4053_v23  ;;  %v6479_v46 = vpop.permute.xlu1 %6478 }
0x1504   : > { %v6481_v63 = vunpack.i.h.bf16 %v6479_v46  ;;  %v6480_v11 = vunpack.i.l.bf16 %v6479_v46  ;;  %v4381_v46 = vld [vmem:[%s8882_s6 + $0x18] sm:$0xff] }
0x1505   : > { %v6610_v47 = vpop.eup %6609 }
0x1506   : > { %v4065_v22 = vmul.f32 %v6610_v47, %v4041_v36  ;;  %v6244_v24 = vpack.c.bf16 %v6481_v63, %v6480_v11  ;;  %v4035_v18 = vpop.xlane.xlu0 %4034  ;;  %v4382_v11 = vld [vmem:[%s8882_s6 + $0x20] sm:$0xff] }
0x1507   : > { %6617 = vrcp.f32 %v4035_v18  ;;  %v6489_v41 = vpop.permute.xlu1 %6488 }
0x1508   : > { %v4073_v29 = vsub.f32 2.0, %v4065_v22  ;;  %6245 = vmatprep.subr.bf16.mxu0 %v6244_v24  ;;  %v6491_v55 = vunpack.i.h.bf16 %v6489_v41  ;;  %v6490_v25 = vunpack.i.l.bf16 %v6489_v41 }
0x1509   : > { %v6612_v52 = vpop.eup %6611  ;;  %6247 = vmatpush3.bf16.msra.mxu0 %v6244_v24  ;;  %v4384_v24 = vld [vmem:[%s8882_s6 + $0x30] sm:$0xff] }
0x150a   : > { %v6614_v33 = vpop.eup %6613  ;;  %v4081_v32 = vmul.f32 %v6610_v47, %v4073_v29  ;;  %v4067_v38 = vmul.f32 %v6612_v52, %v4047_v53  ;;  %v6484_v27 = vpop.permute.xlu0 %6483  ;;  %v6252_v14 = vpack.c.bf16 %v6491_v55, %v6490_v25  ;;  %v4383_v47 = vld [vmem:[%s8882_s6 + $0x28] sm:$0xff] }
0x150b   : > { %v4068_v50 = vmul.f32 %v6614_v33, %v4050_v16  ;;  %v6486_v60 = vunpack.i.h.bf16 %v6484_v27  ;;  %v6485_v30 = vunpack.i.l.bf16 %v6484_v27  ;;  %v6268_v22 = vpack.c.bf16 %v4383_v47, %v4382_v11  ;;  %v9259_v47 = vld [vmem:[#allocation15_spill] sm:$0xff] }
0x150c   : > { %v4089_v44 = vmul.f32 %v8557_v49, %v4081_v32  ;;  %v4075_v4 = vsub.f32 2.0, %v4067_v38 }
0x150d   : > { %v6616_v21 = vpop.eup %6615  ;;  %v4076_v43 = vsub.f32 2.0, %v4068_v50  ;;  %v6248_v20 = vpack.c.bf16 %v6486_v60, %v6485_v30 }
0x150e   : > { %5087 = vst.msk [vmem:[%s7487_s26 + $0xd8] sm:$0xff] %vm9224_vm15, %v4089_v44  ;;  %v4083_v54 = vmul.f32 %v6612_v52, %v4075_v4  ;;  %v4069_v15 = vmul.f32 %v6616_v21, %v4053_v23  ;;  %v4265_v25 = vpop.permute.xlu0 %4264  ;;  %vm4360_vm15 = vcmask 261120  }
0x150f   : > { %v4084_v1 = vmul.f32 %v6614_v33, %v4076_v43  ;;  %6249 = vmatprep.subr.bf16.mxu0 %v6248_v20 }
0x1510   : > { %v4091_v61 = vmul.f32 %v8561_v37, %v4083_v54  ;;  %v4077_v48 = vsub.f32 2.0, %v4069_v15  ;;  %6251 = vmatpush3.bf16.msra.mxu0 %v6248_v20 }
0x1511   : > { %v6618_v49 = vpop.eup %6617  ;;  %v4092_v7 = vmul.f32 %v8563_v9, %v4084_v1  ;;  %6253 = vmatprep.subr.bf16.mxu0 %v6252_v14 }
0x1512   : > { %5089 = vst.msk [vmem:[%s7487_s26 + $0xe8] sm:$0xff] %vm9225_vm12, %v4091_v61  ;;  %v4085_v56 = vmul.f32 %v6616_v21, %v4077_v48  ;;  %v4063_v39 = vmul.f32 %v6618_v49, %v4035_v18  ;;  %v4385_v18 = vld [vmem:[%s8882_s6 + $0x38] sm:$0xff]  ;;  %v4267_v60 = vpop.permute.xlu0 %4266  ;;  %vm9240_vm12 = vcmask 130048  }
0x1513   : > { %5090 = vst.msk [vmem:[%s7487_s26 + $0xf0] sm:$0xff] %vm9226_vm13, %v4092_v7  ;;  %v6272_v41 = vpack.c.bf16 %v4385_v18, %v4384_v24  ;;  %vm4369_vm13 = vcmask 392192  }
0x1514   : > { %v4093_v62 = vmul.f32 %v8569_v5, %v4085_v56  ;;  %v4071_v59 = vsub.f32 2.0, %v4063_v39  ;;  %6255 = vmatpush3.bf16.msra.mxu0 %v6252_v14  ;;  %v9239_v56 = vld [vmem:[#allocation10_spill] sm:$0xff] }
0x1515   : > { %v4352_v39 = vsel %vm9240_vm12, %v9239_v56, %v4265_v25 }
0x1516   : > { %5091 = vst.msk [vmem:[%s7487_s26 + $0xf8] sm:$0xff] %vm9227_vm10, %v4093_v62  ;;  %v4079_v37 = vmul.f32 %v6618_v49, %v4071_v59  ;;  %vm9242_vm10 = vmmov %vm9240_vm12 }
0x1518   : > { %v4087_v31 = vmul.f32 %v8573_v26, %v4079_v37 }
0x151a   : > { %5085 = vst.msk [vmem:[%s7487_s26 + $0xc8] sm:$0xff] %vm9228_vm14, %v4087_v31  ;;  %vm9243_vm14 = vmmov %vm9204_vm0 }
0x1538   : > { %v4038_v35 = vpop.xlane.xlu1 %4037 }
0x1539   : > { %6619 = vrcp.f32 %v4038_v35 }
0x153c   : > { %v4044_v9 = vpop.xlane.xlu1 %4043 }
0x153d   : > { %6621 = vrcp.f32 %v4044_v9 }
0x1540   : > { %v4032_v12 = vpop.xlane.xlu1 %4031 }
0x1541   : > { %6623 = vrcp.f32 %v4032_v12 }
0x1543   : > { %v6620_v6 = vpop.eup %6619 }
0x1544   : > { %v4064_v57 = vmul.f32 %v6620_v6, %v4038_v35  ;;  %v6494_v8 = vpop.permute.xlu1 %6493 }
0x1545   : > { %v6496_v5 = vunpack.i.h.bf16 %v6494_v8  ;;  %v6495_v13 = vunpack.i.l.bf16 %v6494_v8 }
0x1546   : > { %v4072_v34 = vsub.f32 2.0, %v4064_v57  ;;  %v9244_v57 = vld [vmem:[#allocation12_spill] sm:$0xff] }
0x1547   : > { %v6622_v2 = vpop.eup %6621  ;;  %v6256_v42 = vpack.c.bf16 %v6496_v5, %v6495_v13 }
0x1548   : > { %v4080_v26 = vmul.f32 %v6620_v6, %v4072_v34  ;;  %v4066_v10 = vmul.f32 %v6622_v2, %v4044_v9  ;;  %v4273_v30 = vpop.permute.xlu1 %4272 }
0x1549   : > { %6257 = vmatprep.subr.bf16.mxu0 %v6256_v42 }
0x154a   : > { %v4088_v3 = vmul.f32 %v8596_v58, %v4080_v26  ;;  %v4074_v45 = vsub.f32 2.0, %v4066_v10  ;;  %6259 = vmatpush3.bf16.msra.mxu0 %v6256_v42  ;;  %v4378_v58 = vld [vmem:[%s8882_s6] sm:$0xff]  ;;  %v9247_v42 = vld [vmem:[#allocation11_spill] sm:$0xff]  ;;  %v9249_v10 = vld [vmem:[#allocation14_spill] sm:$0xff] }
0x154b   : > { %v6624_v19 = vpop.eup %6623 }
0x154c   : > { %5086 = vst.msk [vmem:[%s7487_s26 + $0xd0] sm:$0xff] %vm9229_vm1, %v4088_v3  ;;  %v4082_v51 = vmul.f32 %v6622_v2, %v4074_v45  ;;  %v4062_v17 = vmul.f32 %v6624_v19, %v4032_v12  ;;  %v4275_v4 = vpop.permute.xlu1 %4274  ;;  %vm9245_vm1 = vmmov %vm9242_vm10 }
0x154d   : > { %vm9260_vm12 = vmmov %vm9245_vm1 }
0x154e   : > { %v4090_v40 = vmul.f32 %v8602_v28, %v4082_v51  ;;  %v4070_v36 = vsub.f32 2.0, %v4062_v17  ;;  %v4379_v28 = vld [vmem:[%s8882_s6 + $0x8] sm:$0xff] }
0x154f   : > { %v6260_v23 = vpack.c.bf16 %v4379_v28, %v4378_v58 }
0x1550   : > { %5088 = vst.msk [vmem:[%s7487_s26 + $0xe0] sm:$0xff] %vm9204_vm0, %v4090_v40  ;;  %v4078_v53 = vmul.f32 %v6624_v19, %v4070_v36  ;;  %v4305_v43 = vpop.permute.xlu1 %4304  ;;  %v9251_v19 = vld [vmem:[#allocation13_spill] sm:$0xff] }
0x1551   : > { %6261 = vmatprep.subr.bf16.mxu0 %v6260_v23  ;;  %6276 = vmatprep.subr.bf16.mxu1 %v6260_v23 }
0x1552   : > { %v4086_v16 = vmul.f32 %v8608_v0, %v4078_v53  ;;  %v4380_v0 = vld [vmem:[%s8882_s6 + $0x10] sm:$0xff]  ;;  %6280 = vmatpush3.bf16.msra.mxu1 %v6260_v23 }
0x1553   : > { %v6264_v63 = vpack.c.bf16 %v4381_v46, %v4380_v0  ;;  %v9255_v0 = vld [vmem:[#allocation16_spill] sm:$0xff] }
0x1554   : > { %5084 = vst.msk [vmem:[%s7487_s26 + $0xc0] sm:$0xff] %vm9230_vm11, %v4086_v16  ;;  %5836 = vmatprep.mubr.msk.f32.mxu0 %vm9231_vm3, %v4086_v16  ;;  %v4307_v54 = vpop.permute.xlu1 %4306  ;;  %vm9246_vm11 = vmmov %vm9204_vm0 }
0x1555   : > { %5837 = vmatmul.mubr.msk.f32.vlgmr.msra.gmra.mrb[48].mxu0 %vm9232_vm4, %v4087_v31  ;;  %6277 = vmatprep.subr.bf16.mxu1 %v6264_v63  ;;  %vm9248_vm3 = vmmov %vm9245_vm1 }
0x1556   : > { %5839 = vmatprep.mubr.msk.f32.mxu0 %vm9233_vm5, %v4088_v3  ;;  %6263 = vmatpush3.bf16.msra.mxu0 %v6260_v23  ;;  %vm9250_vm4 = vmmov %vm9245_vm1 }
0x1557   : > { %6265 = vmatprep.subr.bf16.mxu0 %v6264_v63  ;;  %6281 = vmatpush3.bf16.msra.mxu1 %v6264_v63  ;;  %v4356_v3 = vsel %vm9250_vm4, %v9249_v10, %v4273_v30  ;;  %vm9252_vm5 = vmmov %vm9245_vm1 }
0x1558   : > { %6278 = vmatprep.subr.bf16.mxu1 %v6268_v22  ;;  %v4277_v1 = vpop.permute.xlu1 %4276  ;;  %v4357_v51 = vsel %vm9252_vm5, %v9251_v19, %v4275_v4  ;;  %v4365_v17 = vsel %vm4360_vm15, %v4356_v3, %v4305_v43  ;;  %vm9268_vm4 = vmmov %vm9204_vm0 }
0x1559   : > { %5840 = vmatmul.mubr.msk.f32.gmra.mrb[50].mxu0 %vm9234_vm6, %v4089_v44  ;;  %v4297_v44 = vpop.permute.xlu0 %4296  ;;  %v4366_v53 = vsel %vm4360_vm15, %v4357_v51, %v4307_v54  ;;  %vm9253_vm6 = vmmov %vm9204_vm0 }
0x155a   : > { %5842 = vmatprep.mubr.msk.f32.mxu0 %vm9235_vm2, %v4090_v40  ;;  %6267 = vmatpush3.bf16.msra.mxu0 %v6264_v63  ;;  %v4361_v37 = vsel %vm4360_vm15, %v4352_v39, %v4297_v44  ;;  %vm9254_vm2 = vmmov %vm9204_vm0 }
0x155b   : > { %6269 = vmatprep.subr.bf16.mxu0 %v6268_v22  ;;  %6282 = vmatpush3.bf16.msra.mxu1 %v6268_v22 }
0x155c   : > { %6279 = vmatprep.subr.bf16.mxu1 %v6272_v41 }
0x155d   : > { %5843 = vmatmul.mubr.msk.f32.gmra.mrb[52].mxu0 %vm9236_vm7, %v4091_v61  ;;  %v4299_v21 = vpop.permute.xlu0 %4298  ;;  %v4279_v61 = vpop.permute.xlu1 %4278  ;;  %vm9256_vm7 = vmmov %vm9245_vm1 }
0x155e   : > { %5845 = vmatprep.mubr.msk.f32.mxu0 %vm9237_vm8, %v4092_v7  ;;  %6271 = vmatpush3.bf16.msra.mxu0 %v6268_v22  ;;  %v4358_v23 = vsel %vm9256_vm7, %v9255_v0, %v4277_v1  ;;  %vm9257_vm8 = vmmov %vm9204_vm0  ;;  %v4359_v22 = vsel %vm9260_vm12, %v9259_v47, %v4279_v61 }
0x155f   : > { %6273 = vmatprep.subr.bf16.mxu0 %v6272_v41  ;;  %6283 = vmatpush3.bf16.msra.mxu1 %v6272_v41 }
0x1561   : > { %5846 = vmatmul.mubr.msk.f32.gmra.mrb[54].mxu0 %vm9238_vm9, %v4093_v62  ;;  %v4269_v20 = vpop.permute.xlu0 %4268  ;;  %v4309_v49 = vpop.permute.xlu1 %4308  ;;  %v9241_v62 = vld [vmem:[#allocation9_spill] sm:$0xff]  ;;  %vm9258_vm9 = vmmov %vm9204_vm0 }
0x1562   : > { %6275 = vmatpush3.bf16.msra.mxu0 %v6272_v41  ;;  %v4353_v59 = vsel %vm9242_vm10, %v9241_v62, %v4267_v60  ;;  %v4354_v8 = vsel %vm9245_vm1, %v9244_v57, %v4269_v20  ;;  %v4367_v46 = vsel %vm4360_vm15, %v4358_v23, %v4309_v49  ;;  %vm9261_vm10 = vmmov %vm9204_vm0 }
0x1563   : > { %v4362_v9 = vsel %vm4360_vm15, %v4353_v59, %v4299_v21  ;;  %vm9265_vm1 = vmmov %vm9204_vm0 }
0x1565   : > { %v4271_v15 = vpop.permute.xlu0 %4270  ;;  %v4311_v31 = vpop.permute.xlu1 %4310 }
0x1566   : > { %v4355_v26 = vsel %vm9248_vm3, %v9247_v42, %v4271_v15  ;;  %v4368_v24 = vsel %vm4360_vm15, %v4359_v22, %v4311_v31  ;;  %vm9267_vm3 = vmmov %vm9204_vm0 }
0x1569   : > { %v4301_v14 = vpop.permute.xlu0 %4300 }
0x156a   : > { %v4363_v5 = vsel %vm4360_vm15, %v4354_v8, %v4301_v14 }
0x156d   : > { %v4303_v48 = vpop.permute.xlu0 %4302 }
0x156e   : > { %v4364_v45 = vsel %vm4360_vm15, %v4355_v26, %v4303_v48  ;;  %vm9263_vm15 = vmmov %vm9204_vm0 }
0x1628   : > { %v5838_v29 = vpop.f32.mrb[48].mxu0 }
0x1629   : > { %4330 = vrot.lane.b32.xlu0 %v5838_v29, %s9147_s16  ;;  %v4217_v52 = vpop.f32.mrb[49].mxu0  ;;  %v5108_v29 = vld [vmem:[%s8883_s7] ss:$0 sm:$0xff] }
0x162c   : > { %v5841_v33 = vpop.f32.mrb[50].mxu0 }
0x162d   : > { %4328 = vrot.lane.b32.xlu0 %v4217_v52, %s9147_s16  ;;  %v4227_v32 = vpop.f32.mrb[51].mxu0 }
0x1630   : > { %v5844_v38 = vpop.f32.mrb[52].mxu0 }
0x1631   : > { %4332 = vrot.lane.b32.xlu0 %v4227_v32, %s9147_s16  ;;  %4338 = vrot.lane.b32.xlu1 %v5844_v38, %s9147_s16  ;;  %v4237_v55 = vpop.f32.mrb[53].mxu0 }
0x1634   : > { %v5847_v27 = vpop.f32.mrb[54].mxu0 }
0x1635   : > { %4334 = vrot.lane.b32.xlu0 %v5841_v33, %s9147_s16  ;;  %4336 = vrot.lane.b32.xlu1 %v4237_v55, %s9147_s16  ;;  %v4247_v50 = vpop.f32.mrb[55].mxu0 }
0x1639   : > { %4340 = vrot.lane.b32.xlu1 %v4247_v50, %s9147_s16 }
0x163d   : > { %4342 = vrot.lane.b32.xlu1 %v5847_v27, %s9147_s16  ;;  %s4802_s16 = sshll.u32 %s7473_s18, 6 }
0x163e   : > { %s8740_s27 = scalar_lea.vmem [#allocation2], %s4802_s16 }
0x163f   : > { %4526 = vst.msk [vmem:[%s8740_s27] sm:$0xff] %vm9263_vm15, %v5108_v29 }
0x1640   : > { %4529 = vst.msk [vmem:[%s8740_s27 + $0x18] sm:$0xff] %vm9265_vm1, %v5108_v29 }
0x1641   : > { %4530 = vst.msk [vmem:[%s8740_s27 + $0x20] sm:$0xff] %vm9204_vm0, %v5108_v29 }
0x1642   : > { %4532 = vst.msk [vmem:[%s8740_s27 + $0x30] sm:$0xff] %vm9267_vm3, %v5108_v29 }
0x1643   : > { %4533 = vst.msk [vmem:[%s8740_s27 + $0x38] sm:$0xff] %vm9268_vm4, %v5108_v29 }
0x169b   : > { %v4331_v7 = vpop.permute.xlu0 %4330 }
0x169c   : > { %v4371_v6 = vsel %vm4369_vm13, %v4362_v9, %v4331_v7 }
0x169f   : > { %v4329_v35 = vpop.permute.xlu0 %4328 }
0x16a0   : > { %v4370_v12 = vsel %vm4369_vm13, %v4361_v37, %v4329_v35 }
0x16a1   : > { %5864 = vmatprep.mubr.msk.f32.mxu0 %vm9243_vm14, %v4370_v12  ;;  %vm9262_vm14 = vmmov %vm9204_vm0 }
0x16a2   : > { %5865 = vmatmul.mubr.msk.f32.vlgmr.msra.gmra.mrb[56].mxu0 %vm9204_vm0, %v4371_v6  ;;  %4527 = vst.msk [vmem:[%s8740_s27 + $0x8] sm:$0xff] %vm9262_vm14, %v5108_v29 }
0x16a3   : > { %v4333_v13 = vpop.permute.xlu0 %4332  ;;  %v4339_v34 = vpop.permute.xlu1 %4338 }
0x16a4   : > { %v4372_v2 = vsel %vm4369_vm13, %v4363_v5, %v4333_v13  ;;  %v4375_v28 = vsel %vm4369_vm13, %v4366_v53, %v4339_v34 }
0x16a5   : > { %5867 = vmatprep.mubr.msk.f32.mxu0 %vm9246_vm11, %v4372_v2  ;;  %vm9266_vm11 = vmmov %vm9204_vm0 }
0x16a6   : > { %4531 = vst.msk [vmem:[%s8740_s27 + $0x28] sm:$0xff] %vm9266_vm11, %v5108_v29 }
0x16a7   : > { %v4335_v40 = vpop.permute.xlu0 %4334  ;;  %v4337_v36 = vpop.permute.xlu1 %4336 }
0x16a8   : > { %v4373_v16 = vsel %vm4369_vm13, %v4364_v45, %v4335_v40  ;;  %v4374_v58 = vsel %vm4369_vm13, %v4365_v17, %v4337_v36 }
0x16a9   : > { %5868 = vmatmul.mubr.msk.f32.gmra.mrb[58].mxu0 %vm9253_vm6, %v4373_v16  ;;  %5870 = vmatprep.mubr.msk.f32.mxu1 %vm9254_vm2, %v4374_v58 }
0x16aa   : > { %5871 = vmatmul.mubr.msk.f32.vlgmr.msra.gmra.mrb[56].mxu1 %vm9257_vm8, %v4375_v28 }
0x16ab   : > { %v4341_v63 = vpop.permute.xlu1 %4340 }
0x16ac   : > { %v4376_v11 = vsel %vm4369_vm13, %v4367_v46, %v4341_v63 }
0x16ad   : > { %5873 = vmatprep.mubr.msk.f32.mxu1 %vm9258_vm9, %v4376_v11 }
0x16af   : > { %v4343_v18 = vpop.permute.xlu1 %4342 }
0x16b0   : > { %v4377_v41 = vsel %vm4369_vm13, %v4368_v24, %v4343_v18  ;;  %vm9264_vm13 = vmmov %vm9204_vm0 }
0x16b1   : > { %5874 = vmatmul.mubr.msk.f32.gmra.mrb[58].mxu1 %vm9261_vm10, %v4377_v41  ;;  %4528 = vst.msk [vmem:[%s8740_s27 + $0x10] sm:$0xff] %vm9264_vm13, %v5108_v29 }
0x16b2   : > { %6638 = shalt.err (!%p6635_p5)
}
0x16b3   : > { %s6639_s26 = scalar_lea.hbm %s8762_s5, 4096  ;;  %s6643_s1 = scalar_lea.hbm %s8885_s9, 8192 }
0x16b4   : > { %p6640_p6 = scmp.ne.s32.totalorder %s8762_s5, %s6639_s26  ;;  %p6644_p10 = scmp.lt.u32.totalorder %s8762_s5, %s8885_s9 }
0x16b5   : > { %p6645_p11 = scmp.lt.u32.totalorder %s6643_s1, %s6639_s26  ;;  %p6647_p13 = scmp.lt.u32.totalorder %s6639_s26, %s8762_s5 }
0x16b6   : > { %p6641_p7 = pnand %p6640_p6, %p6842_p4 }
0x16b7   : > { %p6646_p12 = por %p6645_p11, %p6644_p10 }
0x16b8   : > { %p6642_p9 = pneg %p6641_p7 }
0x16b9   : > { %p6648_p0 = por %p6647_p13, %p6646_p12 }
0x16bb   : > { %p6649_p1 = pnand %p6648_p0, %p6642_p9 }
0x16bd   : > { %6652 = shalt.err (!%p6649_p1)
}
0x16be   : > { %s6749_s2 = smov 128   ;;  %s6750_s29 = smov 8   ;;  %v4535_v52 = vld [vmem:[%s8740_s27 + $0x8] sm:$0xff]  ;;  %v4534_v33 = vld [vmem:[%s8740_s27] sm:$0xff]  ;;  %vm9269_vm5 = vmmov %vm9204_vm0 }
0x16bf   : > { %6285 = dma.vmem_to_hbm [thread:$0]  (%p6842_p4), %s8765_s17, 4096, %s8762_s5, %s4564_s23, %s6749_s2, %s6749_s2, %s6750_s29   ;;  %vm9270_vm6 = vmmov %vm9204_vm0 }
0x16c0   : > { %v4537_v50 = vld [vmem:[%s8740_s27 + $0x18] sm:$0xff]  ;;  %v4536_v25 = vld [vmem:[%s8740_s27 + $0x10] sm:$0xff]  ;;  %v4539_v60 = vld [vmem:[%s8740_s27 + $0x28] sm:$0xff]  ;;  %s5118_s5 = sshll.u32 %s6727_s12, 10  ;;  %s4577_s17 = sshll.u32 %s8740_s27, 4  ;;  %s8821_s17 = int_to_ptr.vmem [resolvable:$true] %s4577_s17 }
0x16c1   : > { %v4538_v44 = vld [vmem:[%s8740_s27 + $0x20] sm:$0xff]  ;;  %vm9271_vm2 = vmmov %vm9204_vm0  ;;  %v4541_v14 = vld [vmem:[%s8740_s27 + $0x38] sm:$0xff]  ;;  %s8819_s25 = scalar_lea.hbm %s8884_s8, %s5118_s5  ;;  %s4559_s12 = scalar_lea.sflag [#allocation3], %s7473_s18 }
0x16c2   : > { %vm9272_vm7 = vmmov %vm9204_vm0  ;;  %v4540_v61 = vld [vmem:[%s8740_s27 + $0x30] sm:$0xff]  ;;  %s6653_s24 = scalar_lea.vmem %s8821_s17, 1024  ;;  %s6751_s26 = smov [#allocation2]  }
0x16c3   : > { %vm9273_vm8 = vmmov %vm9204_vm0  ;;  %p6654_p2 = scmp.ne.s32.totalorder %s8821_s17, %s6653_s24  ;;  %s6657_s16 = sshll.u32 %s6751_s26, 4  ;;  %s6658_s16 = int_to_ptr.vmem [resolvable:$false] %s6657_s16 }
0x16c4   : > { %vm9274_vm9 = vmmov %vm9204_vm0  ;;  %s6659_s28 = scalar_lea.vmem %s6658_s16, 2048  ;;  %p6660_p6 = scmp.lt.s32.totalorder %s8821_s17, %s6658_s16 }
0x16c5   : > { %vm9275_vm12 = vmmov %vm9204_vm0  ;;  %p6655_p3 = pnand %p6654_p2, %p6842_p4  ;;  %p6661_p7 = scmp.lt.s32.totalorder %s6659_s28, %s6653_s24 }
0x16c6   : > { %vm9276_vm10 = vmmov %vm9204_vm0 }
0x16c7   : > { %p6656_p5 = pneg %p6655_p3  ;;  %p6662_p9 = por %p6661_p7, %p6660_p6 }
0x16c9   : > { %p6663_p10 = pnand %p6662_p9, %p6656_p5 }
0x1775   : > { %v5866_v32 = vpop.f32.mrb[56].mxu0 }
0x1776   : > { %v4543_v38 = vadd.f32 %v5866_v32, %v4535_v52  ;;  %v4476_v55 = vpop.f32.mrb[57].mxu0 }
0x1777   : > { %v4542_v27 = vadd.f32 %v4534_v33, %v4476_v55 }
0x1778   : > { %4551 = vst.msk [vmem:[%s8740_s27 + $0x8] sm:$0xff] %vm9269_vm5, %v4543_v38 }
0x1779   : > { %4550 = vst.msk [vmem:[%s8740_s27] sm:$0xff] %vm9270_vm6, %v4542_v27 }
0x177c   : > { %v5869_v30 = vpop.f32.mrb[58].mxu0 }
0x177d   : > { %v4545_v4 = vadd.f32 %v5869_v30, %v4537_v50  ;;  %v4486_v21 = vpop.f32.mrb[59].mxu0  ;;  %v5872_v43 = vpop.f32.mrb[56].mxu1 }
0x177e   : > { %v4544_v20 = vadd.f32 %v4536_v25, %v4486_v21  ;;  %v4547_v54 = vadd.f32 %v5872_v43, %v4539_v60  ;;  %v4496_v15 = vpop.f32.mrb[57].mxu1 }
0x177f   : > { %4553 = vst.msk [vmem:[%s8740_s27 + $0x18] sm:$0xff] %vm9271_vm2, %v4545_v4  ;;  %v4546_v1 = vadd.f32 %v4538_v44, %v4496_v15 }
0x1780   : > { %4552 = vst.msk [vmem:[%s8740_s27 + $0x10] sm:$0xff] %vm9272_vm7, %v4544_v20 }
0x1781   : > { %4555 = vst.msk [vmem:[%s8740_s27 + $0x28] sm:$0xff] %vm9273_vm8, %v4547_v54 }
0x1782   : > { %4554 = vst.msk [vmem:[%s8740_s27 + $0x20] sm:$0xff] %vm9274_vm9, %v4546_v1 }
0x1784   : > { %v5875_v48 = vpop.f32.mrb[58].mxu1 }
0x1785   : > { %v4549_v49 = vadd.f32 %v5875_v48, %v4541_v14  ;;  %v4506_v7 = vpop.f32.mrb[59].mxu1 }
0x1786   : > { %v4548_v56 = vadd.f32 %v4540_v61, %v4506_v7 }
0x1787   : > { %4557 = vst.msk [vmem:[%s8740_s27 + $0x38] sm:$0xff] %vm9275_vm12, %v4549_v49 }
0x1788   : > { %4556 = vst.msk [vmem:[%s8740_s27 + $0x30] sm:$0xff] %vm9276_vm10, %v4548_v56 }
0x1789   : > { %6666 = shalt.err (!%p6663_p10)
}
0x178a   : > { %s6667_s27 = scalar_lea.hbm %s8819_s25, 1024  ;;  %s6671_s20 = scalar_lea.hbm %s8884_s8, 2048 }
0x178b   : > { %p6668_p11 = scmp.ne.s32.totalorder %s8819_s25, %s6667_s27  ;;  %p6672_p0 = scmp.lt.u32.totalorder %s8819_s25, %s8884_s8 }
0x178c   : > { %p6673_p1 = scmp.lt.u32.totalorder %s6671_s20, %s6667_s27  ;;  %p6675_p3 = scmp.lt.u32.totalorder %s6667_s27, %s8819_s25 }
0x178d   : > { %p6669_p12 = pnand %p6668_p11, %p6842_p4 }
0x178e   : > { %p6674_p2 = por %p6673_p1, %p6672_p0 }
0x178f   : > { %p6670_p13 = pneg %p6669_p12 }
0x1790   : > { %p6676_p5 = por %p6675_p3, %p6674_p2 }
0x1792   : > { %p6677_p6 = pnand %p6676_p5, %p6670_p13 }
0x1794   : > { %6680 = shalt.err (!%p6677_p6)
}
0x1795   : > { %6284 = dma.vmem_to_hbm [thread:$0]  (%p6842_p4), %s8821_s17, 1024, %s8819_s25, %s4559_s12, %s6749_s2, %s6749_s2, %s6750_s29  }
0x1796 PF: > { %p6295_p7 = scmp.ge.s32.totalorder %s6735_s14, 2  ;;  %s4611_s15 = sand.u32 1, %s6715_s30  }
0x1797   : > { %s4612_s24 = scalar_lea.sflag [#allocation3], %s4611_s15 }
0x1798   : > { %p6289_p9 = pnand %p6295_p7, %p6849_p8 }
0x179a   : > { %6706 = dma.done.wait (!%p6289_p9), %s4612_s24, 1024  }
0x179b   : > { %6708 = vsyncadd (!%p6289_p9), %s4612_s24, 4294966272  ;;  %s4621_s19 = scalar_lea.sflag [#allocation5], %s4611_s15 }
0x179c   : > { %6710 = dma.done.wait (!%p6289_p9), %s4621_s19, 4096  }
0x179d   : > { %6712 = vsyncadd (!%p6289_p9), %s4621_s19, 4294963200  ;;  %s26_s14 = sadd.s32 1, %s6735_s14   ;;  %s9277_s18 = sld [smem:[#allocation8_spill]] }
0x179e   : > { %p23_p10 = scmp.ge.s32.totalorder %s26_s14, 4   ;;  %s9278_s30 = smov %s6719_s10 }
0x179f   : > { %s9279_s10 = smov %s6723_s11  ;;  %s9280_s11 = smov %s6855_s22 }
0x17a0   : > { %s9281_s12 = smov %s6731_s13  ;;  %25 = sbr.rel (!%p23_p10) target bundleno = 11 (0xb), region = 138 }
0x17a3   : > { %s9282_s13 = smov %s9277_s18 }
0x17a7   :  { %4626 = vsyncpa [#allocation3], 1 }
0x17a8   :  { %4628 = vsyncpa [#allocation3 + $0x1], 1 }
0x17a9   :  { %4629 = vsyncpa [#allocation5], 1 }
0x17aa   :  { %4631 = vsyncpa [#allocation5 + $0x1], 1 }

</bundles_post_ra>
